<compile_context>
chip_gen: v7x
topology: tpu7x:2x2x1
jax: 0.10.0
libtpu: 0.0.40
codegen_flags: <defaults>
</compile_context>

<pallas_src>
import math

import jax
import jax.numpy as jnp
from jax import lax
from jax.experimental import pallas as pl
from jax.experimental.pallas import tpu as pltpu


def _prefer_batch_grid():
    """grid=(B,) only pays off when a device exposes >1 TensorCore (v7x / megacore)."""
    try:
        kind = jax.devices()[0].device_kind.lower()
    except Exception:
        return False
    return ("v7" in kind) or ("7x" in kind) or ("v4" in kind) or ("v5p" in kind)


def _make_emsa_kernel(*, nq, nk, nk_pad, C, h, d_k, d_v, KK, nb):
    eps = 1e-5
    dn_qkT = (((1,), (1,)), ((), ()))          # contract dim 1 of q with dim 1 of k -> q @ k^T
    inv_nk = 1.0 / nk                          # exact InstanceNorm mean of a softmax output
    inv_cnt = 1.0 / (nq * nk)                  # statistics use the REAL nk, not the padded one

    def kernel(q_in_ref, xtaps_ref,
               wq_ref, bq_ref, wkv_ref, bkv_ref, wo_ref, bo_ref,
               srw_ref, srb_ref, lng_ref, lnb_ref,
               tw_ref, tb_ref,
               out_ref):
        # ---- stack batches into the M dimension (free leading-dim reshape) ----
        q_rows = q_in_ref[...].reshape(nb * nq, C)                  # (nb*nq, C)

        # ---- depthwise sr_conv: KK vectorized FMAs, 4-way partial-sum tree ----
        accs = [None, None, None, None]
        for t in range(KK):
            term = xtaps_ref[t].reshape(nb * nk_pad, C) * srw_ref[t:t + 1, :]
            j = t & 3
            accs[j] = term if accs[j] is None else accs[j] + term
        parts = [a for a in accs if a is not None]
        while len(parts) > 1:
            parts = [parts[i] + parts[i + 1] if i + 1 < len(parts) else parts[i]
                     for i in range(0, len(parts), 2)]
        xs = parts[0] + srb_ref[...]                                # (nb*nk_pad, C)

        # ---- LayerNorm over the channel dim (f32 statistics) ----
        mu = jnp.mean(xs, axis=-1, keepdims=True)
        var = jnp.mean((xs - mu) ** 2, axis=-1, keepdims=True)
        xs = (xs - mu) * lax.rsqrt(var + eps) * lng_ref[...] + lnb_ref[...]

        # ---- projections: Q, and fused K|V (N=128 fills one MXU tile). bf16 ops, f32 acc ----
        q_all = jnp.dot(q_rows.astype(jnp.bfloat16), wq_ref[...],
                        preferred_element_type=jnp.float32) + bq_ref[...]    # (nb*nq, h*d_k)
        kv_all = jnp.dot(xs.astype(jnp.bfloat16), wkv_ref[...],
                         preferred_element_type=jnp.float32) + bkv_ref[...]  # (nb*nk_pad, h*(d_k+d_v))

        if nk_pad > nk:
            kmask = lax.broadcasted_iota(jnp.int32, (1, nk_pad), 1) < nk     # (1, nk_pad)
        else:
            kmask = None

        for b in range(nb):
            qb = q_all[b * nq:(b + 1) * nq, :]                      # (nq, h*d_k)  sublane-aligned
            kvb = kv_all[b * nk_pad:(b + 1) * nk_pad, :]            # (nk_pad, h*(d_k+d_v))

            # per-head scaled logits (scale pre-folded into tw in the wrapper)
            att = [lax.dot_general(qb[:, i * d_k:(i + 1) * d_k],
                                   kvb[:, i * d_k:(i + 1) * d_k],
                                   dn_qkT, preferred_element_type=jnp.float32)
                   for i in range(h)]                               # h x (nq, nk_pad)

            # transform (1x1 head-mix -> softmax -> InstanceNorm2d) -> att @ V -> fc_o slice,
            # accumulated per output head into a running (nq, C) f32 value.
            acc = jnp.zeros((nq, C), jnp.float32)
            for o in range(h):
                mixed = att[0] * tw_ref[o, 0]
                for j in range(1, h):
                    mixed = mixed + att[j] * tw_ref[o, j]
                mixed = mixed + tb_ref[0, o]
                if kmask is not None:
                    mixed = jnp.where(kmask, mixed, -1e30)          # mask padded keys
                m = jnp.max(mixed, axis=-1, keepdims=True)
                e = jnp.exp(mixed - m)
                p = e / jnp.sum(e, axis=-1, keepdims=True)          # exact divide (see header)
                # InstanceNorm2d (affine=False): mean is exactly 1/nk for a softmax output.
                ivar = jnp.sum(p * p) * inv_cnt - inv_nk * inv_nk
                pn = (p - inv_nk) * lax.rsqrt(ivar + eps)
                if kmask is not None:
                    pn = jnp.where(kmask, pn, 0.0)                  # padded keys contribute 0
                # dropout (p=0.1) is identity at inference time.
                vh = kvb[:, h * d_k + o * d_v: h * d_k + (o + 1) * d_v]      # (nk_pad, d_v)
                head_out = jnp.dot(pn, vh, preferred_element_type=jnp.float32)   # (nq, d_v) f32
                acc = acc + jnp.dot(head_out, wo_ref[o * d_v:(o + 1) * d_v, :],
                                    preferred_element_type=jnp.float32)
            out_ref[b] = acc + bo_ref[...]

    return kernel


def emsa_forward(queries, params, *, H, W, h, d_k, d_v, ratio, batch_in_grid=None):
    B, nq, C = queries.shape
    assert nq == H * W
    if batch_in_grid is None:
        batch_in_grid = _prefer_batch_grid()

    K = ratio + 1
    stride = ratio
    pad = ratio // 2
    Ho = (H + 2 * pad - K) // stride + 1
    Wo = (W + 2 * pad - K) // stride + 1
    nk = Ho * Wo
    KK = K * K
    nk_pad = ((nk + 7) // 8) * 8                    # sublane-aligned key rows (masked in-kernel)

    # Tap extraction (im2col, tap-major, channels-last). Pure layout plumbing — the conv
    # arithmetic (taps * depthwise weights, accumulation, bias) stays in-kernel.
    x_pad = jnp.pad(queries.reshape(B, H, W, C),
                    ((0, 0), (pad, pad), (pad, pad), (0, 0)))
    taps = []
    for kh in range(K):
        for kw in range(K):
            taps.append(lax.slice(
                x_pad,
                (0, kh, kw, 0),
                (B, kh + (Ho - 1) * stride + 1, kw + (Wo - 1) * stride + 1, C),
                (1, stride, stride, 1)).reshape(B, nk, C))
    x_taps = jnp.stack(taps, axis=0)                                # (KK, B, nk, C)
    if nk_pad > nk:
        x_taps = jnp.pad(x_taps, ((0, 0), (0, 0), (0, nk_pad - nk), (0, 0)))

    # Weight prep: bf16 projection weights, fused K|V, scale folded into tw.
    wq_bf = params["wq"].astype(jnp.bfloat16)                       # (C, h*d_k)
    wkv_bf = jnp.concatenate([params["wk"], params["wv"]], axis=1).astype(jnp.bfloat16)
    bkv = jnp.concatenate([params["bk"], params["bv"]], axis=1)     # (1, h*(d_k+d_v))
    tw_scaled = params["tw"] * (1.0 / math.sqrt(d_k))               # fold 1/sqrt(d_k), bias untouched

    nb = 1 if batch_in_grid else B
    grid = (B,) if batch_in_grid else (1,)

    kernel = _make_emsa_kernel(nq=nq, nk=nk, nk_pad=nk_pad, C=C, h=h,
                               d_k=d_k, d_v=d_v, KK=KK, nb=nb)

    def full2d(a):
        return pl.BlockSpec(a.shape, lambda b: (0, 0))

    smem_spec = pl.BlockSpec(memory_space=pltpu.MemorySpace.SMEM)

    if batch_in_grid:
        q_spec = pl.BlockSpec((1, nq, C), lambda b: (b, 0, 0))
        taps_spec = pl.BlockSpec((KK, 1, nk_pad, C), lambda b: (0, b, 0, 0))
        out_spec = pl.BlockSpec((1, nq, C), lambda b: (b, 0, 0))
    else:
        q_spec = pl.BlockSpec((B, nq, C), lambda b: (0, 0, 0))
        taps_spec = pl.BlockSpec((KK, B, nk_pad, C), lambda b: (0, 0, 0, 0))
        out_spec = pl.BlockSpec((B, nq, C), lambda b: (0, 0, 0))

    in_specs = [
        q_spec, taps_spec,
        full2d(wq_bf), full2d(params["bq"]),
        full2d(wkv_bf), full2d(bkv),
        full2d(params["wo"]), full2d(params["bo"]),
        full2d(params["sr_w"]), full2d(params["sr_b"]),
        full2d(params["ln_g"]), full2d(params["ln_b"]),
        smem_spec, smem_spec,
    ]

    flops_per_b = (
        2 * nk_pad * KK * C                         # depthwise sr_conv
        + 2 * nq * C * h * d_k                      # fc_q
        + 2 * nk_pad * C * h * (d_k + d_v)          # fused fc_k|fc_v
        + 2 * h * nq * d_k * nk_pad                 # q @ k^T
        + 2 * h * h * nq * nk_pad                   # head-mix 1x1 conv
        + 2 * h * nq * nk_pad * d_v                 # att @ v
        + 2 * nq * h * d_v * C                      # fc_o
    )
    bytes_per_b = (
        4 * (nq * C * 2 + KK * nk_pad * C)                              # queries in/out + taps
        + 2 * (C * h * d_k + C * h * (d_k + d_v))                       # bf16 projection weights
        + 4 * (h * d_v * C + KK * C + 8 * C + h * d_k + h * (d_k + d_v) + h * h + h)
    )
    cost = pl.CostEstimate(flops=B * flops_per_b,
                           transcendentals=B * h * nq * nk_pad,
                           bytes_accessed=B * bytes_per_b)

    return pl.pallas_call(
        kernel,
        out_shape=jax.ShapeDtypeStruct((B, nq, C), jnp.float32),
        grid_spec=pltpu.PrefetchScalarGridSpec(
            num_scalar_prefetch=0,
            grid=grid,
            in_specs=in_specs,
            out_specs=out_spec,
        ),
        compiler_params=pltpu.CompilerParams(
            dimension_semantics=("parallel",),
            vmem_limit_bytes=16 * 1024 * 1024),
        cost_estimate=cost,
    )(queries, x_taps,
      wq_bf, params["bq"], wkv_bf, bkv,
      params["wo"], params["bo"],
      params["sr_w"], params["sr_b"], params["ln_g"], params["ln_b"],
      tw_scaled, params["tb"])


def init_params(key, *, d_model, d_k, d_v, h, ratio):
    C = d_model
    K = ratio + 1
    ks = jax.random.split(key, 6)
    std = 0.001  # nn.Linear init in the module: normal(std=0.001), bias = 0
    wq = jax.random.normal(ks[0], (C, h * d_k), jnp.float32) * std
    wk = jax.random.normal(ks[1], (C, h * d_k), jnp.float32) * std
    wv = jax.random.normal(ks[2], (C, h * d_v), jnp.float32) * std
    wo = jax.random.normal(ks[3], (h * d_v, C), jnp.float32) * std
    bq = jnp.zeros((1, h * d_k), jnp.float32)
    bk = jnp.zeros((1, h * d_k), jnp.float32)
    bv = jnp.zeros((1, h * d_v), jnp.float32)
    bo = jnp.zeros((1, C), jnp.float32)
    # depthwise sr_conv: PyTorch weight (C, 1, K, K); kaiming_normal fan_out
    sr_w_oikk = jax.random.normal(ks[4], (C, 1, K, K), jnp.float32) * math.sqrt(2.0 / (K * K))
    sr_w = jnp.transpose(sr_w_oikk[:, 0], (1, 2, 0)).reshape(K * K, C)   # (K*K, C) channels-last
    sr_b = jnp.zeros((1, C), jnp.float32)
    ln_g = jnp.ones((1, C), jnp.float32)
    ln_b = jnp.zeros((1, C), jnp.float32)
    # transform 1x1 conv over heads: PyTorch weight (h, h, 1, 1); kaiming_normal fan_out
    tw = jax.random.normal(ks[5], (h, h), jnp.float32) * math.sqrt(2.0 / h)
    tb = jnp.zeros((1, h), jnp.float32)
    return dict(wq=wq, bq=bq, wk=wk, bk=bk, wv=wv, bv=bv, wo=wo, bo=bo,
                sr_w=sr_w, sr_w_oikk=sr_w_oikk, sr_b=sr_b,
                ln_g=ln_g, ln_b=ln_b, tw=tw, tb=tb)


def emsa_reference(queries, params, *, H, W, h, d_k, d_v, ratio):
    # Pure-JAX (f32) mirror of the PyTorch forward (ratio > 1 branch, eval mode).
    B, nq, C = queries.shape
    pad = ratio // 2
    q = (queries @ params["wq"] + params["bq"]).reshape(B, nq, h, d_k).transpose(0, 2, 1, 3)
    x = jnp.transpose(queries, (0, 2, 1)).reshape(B, C, H, W)
    x = lax.conv_general_dilated(
        x, params["sr_w_oikk"], window_strides=(ratio, ratio),
        padding=((pad, pad), (pad, pad)), feature_group_count=C,
        dimension_numbers=("NCHW", "OIHW", "NCHW")) + params["sr_b"].reshape(1, C, 1, 1)
    x = x.reshape(B, C, -1).transpose(0, 2, 1)
    mu = x.mean(-1, keepdims=True)
    var = ((x - mu) ** 2).mean(-1, keepdims=True)
    x = (x - mu) / jnp.sqrt(var + 1e-5) * params["ln_g"] + params["ln_b"]
    nk = x.shape[1]
    k = (x @ params["wk"] + params["bk"]).reshape(B, nk, h, d_k).transpose(0, 2, 3, 1)
    v = (x @ params["wv"] + params["bv"]).reshape(B, nk, h, d_v).transpose(0, 2, 1, 3)
    att = jnp.matmul(q, k) / math.sqrt(d_k)
    att = jnp.einsum("oi,bipq->bopq", params["tw"], att) + params["tb"].reshape(1, h, 1, 1)
    att = jax.nn.softmax(att, axis=-1)
    imu = att.mean(axis=(-2, -1), keepdims=True)
    ivar = ((att - imu) ** 2).mean(axis=(-2, -1), keepdims=True)
    att = (att - imu) / jnp.sqrt(ivar + 1e-5)
    out = jnp.matmul(att, v).transpose(0, 2, 1, 3).reshape(B, nq, h * d_v)
    return out @ params["wo"] + params["bo"]


if __name__ == "__main__":
    B, H, W = 2, 8, 8
    d_model, d_k, d_v, h, ratio = 32, 16, 16, 4, 3
    nq = H * W

    key = jax.random.PRNGKey(0)
    kq, kp = jax.random.split(key)
    queries = jax.random.normal(kq, (B, nq, d_model), jnp.float32)
    # keys / values arguments of the PyTorch forward are unused when ratio > 1.
    params = init_params(kp, d_model=d_model, d_k=d_k, d_v=d_v, h=h, ratio=ratio)

    ref = jax.block_until_ready(
        emsa_reference(queries, params, H=H, W=W, h=h, d_k=d_k, d_v=d_v, ratio=ratio))

    # Validate both code paths regardless of the device generation:
    #   False -> collapsed single grid step (v5e/v6e);  True -> grid=(B,) (v7x / megacore).
    for mode in (False, True):
        def run(q, _mode=mode):
            return emsa_forward(q, params, H=H, W=W, h=h, d_k=d_k, d_v=d_v,
                                ratio=ratio, batch_in_grid=_mode)
        out = jax.block_until_ready(jax.jit(run)(queries))
        rel = float(jnp.linalg.norm(out - ref) / (jnp.linalg.norm(ref) + 1e-30))
        assert rel < 5e-2, f"batch_in_grid={mode}: kernel vs reference relative error {rel}"

    print("KERNEL_OK")
</pallas_src>

<mosaic_0001>
module attributes {stable_mosaic.version = 11 : i64} {
  func.func @kernel(%arg0: i32, %arg1: memref<2x64x32xf32, #tpu.memory_space<vmem>>, %arg2: memref<16x2x16x32xf32, #tpu.memory_space<vmem>>, %arg3: memref<32x64xbf16, #tpu.memory_space<vmem>>, %arg4: memref<1x64xf32, #tpu.memory_space<vmem>>, %arg5: memref<32x128xbf16, #tpu.memory_space<vmem>>, %arg6: memref<1x128xf32, #tpu.memory_space<vmem>>, %arg7: memref<64x32xf32, #tpu.memory_space<vmem>>, %arg8: memref<1x32xf32, #tpu.memory_space<vmem>>, %arg9: memref<16x32xf32, #tpu.memory_space<vmem>>, %arg10: memref<1x32xf32, #tpu.memory_space<vmem>>, %arg11: memref<1x32xf32, #tpu.memory_space<vmem>>, %arg12: memref<1x32xf32, #tpu.memory_space<vmem>>, %arg13: memref<4x4xf32, #tpu.memory_space<smem>>, %arg14: memref<1x4xf32, #tpu.memory_space<smem>>, %arg15: memref<2x64x32xf32, #tpu.memory_space<vmem>>) attributes {dimension_semantics = [#tpu.dimension_semantics<parallel>], iteration_bounds = array<i64: 1>, scalar_prefetch = 0 : i64, scratch_operands = 0 : i64, tpu.core_type = #tpu.core_type<tc>, window_params = [{pipeline_mode = #tpu.pipeline_mode<synchronous>, transform_indices = @transform_0, window_bounds = array<i64: 2, 64, 32>}, {pipeline_mode = #tpu.pipeline_mode<synchronous>, transform_indices = @transform_1, window_bounds = array<i64: 16, 2, 16, 32>}, {pipeline_mode = #tpu.pipeline_mode<synchronous>, transform_indices = @transform_2, window_bounds = array<i64: 32, 64>}, {pipeline_mode = #tpu.pipeline_mode<synchronous>, transform_indices = @transform_3, window_bounds = array<i64: 1, 64>}, {pipeline_mode = #tpu.pipeline_mode<synchronous>, transform_indices = @transform_4, window_bounds = array<i64: 32, 128>}, {pipeline_mode = #tpu.pipeline_mode<synchronous>, transform_indices = @transform_5, window_bounds = array<i64: 1, 128>}, {pipeline_mode = #tpu.pipeline_mode<synchronous>, transform_indices = @transform_6, window_bounds = array<i64: 64, 32>}, {pipeline_mode = #tpu.pipeline_mode<synchronous>, transform_indices = @transform_7, window_bounds = array<i64: 1, 32>}, {pipeline_mode = #tpu.pipeline_mode<synchronous>, transform_indices = @transform_8, window_bounds = array<i64: 16, 32>}, {pipeline_mode = #tpu.pipeline_mode<synchronous>, transform_indices = @transform_9, window_bounds = array<i64: 1, 32>}, {pipeline_mode = #tpu.pipeline_mode<synchronous>, transform_indices = @transform_10, window_bounds = array<i64: 1, 32>}, {pipeline_mode = #tpu.pipeline_mode<synchronous>, transform_indices = @transform_11, window_bounds = array<i64: 1, 32>}, {transform_indices = @transform_12, window_bounds = array<i64: 4, 4>}, {transform_indices = @transform_13, window_bounds = array<i64: 1, 4>}, {pipeline_mode = #tpu.pipeline_mode<synchronous>, transform_indices = @transform_14, window_bounds = array<i64: 2, 64, 32>}]} {
    %c0 = arith.constant 0 : index
    %c0_0 = arith.constant 0 : index
    %c0_1 = arith.constant 0 : index
    %0 = vector.load %arg1[%c0, %c0_0, %c0_1] : memref<2x64x32xf32, #tpu.memory_space<vmem>>, vector<2x64x32xf32>
    %1 = vector.shape_cast %0 : vector<2x64x32xf32> to vector<128x32xf32>
    %c0_2 = arith.constant 0 : index
    %c0_3 = arith.constant 0 : index
    %c0_4 = arith.constant 0 : index
    %c0_5 = arith.constant 0 : index
    %2 = vector.load %arg2[%c0_2, %c0_3, %c0_4, %c0_5] : memref<16x2x16x32xf32, #tpu.memory_space<vmem>>, vector<1x2x16x32xf32>
    %3 = vector.shape_cast %2 : vector<1x2x16x32xf32> to vector<2x16x32xf32>
    %4 = vector.shape_cast %3 : vector<2x16x32xf32> to vector<32x32xf32>
    %c0_6 = arith.constant 0 : index
    %c0_7 = arith.constant 0 : index
    %5 = vector.load %arg9[%c0_6, %c0_7] : memref<16x32xf32, #tpu.memory_space<vmem>>, vector<1x32xf32>
    %6 = vector.broadcast %5 : vector<1x32xf32> to vector<32x32xf32>
    %7 = arith.mulf %4, %6 : vector<32x32xf32>
    %c1 = arith.constant 1 : index
    %c0_8 = arith.constant 0 : index
    %c0_9 = arith.constant 0 : index
    %c0_10 = arith.constant 0 : index
    %8 = vector.load %arg2[%c1, %c0_8, %c0_9, %c0_10] : memref<16x2x16x32xf32, #tpu.memory_space<vmem>>, vector<1x2x16x32xf32>
    %9 = vector.shape_cast %8 : vector<1x2x16x32xf32> to vector<2x16x32xf32>
    %10 = vector.shape_cast %9 : vector<2x16x32xf32> to vector<32x32xf32>
    %c1_11 = arith.constant 1 : index
    %c0_12 = arith.constant 0 : index
    %11 = vector.load %arg9[%c1_11, %c0_12] : memref<16x32xf32, #tpu.memory_space<vmem>>, vector<1x32xf32>
    %12 = vector.broadcast %11 : vector<1x32xf32> to vector<32x32xf32>
    %13 = arith.mulf %10, %12 : vector<32x32xf32>
    %c2 = arith.constant 2 : index
    %c0_13 = arith.constant 0 : index
    %c0_14 = arith.constant 0 : index
    %c0_15 = arith.constant 0 : index
    %14 = vector.load %arg2[%c2, %c0_13, %c0_14, %c0_15] : memref<16x2x16x32xf32, #tpu.memory_space<vmem>>, vector<1x2x16x32xf32>
    %15 = vector.shape_cast %14 : vector<1x2x16x32xf32> to vector<2x16x32xf32>
    %16 = vector.shape_cast %15 : vector<2x16x32xf32> to vector<32x32xf32>
    %c2_16 = arith.constant 2 : index
    %c0_17 = arith.constant 0 : index
    %17 = vector.load %arg9[%c2_16, %c0_17] : memref<16x32xf32, #tpu.memory_space<vmem>>, vector<1x32xf32>
    %18 = vector.broadcast %17 : vector<1x32xf32> to vector<32x32xf32>
    %19 = arith.mulf %16, %18 : vector<32x32xf32>
    %c3 = arith.constant 3 : index
    %c0_18 = arith.constant 0 : index
    %c0_19 = arith.constant 0 : index
    %c0_20 = arith.constant 0 : index
    %20 = vector.load %arg2[%c3, %c0_18, %c0_19, %c0_20] : memref<16x2x16x32xf32, #tpu.memory_space<vmem>>, vector<1x2x16x32xf32>
    %21 = vector.shape_cast %20 : vector<1x2x16x32xf32> to vector<2x16x32xf32>
    %22 = vector.shape_cast %21 : vector<2x16x32xf32> to vector<32x32xf32>
    %c3_21 = arith.constant 3 : index
    %c0_22 = arith.constant 0 : index
    %23 = vector.load %arg9[%c3_21, %c0_22] : memref<16x32xf32, #tpu.memory_space<vmem>>, vector<1x32xf32>
    %24 = vector.broadcast %23 : vector<1x32xf32> to vector<32x32xf32>
    %25 = arith.mulf %22, %24 : vector<32x32xf32>
    %c4 = arith.constant 4 : index
    %c0_23 = arith.constant 0 : index
    %c0_24 = arith.constant 0 : index
    %c0_25 = arith.constant 0 : index
    %26 = vector.load %arg2[%c4, %c0_23, %c0_24, %c0_25] : memref<16x2x16x32xf32, #tpu.memory_space<vmem>>, vector<1x2x16x32xf32>
    %27 = vector.shape_cast %26 : vector<1x2x16x32xf32> to vector<2x16x32xf32>
    %28 = vector.shape_cast %27 : vector<2x16x32xf32> to vector<32x32xf32>
    %c4_26 = arith.constant 4 : index
    %c0_27 = arith.constant 0 : index
    %29 = vector.load %arg9[%c4_26, %c0_27] : memref<16x32xf32, #tpu.memory_space<vmem>>, vector<1x32xf32>
    %30 = vector.broadcast %29 : vector<1x32xf32> to vector<32x32xf32>
    %31 = arith.mulf %28, %30 : vector<32x32xf32>
    %32 = arith.addf %7, %31 : vector<32x32xf32>
    %c5 = arith.constant 5 : index
    %c0_28 = arith.constant 0 : index
    %c0_29 = arith.constant 0 : index
    %c0_30 = arith.constant 0 : index
    %33 = vector.load %arg2[%c5, %c0_28, %c0_29, %c0_30] : memref<16x2x16x32xf32, #tpu.memory_space<vmem>>, vector<1x2x16x32xf32>
    %34 = vector.shape_cast %33 : vector<1x2x16x32xf32> to vector<2x16x32xf32>
    %35 = vector.shape_cast %34 : vector<2x16x32xf32> to vector<32x32xf32>
    %c5_31 = arith.constant 5 : index
    %c0_32 = arith.constant 0 : index
    %36 = vector.load %arg9[%c5_31, %c0_32] : memref<16x32xf32, #tpu.memory_space<vmem>>, vector<1x32xf32>
    %37 = vector.broadcast %36 : vector<1x32xf32> to vector<32x32xf32>
    %38 = arith.mulf %35, %37 : vector<32x32xf32>
    %39 = arith.addf %13, %38 : vector<32x32xf32>
    %c6 = arith.constant 6 : index
    %c0_33 = arith.constant 0 : index
    %c0_34 = arith.constant 0 : index
    %c0_35 = arith.constant 0 : index
    %40 = vector.load %arg2[%c6, %c0_33, %c0_34, %c0_35] : memref<16x2x16x32xf32, #tpu.memory_space<vmem>>, vector<1x2x16x32xf32>
    %41 = vector.shape_cast %40 : vector<1x2x16x32xf32> to vector<2x16x32xf32>
    %42 = vector.shape_cast %41 : vector<2x16x32xf32> to vector<32x32xf32>
    %c6_36 = arith.constant 6 : index
    %c0_37 = arith.constant 0 : index
    %43 = vector.load %arg9[%c6_36, %c0_37] : memref<16x32xf32, #tpu.memory_space<vmem>>, vector<1x32xf32>
    %44 = vector.broadcast %43 : vector<1x32xf32> to vector<32x32xf32>
    %45 = arith.mulf %42, %44 : vector<32x32xf32>
    %46 = arith.addf %19, %45 : vector<32x32xf32>
    %c7 = arith.constant 7 : index
    %c0_38 = arith.constant 0 : index
    %c0_39 = arith.constant 0 : index
    %c0_40 = arith.constant 0 : index
    %47 = vector.load %arg2[%c7, %c0_38, %c0_39, %c0_40] : memref<16x2x16x32xf32, #tpu.memory_space<vmem>>, vector<1x2x16x32xf32>
    %48 = vector.shape_cast %47 : vector<1x2x16x32xf32> to vector<2x16x32xf32>
    %49 = vector.shape_cast %48 : vector<2x16x32xf32> to vector<32x32xf32>
    %c7_41 = arith.constant 7 : index
    %c0_42 = arith.constant 0 : index
    %50 = vector.load %arg9[%c7_41, %c0_42] : memref<16x32xf32, #tpu.memory_space<vmem>>, vector<1x32xf32>
    %51 = vector.broadcast %50 : vector<1x32xf32> to vector<32x32xf32>
    %52 = arith.mulf %49, %51 : vector<32x32xf32>
    %53 = arith.addf %25, %52 : vector<32x32xf32>
    %c8 = arith.constant 8 : index
    %c0_43 = arith.constant 0 : index
    %c0_44 = arith.constant 0 : index
    %c0_45 = arith.constant 0 : index
    %54 = vector.load %arg2[%c8, %c0_43, %c0_44, %c0_45] : memref<16x2x16x32xf32, #tpu.memory_space<vmem>>, vector<1x2x16x32xf32>
    %55 = vector.shape_cast %54 : vector<1x2x16x32xf32> to vector<2x16x32xf32>
    %56 = vector.shape_cast %55 : vector<2x16x32xf32> to vector<32x32xf32>
    %c8_46 = arith.constant 8 : index
    %c0_47 = arith.constant 0 : index
    %57 = vector.load %arg9[%c8_46, %c0_47] : memref<16x32xf32, #tpu.memory_space<vmem>>, vector<1x32xf32>
    %58 = vector.broadcast %57 : vector<1x32xf32> to vector<32x32xf32>
    %59 = arith.mulf %56, %58 : vector<32x32xf32>
    %60 = arith.addf %32, %59 : vector<32x32xf32>
    %c9 = arith.constant 9 : index
    %c0_48 = arith.constant 0 : index
    %c0_49 = arith.constant 0 : index
    %c0_50 = arith.constant 0 : index
    %61 = vector.load %arg2[%c9, %c0_48, %c0_49, %c0_50] : memref<16x2x16x32xf32, #tpu.memory_space<vmem>>, vector<1x2x16x32xf32>
    %62 = vector.shape_cast %61 : vector<1x2x16x32xf32> to vector<2x16x32xf32>
    %63 = vector.shape_cast %62 : vector<2x16x32xf32> to vector<32x32xf32>
    %c9_51 = arith.constant 9 : index
    %c0_52 = arith.constant 0 : index
    %64 = vector.load %arg9[%c9_51, %c0_52] : memref<16x32xf32, #tpu.memory_space<vmem>>, vector<1x32xf32>
    %65 = vector.broadcast %64 : vector<1x32xf32> to vector<32x32xf32>
    %66 = arith.mulf %63, %65 : vector<32x32xf32>
    %67 = arith.addf %39, %66 : vector<32x32xf32>
    %c10 = arith.constant 10 : index
    %c0_53 = arith.constant 0 : index
    %c0_54 = arith.constant 0 : index
    %c0_55 = arith.constant 0 : index
    %68 = vector.load %arg2[%c10, %c0_53, %c0_54, %c0_55] : memref<16x2x16x32xf32, #tpu.memory_space<vmem>>, vector<1x2x16x32xf32>
    %69 = vector.shape_cast %68 : vector<1x2x16x32xf32> to vector<2x16x32xf32>
    %70 = vector.shape_cast %69 : vector<2x16x32xf32> to vector<32x32xf32>
    %c10_56 = arith.constant 10 : index
    %c0_57 = arith.constant 0 : index
    %71 = vector.load %arg9[%c10_56, %c0_57] : memref<16x32xf32, #tpu.memory_space<vmem>>, vector<1x32xf32>
    %72 = vector.broadcast %71 : vector<1x32xf32> to vector<32x32xf32>
    %73 = arith.mulf %70, %72 : vector<32x32xf32>
    %74 = arith.addf %46, %73 : vector<32x32xf32>
    %c11 = arith.constant 11 : index
    %c0_58 = arith.constant 0 : index
    %c0_59 = arith.constant 0 : index
    %c0_60 = arith.constant 0 : index
    %75 = vector.load %arg2[%c11, %c0_58, %c0_59, %c0_60] : memref<16x2x16x32xf32, #tpu.memory_space<vmem>>, vector<1x2x16x32xf32>
    %76 = vector.shape_cast %75 : vector<1x2x16x32xf32> to vector<2x16x32xf32>
    %77 = vector.shape_cast %76 : vector<2x16x32xf32> to vector<32x32xf32>
    %c11_61 = arith.constant 11 : index
    %c0_62 = arith.constant 0 : index
    %78 = vector.load %arg9[%c11_61, %c0_62] : memref<16x32xf32, #tpu.memory_space<vmem>>, vector<1x32xf32>
    %79 = vector.broadcast %78 : vector<1x32xf32> to vector<32x32xf32>
    %80 = arith.mulf %77, %79 : vector<32x32xf32>
    %81 = arith.addf %53, %80 : vector<32x32xf32>
    %c12 = arith.constant 12 : index
    %c0_63 = arith.constant 0 : index
    %c0_64 = arith.constant 0 : index
    %c0_65 = arith.constant 0 : index
    %82 = vector.load %arg2[%c12, %c0_63, %c0_64, %c0_65] : memref<16x2x16x32xf32, #tpu.memory_space<vmem>>, vector<1x2x16x32xf32>
    %83 = vector.shape_cast %82 : vector<1x2x16x32xf32> to vector<2x16x32xf32>
    %84 = vector.shape_cast %83 : vector<2x16x32xf32> to vector<32x32xf32>
    %c12_66 = arith.constant 12 : index
    %c0_67 = arith.constant 0 : index
    %85 = vector.load %arg9[%c12_66, %c0_67] : memref<16x32xf32, #tpu.memory_space<vmem>>, vector<1x32xf32>
    %86 = vector.broadcast %85 : vector<1x32xf32> to vector<32x32xf32>
    %87 = arith.mulf %84, %86 : vector<32x32xf32>
    %88 = arith.addf %60, %87 : vector<32x32xf32>
    %c13 = arith.constant 13 : index
    %c0_68 = arith.constant 0 : index
    %c0_69 = arith.constant 0 : index
    %c0_70 = arith.constant 0 : index
    %89 = vector.load %arg2[%c13, %c0_68, %c0_69, %c0_70] : memref<16x2x16x32xf32, #tpu.memory_space<vmem>>, vector<1x2x16x32xf32>
    %90 = vector.shape_cast %89 : vector<1x2x16x32xf32> to vector<2x16x32xf32>
    %91 = vector.shape_cast %90 : vector<2x16x32xf32> to vector<32x32xf32>
    %c13_71 = arith.constant 13 : index
    %c0_72 = arith.constant 0 : index
    %92 = vector.load %arg9[%c13_71, %c0_72] : memref<16x32xf32, #tpu.memory_space<vmem>>, vector<1x32xf32>
    %93 = vector.broadcast %92 : vector<1x32xf32> to vector<32x32xf32>
    %94 = arith.mulf %91, %93 : vector<32x32xf32>
    %95 = arith.addf %67, %94 : vector<32x32xf32>
    %c14 = arith.constant 14 : index
    %c0_73 = arith.constant 0 : index
    %c0_74 = arith.constant 0 : index
    %c0_75 = arith.constant 0 : index
    %96 = vector.load %arg2[%c14, %c0_73, %c0_74, %c0_75] : memref<16x2x16x32xf32, #tpu.memory_space<vmem>>, vector<1x2x16x32xf32>
    %97 = vector.shape_cast %96 : vector<1x2x16x32xf32> to vector<2x16x32xf32>
    %98 = vector.shape_cast %97 : vector<2x16x32xf32> to vector<32x32xf32>
    %c14_76 = arith.constant 14 : index
    %c0_77 = arith.constant 0 : index
    %99 = vector.load %arg9[%c14_76, %c0_77] : memref<16x32xf32, #tpu.memory_space<vmem>>, vector<1x32xf32>
    %100 = vector.broadcast %99 : vector<1x32xf32> to vector<32x32xf32>
    %101 = arith.mulf %98, %100 : vector<32x32xf32>
    %102 = arith.addf %74, %101 : vector<32x32xf32>
    %c15 = arith.constant 15 : index
    %c0_78 = arith.constant 0 : index
    %c0_79 = arith.constant 0 : index
    %c0_80 = arith.constant 0 : index
    %103 = vector.load %arg2[%c15, %c0_78, %c0_79, %c0_80] : memref<16x2x16x32xf32, #tpu.memory_space<vmem>>, vector<1x2x16x32xf32>
    %104 = vector.shape_cast %103 : vector<1x2x16x32xf32> to vector<2x16x32xf32>
    %105 = vector.shape_cast %104 : vector<2x16x32xf32> to vector<32x32xf32>
    %c15_81 = arith.constant 15 : index
    %c0_82 = arith.constant 0 : index
    %106 = vector.load %arg9[%c15_81, %c0_82] : memref<16x32xf32, #tpu.memory_space<vmem>>, vector<1x32xf32>
    %107 = vector.broadcast %106 : vector<1x32xf32> to vector<32x32xf32>
    %108 = arith.mulf %105, %107 : vector<32x32xf32>
    %109 = arith.addf %81, %108 : vector<32x32xf32>
    %110 = arith.addf %88, %95 : vector<32x32xf32>
    %111 = arith.addf %102, %109 : vector<32x32xf32>
    %112 = arith.addf %110, %111 : vector<32x32xf32>
    %c0_83 = arith.constant 0 : index
    %c0_84 = arith.constant 0 : index
    %113 = vector.load %arg10[%c0_83, %c0_84] : memref<1x32xf32, #tpu.memory_space<vmem>>, vector<1x32xf32>
    %114 = vector.broadcast %113 : vector<1x32xf32> to vector<32x32xf32>
    %115 = arith.addf %112, %114 : vector<32x32xf32>
    %cst = arith.constant dense<0.000000e+00> : vector<32xf32>
    %116 = vector.multi_reduction <add>, %115, %cst [1] : vector<32x32xf32> to vector<32xf32>
    %117 = vector.shape_cast %116 : vector<32xf32> to vector<32x1xf32>
    %cst_85 = arith.constant 3.200000e+01 : f32
    %118 = vector.broadcast %cst_85 : f32 to vector<32x1xf32>
    %119 = arith.divf %117, %118 : vector<32x1xf32>
    %120 = vector.broadcast %119 : vector<32x1xf32> to vector<32x32xf32>
    %121 = arith.subf %115, %120 : vector<32x32xf32>
    %122 = arith.mulf %121, %121 : vector<32x32xf32>
    %cst_86 = arith.constant dense<0.000000e+00> : vector<32xf32>
    %123 = vector.multi_reduction <add>, %122, %cst_86 [1] : vector<32x32xf32> to vector<32xf32>
    %124 = vector.shape_cast %123 : vector<32xf32> to vector<32x1xf32>
    %cst_87 = arith.constant 3.200000e+01 : f32
    %125 = vector.broadcast %cst_87 : f32 to vector<32x1xf32>
    %126 = arith.divf %124, %125 : vector<32x1xf32>
    %127 = vector.broadcast %119 : vector<32x1xf32> to vector<32x32xf32>
    %128 = arith.subf %115, %127 : vector<32x32xf32>
    %cst_88 = arith.constant 9.99999974E-6 : f32
    %129 = vector.broadcast %cst_88 : f32 to vector<32x1xf32>
    %130 = arith.addf %126, %129 : vector<32x1xf32>
    %131 = math.rsqrt %130 : vector<32x1xf32>
    %132 = vector.broadcast %131 : vector<32x1xf32> to vector<32x32xf32>
    %133 = arith.mulf %128, %132 : vector<32x32xf32>
    %c0_89 = arith.constant 0 : index
    %c0_90 = arith.constant 0 : index
    %134 = vector.load %arg11[%c0_89, %c0_90] : memref<1x32xf32, #tpu.memory_space<vmem>>, vector<1x32xf32>
    %135 = vector.broadcast %134 : vector<1x32xf32> to vector<32x32xf32>
    %136 = arith.mulf %133, %135 : vector<32x32xf32>
    %c0_91 = arith.constant 0 : index
    %c0_92 = arith.constant 0 : index
    %137 = vector.load %arg12[%c0_91, %c0_92] : memref<1x32xf32, #tpu.memory_space<vmem>>, vector<1x32xf32>
    %138 = vector.broadcast %137 : vector<1x32xf32> to vector<32x32xf32>
    %139 = arith.addf %136, %138 : vector<32x32xf32>
    %140 = arith.truncf %1 : vector<128x32xf32> to vector<128x32xbf16>
    %c0_93 = arith.constant 0 : index
    %c0_94 = arith.constant 0 : index
    %141 = vector.load %arg3[%c0_93, %c0_94] : memref<32x64xbf16, #tpu.memory_space<vmem>>, vector<32x64xbf16>
    %cst_95 = arith.constant dense<0.000000e+00> : vector<128x64xf32>
    %142 = tpu.matmul %140, %141, %cst_95 {dimension_numbers = #tpu.dot_dimension_numbers<[1], [0], [0], [1], [0, 0, 1, 1], [], []>} : vector<128x32xbf16>, vector<32x64xbf16>, vector<128x64xf32> -> vector<128x64xf32>
    %c0_96 = arith.constant 0 : index
    %c0_97 = arith.constant 0 : index
    %143 = vector.load %arg4[%c0_96, %c0_97] : memref<1x64xf32, #tpu.memory_space<vmem>>, vector<1x64xf32>
    %144 = vector.broadcast %143 : vector<1x64xf32> to vector<128x64xf32>
    %145 = arith.addf %142, %144 : vector<128x64xf32>
    %146 = arith.truncf %139 : vector<32x32xf32> to vector<32x32xbf16>
    %c0_98 = arith.constant 0 : index
    %c0_99 = arith.constant 0 : index
    %147 = vector.load %arg5[%c0_98, %c0_99] : memref<32x128xbf16, #tpu.memory_space<vmem>>, vector<32x128xbf16>
    %cst_100 = arith.constant dense<0.000000e+00> : vector<32x128xf32>
    %148 = tpu.matmul %146, %147, %cst_100 {dimension_numbers = #tpu.dot_dimension_numbers<[1], [0], [0], [1], [0, 0, 1, 1], [], []>} : vector<32x32xbf16>, vector<32x128xbf16>, vector<32x128xf32> -> vector<32x128xf32>
    %c0_101 = arith.constant 0 : index
    %c0_102 = arith.constant 0 : index
    %149 = vector.load %arg6[%c0_101, %c0_102] : memref<1x128xf32, #tpu.memory_space<vmem>>, vector<1x128xf32>
    %150 = vector.broadcast %149 : vector<1x128xf32> to vector<32x128xf32>
    %151 = arith.addf %148, %150 : vector<32x128xf32>
    %152 = tpu.iota {dimensions = array<i32: 1>} : vector<1x16xi32>
    %c9_i32 = arith.constant 9 : i32
    %153 = vector.broadcast %c9_i32 : i32 to vector<1x16xi32>
    %154 = arith.cmpi slt, %152, %153 : vector<1x16xi32>
    %155 = vector.extract_strided_slice %145 {offsets = [0, 0], sizes = [64, 64], strides = [1, 1]} : vector<128x64xf32> to vector<64x64xf32>
    %156 = vector.extract_strided_slice %151 {offsets = [0, 0], sizes = [16, 128], strides = [1, 1]} : vector<32x128xf32> to vector<16x128xf32>
    %157 = vector.extract_strided_slice %155 {offsets = [0, 0], sizes = [64, 16], strides = [1, 1]} : vector<64x64xf32> to vector<64x16xf32>
    %158 = vector.extract_strided_slice %156 {offsets = [0, 0], sizes = [16, 16], strides = [1, 1]} : vector<16x128xf32> to vector<16x16xf32>
    %cst_103 = arith.constant dense<0.000000e+00> : vector<64x16xf32>
    %159 = tpu.matmul %157, %158, %cst_103 {dimension_numbers = #tpu.dot_dimension_numbers<[1], [1], [0], [0], [0, 0, 1, 0], [], []>} : vector<64x16xf32>, vector<16x16xf32>, vector<64x16xf32> -> vector<64x16xf32>
    %160 = vector.extract_strided_slice %155 {offsets = [0, 16], sizes = [64, 16], strides = [1, 1]} : vector<64x64xf32> to vector<64x16xf32>
    %161 = vector.extract_strided_slice %156 {offsets = [0, 16], sizes = [16, 16], strides = [1, 1]} : vector<16x128xf32> to vector<16x16xf32>
    %cst_104 = arith.constant dense<0.000000e+00> : vector<64x16xf32>
    %162 = tpu.matmul %160, %161, %cst_104 {dimension_numbers = #tpu.dot_dimension_numbers<[1], [1], [0], [0], [0, 0, 1, 0], [], []>} : vector<64x16xf32>, vector<16x16xf32>, vector<64x16xf32> -> vector<64x16xf32>
    %163 = vector.extract_strided_slice %155 {offsets = [0, 32], sizes = [64, 16], strides = [1, 1]} : vector<64x64xf32> to vector<64x16xf32>
    %164 = vector.extract_strided_slice %156 {offsets = [0, 32], sizes = [16, 16], strides = [1, 1]} : vector<16x128xf32> to vector<16x16xf32>
    %cst_105 = arith.constant dense<0.000000e+00> : vector<64x16xf32>
    %165 = tpu.matmul %163, %164, %cst_105 {dimension_numbers = #tpu.dot_dimension_numbers<[1], [1], [0], [0], [0, 0, 1, 0], [], []>} : vector<64x16xf32>, vector<16x16xf32>, vector<64x16xf32> -> vector<64x16xf32>
    %166 = vector.extract_strided_slice %155 {offsets = [0, 48], sizes = [64, 16], strides = [1, 1]} : vector<64x64xf32> to vector<64x16xf32>
    %167 = vector.extract_strided_slice %156 {offsets = [0, 48], sizes = [16, 16], strides = [1, 1]} : vector<16x128xf32> to vector<16x16xf32>
    %cst_106 = arith.constant dense<0.000000e+00> : vector<64x16xf32>
    %168 = tpu.matmul %166, %167, %cst_106 {dimension_numbers = #tpu.dot_dimension_numbers<[1], [1], [0], [0], [0, 0, 1, 0], [], []>} : vector<64x16xf32>, vector<16x16xf32>, vector<64x16xf32> -> vector<64x16xf32>
    %cst_107 = arith.constant 0.000000e+00 : f32
    %169 = vector.broadcast %cst_107 : f32 to vector<64x32xf32>
    %c0_108 = arith.constant 0 : index
    %c0_109 = arith.constant 0 : index
    %170 = memref.load %arg13[%c0_108, %c0_109] : memref<4x4xf32, #tpu.memory_space<smem>>
    %171 = vector.broadcast %170 : f32 to vector<64x16xf32>
    %172 = arith.mulf %159, %171 : vector<64x16xf32>
    %c0_110 = arith.constant 0 : index
    %c1_111 = arith.constant 1 : index
    %173 = memref.load %arg13[%c0_110, %c1_111] : memref<4x4xf32, #tpu.memory_space<smem>>
    %174 = vector.broadcast %173 : f32 to vector<64x16xf32>
    %175 = arith.mulf %162, %174 : vector<64x16xf32>
    %176 = arith.addf %172, %175 : vector<64x16xf32>
    %c0_112 = arith.constant 0 : index
    %c2_113 = arith.constant 2 : index
    %177 = memref.load %arg13[%c0_112, %c2_113] : memref<4x4xf32, #tpu.memory_space<smem>>
    %178 = vector.broadcast %177 : f32 to vector<64x16xf32>
    %179 = arith.mulf %165, %178 : vector<64x16xf32>
    %180 = arith.addf %176, %179 : vector<64x16xf32>
    %c0_114 = arith.constant 0 : index
    %c3_115 = arith.constant 3 : index
    %181 = memref.load %arg13[%c0_114, %c3_115] : memref<4x4xf32, #tpu.memory_space<smem>>
    %182 = vector.broadcast %181 : f32 to vector<64x16xf32>
    %183 = arith.mulf %168, %182 : vector<64x16xf32>
    %184 = arith.addf %180, %183 : vector<64x16xf32>
    %c0_116 = arith.constant 0 : index
    %c0_117 = arith.constant 0 : index
    %185 = memref.load %arg14[%c0_116, %c0_117] : memref<1x4xf32, #tpu.memory_space<smem>>
    %186 = vector.broadcast %185 : f32 to vector<64x16xf32>
    %187 = arith.addf %184, %186 : vector<64x16xf32>
    %cst_118 = arith.constant -1.000000e+30 : f32
    %188 = vector.shape_cast %154 : vector<1x16xi1> to vector<1x16xi1>
    %189 = vector.broadcast %188 : vector<1x16xi1> to vector<64x16xi1>
    %190 = vector.broadcast %cst_118 : f32 to vector<64x16xf32>
    %191 = arith.select %189, %187, %190 : vector<64x16xi1>, vector<64x16xf32>
    %cst_119 = arith.constant dense<0xFF800000> : vector<64xf32>
    %192 = vector.multi_reduction <maximumf>, %191, %cst_119 [1] : vector<64x16xf32> to vector<64xf32>
    %193 = vector.shape_cast %192 : vector<64xf32> to vector<64x1xf32>
    %194 = vector.broadcast %193 : vector<64x1xf32> to vector<64x16xf32>
    %195 = arith.subf %191, %194 : vector<64x16xf32>
    %196 = math.exp %195 : vector<64x16xf32>
    %cst_120 = arith.constant dense<0.000000e+00> : vector<64xf32>
    %197 = vector.multi_reduction <add>, %196, %cst_120 [1] : vector<64x16xf32> to vector<64xf32>
    %198 = vector.shape_cast %197 : vector<64xf32> to vector<64x1xf32>
    %199 = vector.broadcast %198 : vector<64x1xf32> to vector<64x16xf32>
    %200 = arith.divf %196, %199 : vector<64x16xf32>
    %201 = arith.mulf %200, %200 : vector<64x16xf32>
    %202 = vector.shape_cast %201 : vector<64x16xf32> to vector<1x64x16xf32>
    %cst_121 = arith.constant dense<0.000000e+00> : vector<1xf32>
    %203 = vector.multi_reduction <add>, %202, %cst_121 [1, 2] : vector<1x64x16xf32> to vector<1xf32>
    %204 = vector.shape_cast %203 : vector<1xf32> to vector<1x1x1xf32>
    %205 = vector.extract %204[0, 0, 0] : f32 from vector<1x1x1xf32>
    %cst_122 = arith.constant 0.00173611112 : f32
    %206 = arith.mulf %205, %cst_122 : f32
    %cst_123 = arith.constant 0.0123456791 : f32
    %207 = arith.subf %206, %cst_123 : f32
    %cst_124 = arith.constant 0.111111112 : f32
    %208 = vector.broadcast %cst_124 : f32 to vector<64x16xf32>
    %209 = arith.subf %200, %208 : vector<64x16xf32>
    %cst_125 = arith.constant 9.99999974E-6 : f32
    %210 = arith.addf %207, %cst_125 : f32
    %211 = math.rsqrt %210 : f32
    %212 = vector.broadcast %211 : f32 to vector<64x16xf32>
    %213 = arith.mulf %209, %212 : vector<64x16xf32>
    %cst_126 = arith.constant 0.000000e+00 : f32
    %214 = vector.shape_cast %154 : vector<1x16xi1> to vector<1x16xi1>
    %215 = vector.broadcast %214 : vector<1x16xi1> to vector<64x16xi1>
    %216 = vector.broadcast %cst_126 : f32 to vector<64x16xf32>
    %217 = arith.select %215, %213, %216 : vector<64x16xi1>, vector<64x16xf32>
    %218 = vector.extract_strided_slice %156 {offsets = [0, 64], sizes = [16, 16], strides = [1, 1]} : vector<16x128xf32> to vector<16x16xf32>
    %cst_127 = arith.constant dense<0.000000e+00> : vector<64x16xf32>
    %219 = tpu.matmul %217, %218, %cst_127 {dimension_numbers = #tpu.dot_dimension_numbers<[1], [0], [0], [1], [0, 0, 1, 1], [], []>} : vector<64x16xf32>, vector<16x16xf32>, vector<64x16xf32> -> vector<64x16xf32>
    %c0_128 = arith.constant 0 : index
    %c0_129 = arith.constant 0 : index
    %220 = vector.load %arg7[%c0_128, %c0_129] : memref<64x32xf32, #tpu.memory_space<vmem>>, vector<16x32xf32>
    %cst_130 = arith.constant dense<0.000000e+00> : vector<64x32xf32>
    %221 = tpu.matmul %219, %220, %cst_130 {dimension_numbers = #tpu.dot_dimension_numbers<[1], [0], [0], [1], [0, 0, 1, 1], [], []>} : vector<64x16xf32>, vector<16x32xf32>, vector<64x32xf32> -> vector<64x32xf32>
    %222 = arith.addf %169, %221 : vector<64x32xf32>
    %c1_131 = arith.constant 1 : index
    %c0_132 = arith.constant 0 : index
    %223 = memref.load %arg13[%c1_131, %c0_132] : memref<4x4xf32, #tpu.memory_space<smem>>
    %224 = vector.broadcast %223 : f32 to vector<64x16xf32>
    %225 = arith.mulf %159, %224 : vector<64x16xf32>
    %c1_133 = arith.constant 1 : index
    %c1_134 = arith.constant 1 : index
    %226 = memref.load %arg13[%c1_133, %c1_134] : memref<4x4xf32, #tpu.memory_space<smem>>
    %227 = vector.broadcast %226 : f32 to vector<64x16xf32>
    %228 = arith.mulf %162, %227 : vector<64x16xf32>
    %229 = arith.addf %225, %228 : vector<64x16xf32>
    %c1_135 = arith.constant 1 : index
    %c2_136 = arith.constant 2 : index
    %230 = memref.load %arg13[%c1_135, %c2_136] : memref<4x4xf32, #tpu.memory_space<smem>>
    %231 = vector.broadcast %230 : f32 to vector<64x16xf32>
    %232 = arith.mulf %165, %231 : vector<64x16xf32>
    %233 = arith.addf %229, %232 : vector<64x16xf32>
    %c1_137 = arith.constant 1 : index
    %c3_138 = arith.constant 3 : index
    %234 = memref.load %arg13[%c1_137, %c3_138] : memref<4x4xf32, #tpu.memory_space<smem>>
    %235 = vector.broadcast %234 : f32 to vector<64x16xf32>
    %236 = arith.mulf %168, %235 : vector<64x16xf32>
    %237 = arith.addf %233, %236 : vector<64x16xf32>
    %c0_139 = arith.constant 0 : index
    %c1_140 = arith.constant 1 : index
    %238 = memref.load %arg14[%c0_139, %c1_140] : memref<1x4xf32, #tpu.memory_space<smem>>
    %239 = vector.broadcast %238 : f32 to vector<64x16xf32>
    %240 = arith.addf %237, %239 : vector<64x16xf32>
    %cst_141 = arith.constant -1.000000e+30 : f32
    %241 = vector.shape_cast %154 : vector<1x16xi1> to vector<1x16xi1>
    %242 = vector.broadcast %241 : vector<1x16xi1> to vector<64x16xi1>
    %243 = vector.broadcast %cst_141 : f32 to vector<64x16xf32>
    %244 = arith.select %242, %240, %243 : vector<64x16xi1>, vector<64x16xf32>
    %cst_142 = arith.constant dense<0xFF800000> : vector<64xf32>
    %245 = vector.multi_reduction <maximumf>, %244, %cst_142 [1] : vector<64x16xf32> to vector<64xf32>
    %246 = vector.shape_cast %245 : vector<64xf32> to vector<64x1xf32>
    %247 = vector.broadcast %246 : vector<64x1xf32> to vector<64x16xf32>
    %248 = arith.subf %244, %247 : vector<64x16xf32>
    %249 = math.exp %248 : vector<64x16xf32>
    %cst_143 = arith.constant dense<0.000000e+00> : vector<64xf32>
    %250 = vector.multi_reduction <add>, %249, %cst_143 [1] : vector<64x16xf32> to vector<64xf32>
    %251 = vector.shape_cast %250 : vector<64xf32> to vector<64x1xf32>
    %252 = vector.broadcast %251 : vector<64x1xf32> to vector<64x16xf32>
    %253 = arith.divf %249, %252 : vector<64x16xf32>
    %254 = arith.mulf %253, %253 : vector<64x16xf32>
    %255 = vector.shape_cast %254 : vector<64x16xf32> to vector<1x64x16xf32>
    %cst_144 = arith.constant dense<0.000000e+00> : vector<1xf32>
    %256 = vector.multi_reduction <add>, %255, %cst_144 [1, 2] : vector<1x64x16xf32> to vector<1xf32>
    %257 = vector.shape_cast %256 : vector<1xf32> to vector<1x1x1xf32>
    %258 = vector.extract %257[0, 0, 0] : f32 from vector<1x1x1xf32>
    %cst_145 = arith.constant 0.00173611112 : f32
    %259 = arith.mulf %258, %cst_145 : f32
    %cst_146 = arith.constant 0.0123456791 : f32
    %260 = arith.subf %259, %cst_146 : f32
    %cst_147 = arith.constant 0.111111112 : f32
    %261 = vector.broadcast %cst_147 : f32 to vector<64x16xf32>
    %262 = arith.subf %253, %261 : vector<64x16xf32>
    %cst_148 = arith.constant 9.99999974E-6 : f32
    %263 = arith.addf %260, %cst_148 : f32
    %264 = math.rsqrt %263 : f32
    %265 = vector.broadcast %264 : f32 to vector<64x16xf32>
    %266 = arith.mulf %262, %265 : vector<64x16xf32>
    %cst_149 = arith.constant 0.000000e+00 : f32
    %267 = vector.shape_cast %154 : vector<1x16xi1> to vector<1x16xi1>
    %268 = vector.broadcast %267 : vector<1x16xi1> to vector<64x16xi1>
    %269 = vector.broadcast %cst_149 : f32 to vector<64x16xf32>
    %270 = arith.select %268, %266, %269 : vector<64x16xi1>, vector<64x16xf32>
    %271 = vector.extract_strided_slice %156 {offsets = [0, 80], sizes = [16, 16], strides = [1, 1]} : vector<16x128xf32> to vector<16x16xf32>
    %cst_150 = arith.constant dense<0.000000e+00> : vector<64x16xf32>
    %272 = tpu.matmul %270, %271, %cst_150 {dimension_numbers = #tpu.dot_dimension_numbers<[1], [0], [0], [1], [0, 0, 1, 1], [], []>} : vector<64x16xf32>, vector<16x16xf32>, vector<64x16xf32> -> vector<64x16xf32>
    %c16 = arith.constant 16 : index
    %c0_151 = arith.constant 0 : index
    %273 = vector.load %arg7[%c16, %c0_151] : memref<64x32xf32, #tpu.memory_space<vmem>>, vector<16x32xf32>
    %cst_152 = arith.constant dense<0.000000e+00> : vector<64x32xf32>
    %274 = tpu.matmul %272, %273, %cst_152 {dimension_numbers = #tpu.dot_dimension_numbers<[1], [0], [0], [1], [0, 0, 1, 1], [], []>} : vector<64x16xf32>, vector<16x32xf32>, vector<64x32xf32> -> vector<64x32xf32>
    %275 = arith.addf %222, %274 : vector<64x32xf32>
    %c2_153 = arith.constant 2 : index
    %c0_154 = arith.constant 0 : index
    %276 = memref.load %arg13[%c2_153, %c0_154] : memref<4x4xf32, #tpu.memory_space<smem>>
    %277 = vector.broadcast %276 : f32 to vector<64x16xf32>
    %278 = arith.mulf %159, %277 : vector<64x16xf32>
    %c2_155 = arith.constant 2 : index
    %c1_156 = arith.constant 1 : index
    %279 = memref.load %arg13[%c2_155, %c1_156] : memref<4x4xf32, #tpu.memory_space<smem>>
    %280 = vector.broadcast %279 : f32 to vector<64x16xf32>
    %281 = arith.mulf %162, %280 : vector<64x16xf32>
    %282 = arith.addf %278, %281 : vector<64x16xf32>
    %c2_157 = arith.constant 2 : index
    %c2_158 = arith.constant 2 : index
    %283 = memref.load %arg13[%c2_157, %c2_158] : memref<4x4xf32, #tpu.memory_space<smem>>
    %284 = vector.broadcast %283 : f32 to vector<64x16xf32>
    %285 = arith.mulf %165, %284 : vector<64x16xf32>
    %286 = arith.addf %282, %285 : vector<64x16xf32>
    %c2_159 = arith.constant 2 : index
    %c3_160 = arith.constant 3 : index
    %287 = memref.load %arg13[%c2_159, %c3_160] : memref<4x4xf32, #tpu.memory_space<smem>>
    %288 = vector.broadcast %287 : f32 to vector<64x16xf32>
    %289 = arith.mulf %168, %288 : vector<64x16xf32>
    %290 = arith.addf %286, %289 : vector<64x16xf32>
    %c0_161 = arith.constant 0 : index
    %c2_162 = arith.constant 2 : index
    %291 = memref.load %arg14[%c0_161, %c2_162] : memref<1x4xf32, #tpu.memory_space<smem>>
    %292 = vector.broadcast %291 : f32 to vector<64x16xf32>
    %293 = arith.addf %290, %292 : vector<64x16xf32>
    %cst_163 = arith.constant -1.000000e+30 : f32
    %294 = vector.shape_cast %154 : vector<1x16xi1> to vector<1x16xi1>
    %295 = vector.broadcast %294 : vector<1x16xi1> to vector<64x16xi1>
    %296 = vector.broadcast %cst_163 : f32 to vector<64x16xf32>
    %297 = arith.select %295, %293, %296 : vector<64x16xi1>, vector<64x16xf32>
    %cst_164 = arith.constant dense<0xFF800000> : vector<64xf32>
    %298 = vector.multi_reduction <maximumf>, %297, %cst_164 [1] : vector<64x16xf32> to vector<64xf32>
    %299 = vector.shape_cast %298 : vector<64xf32> to vector<64x1xf32>
    %300 = vector.broadcast %299 : vector<64x1xf32> to vector<64x16xf32>
    %301 = arith.subf %297, %300 : vector<64x16xf32>
    %302 = math.exp %301 : vector<64x16xf32>
    %cst_165 = arith.constant dense<0.000000e+00> : vector<64xf32>
    %303 = vector.multi_reduction <add>, %302, %cst_165 [1] : vector<64x16xf32> to vector<64xf32>
    %304 = vector.shape_cast %303 : vector<64xf32> to vector<64x1xf32>
    %305 = vector.broadcast %304 : vector<64x1xf32> to vector<64x16xf32>
    %306 = arith.divf %302, %305 : vector<64x16xf32>
    %307 = arith.mulf %306, %306 : vector<64x16xf32>
    %308 = vector.shape_cast %307 : vector<64x16xf32> to vector<1x64x16xf32>
    %cst_166 = arith.constant dense<0.000000e+00> : vector<1xf32>
    %309 = vector.multi_reduction <add>, %308, %cst_166 [1, 2] : vector<1x64x16xf32> to vector<1xf32>
    %310 = vector.shape_cast %309 : vector<1xf32> to vector<1x1x1xf32>
    %311 = vector.extract %310[0, 0, 0] : f32 from vector<1x1x1xf32>
    %cst_167 = arith.constant 0.00173611112 : f32
    %312 = arith.mulf %311, %cst_167 : f32
    %cst_168 = arith.constant 0.0123456791 : f32
    %313 = arith.subf %312, %cst_168 : f32
    %cst_169 = arith.constant 0.111111112 : f32
    %314 = vector.broadcast %cst_169 : f32 to vector<64x16xf32>
    %315 = arith.subf %306, %314 : vector<64x16xf32>
    %cst_170 = arith.constant 9.99999974E-6 : f32
    %316 = arith.addf %313, %cst_170 : f32
    %317 = math.rsqrt %316 : f32
    %318 = vector.broadcast %317 : f32 to vector<64x16xf32>
    %319 = arith.mulf %315, %318 : vector<64x16xf32>
    %cst_171 = arith.constant 0.000000e+00 : f32
    %320 = vector.shape_cast %154 : vector<1x16xi1> to vector<1x16xi1>
    %321 = vector.broadcast %320 : vector<1x16xi1> to vector<64x16xi1>
    %322 = vector.broadcast %cst_171 : f32 to vector<64x16xf32>
    %323 = arith.select %321, %319, %322 : vector<64x16xi1>, vector<64x16xf32>
    %324 = vector.extract_strided_slice %156 {offsets = [0, 96], sizes = [16, 16], strides = [1, 1]} : vector<16x128xf32> to vector<16x16xf32>
    %cst_172 = arith.constant dense<0.000000e+00> : vector<64x16xf32>
    %325 = tpu.matmul %323, %324, %cst_172 {dimension_numbers = #tpu.dot_dimension_numbers<[1], [0], [0], [1], [0, 0, 1, 1], [], []>} : vector<64x16xf32>, vector<16x16xf32>, vector<64x16xf32> -> vector<64x16xf32>
    %c32 = arith.constant 32 : index
    %c0_173 = arith.constant 0 : index
    %326 = vector.load %arg7[%c32, %c0_173] : memref<64x32xf32, #tpu.memory_space<vmem>>, vector<16x32xf32>
    %cst_174 = arith.constant dense<0.000000e+00> : vector<64x32xf32>
    %327 = tpu.matmul %325, %326, %cst_174 {dimension_numbers = #tpu.dot_dimension_numbers<[1], [0], [0], [1], [0, 0, 1, 1], [], []>} : vector<64x16xf32>, vector<16x32xf32>, vector<64x32xf32> -> vector<64x32xf32>
    %328 = arith.addf %275, %327 : vector<64x32xf32>
    %c3_175 = arith.constant 3 : index
    %c0_176 = arith.constant 0 : index
    %329 = memref.load %arg13[%c3_175, %c0_176] : memref<4x4xf32, #tpu.memory_space<smem>>
    %330 = vector.broadcast %329 : f32 to vector<64x16xf32>
    %331 = arith.mulf %159, %330 : vector<64x16xf32>
    %c3_177 = arith.constant 3 : index
    %c1_178 = arith.constant 1 : index
    %332 = memref.load %arg13[%c3_177, %c1_178] : memref<4x4xf32, #tpu.memory_space<smem>>
    %333 = vector.broadcast %332 : f32 to vector<64x16xf32>
    %334 = arith.mulf %162, %333 : vector<64x16xf32>
    %335 = arith.addf %331, %334 : vector<64x16xf32>
    %c3_179 = arith.constant 3 : index
    %c2_180 = arith.constant 2 : index
    %336 = memref.load %arg13[%c3_179, %c2_180] : memref<4x4xf32, #tpu.memory_space<smem>>
    %337 = vector.broadcast %336 : f32 to vector<64x16xf32>
    %338 = arith.mulf %165, %337 : vector<64x16xf32>
    %339 = arith.addf %335, %338 : vector<64x16xf32>
    %c3_181 = arith.constant 3 : index
    %c3_182 = arith.constant 3 : index
    %340 = memref.load %arg13[%c3_181, %c3_182] : memref<4x4xf32, #tpu.memory_space<smem>>
    %341 = vector.broadcast %340 : f32 to vector<64x16xf32>
    %342 = arith.mulf %168, %341 : vector<64x16xf32>
    %343 = arith.addf %339, %342 : vector<64x16xf32>
    %c0_183 = arith.constant 0 : index
    %c3_184 = arith.constant 3 : index
    %344 = memref.load %arg14[%c0_183, %c3_184] : memref<1x4xf32, #tpu.memory_space<smem>>
    %345 = vector.broadcast %344 : f32 to vector<64x16xf32>
    %346 = arith.addf %343, %345 : vector<64x16xf32>
    %cst_185 = arith.constant -1.000000e+30 : f32
    %347 = vector.shape_cast %154 : vector<1x16xi1> to vector<1x16xi1>
    %348 = vector.broadcast %347 : vector<1x16xi1> to vector<64x16xi1>
    %349 = vector.broadcast %cst_185 : f32 to vector<64x16xf32>
    %350 = arith.select %348, %346, %349 : vector<64x16xi1>, vector<64x16xf32>
    %cst_186 = arith.constant dense<0xFF800000> : vector<64xf32>
    %351 = vector.multi_reduction <maximumf>, %350, %cst_186 [1] : vector<64x16xf32> to vector<64xf32>
    %352 = vector.shape_cast %351 : vector<64xf32> to vector<64x1xf32>
    %353 = vector.broadcast %352 : vector<64x1xf32> to vector<64x16xf32>
    %354 = arith.subf %350, %353 : vector<64x16xf32>
    %355 = math.exp %354 : vector<64x16xf32>
    %cst_187 = arith.constant dense<0.000000e+00> : vector<64xf32>
    %356 = vector.multi_reduction <add>, %355, %cst_187 [1] : vector<64x16xf32> to vector<64xf32>
    %357 = vector.shape_cast %356 : vector<64xf32> to vector<64x1xf32>
    %358 = vector.broadcast %357 : vector<64x1xf32> to vector<64x16xf32>
    %359 = arith.divf %355, %358 : vector<64x16xf32>
    %360 = arith.mulf %359, %359 : vector<64x16xf32>
    %361 = vector.shape_cast %360 : vector<64x16xf32> to vector<1x64x16xf32>
    %cst_188 = arith.constant dense<0.000000e+00> : vector<1xf32>
    %362 = vector.multi_reduction <add>, %361, %cst_188 [1, 2] : vector<1x64x16xf32> to vector<1xf32>
    %363 = vector.shape_cast %362 : vector<1xf32> to vector<1x1x1xf32>
    %364 = vector.extract %363[0, 0, 0] : f32 from vector<1x1x1xf32>
    %cst_189 = arith.constant 0.00173611112 : f32
    %365 = arith.mulf %364, %cst_189 : f32
    %cst_190 = arith.constant 0.0123456791 : f32
    %366 = arith.subf %365, %cst_190 : f32
    %cst_191 = arith.constant 0.111111112 : f32
    %367 = vector.broadcast %cst_191 : f32 to vector<64x16xf32>
    %368 = arith.subf %359, %367 : vector<64x16xf32>
    %cst_192 = arith.constant 9.99999974E-6 : f32
    %369 = arith.addf %366, %cst_192 : f32
    %370 = math.rsqrt %369 : f32
    %371 = vector.broadcast %370 : f32 to vector<64x16xf32>
    %372 = arith.mulf %368, %371 : vector<64x16xf32>
    %cst_193 = arith.constant 0.000000e+00 : f32
    %373 = vector.shape_cast %154 : vector<1x16xi1> to vector<1x16xi1>
    %374 = vector.broadcast %373 : vector<1x16xi1> to vector<64x16xi1>
    %375 = vector.broadcast %cst_193 : f32 to vector<64x16xf32>
    %376 = arith.select %374, %372, %375 : vector<64x16xi1>, vector<64x16xf32>
    %377 = vector.extract_strided_slice %156 {offsets = [0, 112], sizes = [16, 16], strides = [1, 1]} : vector<16x128xf32> to vector<16x16xf32>
    %cst_194 = arith.constant dense<0.000000e+00> : vector<64x16xf32>
    %378 = tpu.matmul %376, %377, %cst_194 {dimension_numbers = #tpu.dot_dimension_numbers<[1], [0], [0], [1], [0, 0, 1, 1], [], []>} : vector<64x16xf32>, vector<16x16xf32>, vector<64x16xf32> -> vector<64x16xf32>
    %c48 = arith.constant 48 : index
    %c0_195 = arith.constant 0 : index
    %379 = vector.load %arg7[%c48, %c0_195] : memref<64x32xf32, #tpu.memory_space<vmem>>, vector<16x32xf32>
    %cst_196 = arith.constant dense<0.000000e+00> : vector<64x32xf32>
    %380 = tpu.matmul %378, %379, %cst_196 {dimension_numbers = #tpu.dot_dimension_numbers<[1], [0], [0], [1], [0, 0, 1, 1], [], []>} : vector<64x16xf32>, vector<16x32xf32>, vector<64x32xf32> -> vector<64x32xf32>
    %381 = arith.addf %328, %380 : vector<64x32xf32>
    %c0_197 = arith.constant 0 : index
    %c0_198 = arith.constant 0 : index
    %382 = vector.load %arg8[%c0_197, %c0_198] : memref<1x32xf32, #tpu.memory_space<vmem>>, vector<1x32xf32>
    %383 = vector.broadcast %382 : vector<1x32xf32> to vector<64x32xf32>
    %384 = arith.addf %381, %383 : vector<64x32xf32>
    %c0_199 = arith.constant 0 : index
    %c0_200 = arith.constant 0 : index
    %c0_201 = arith.constant 0 : index
    %385 = vector.load %arg15[%c0_199, %c0_200, %c0_201] : memref<2x64x32xf32, #tpu.memory_space<vmem>>, vector<1x64x32xf32>
    %386 = vector.shape_cast %385 : vector<1x64x32xf32> to vector<64x32xf32>
    %387 = vector.shape_cast %384 : vector<64x32xf32> to vector<1x64x32xf32>
    tpu.vector_store %arg15[%c0_199, %c0_200, %c0_201], %387 {strides = array<i32>} : memref<2x64x32xf32, #tpu.memory_space<vmem>>, vector<1x64x32xf32>,
    %388 = vector.extract_strided_slice %145 {offsets = [64, 0], sizes = [64, 64], strides = [1, 1]} : vector<128x64xf32> to vector<64x64xf32>
    %389 = vector.extract_strided_slice %151 {offsets = [16, 0], sizes = [16, 128], strides = [1, 1]} : vector<32x128xf32> to vector<16x128xf32>
    %390 = vector.extract_strided_slice %388 {offsets = [0, 0], sizes = [64, 16], strides = [1, 1]} : vector<64x64xf32> to vector<64x16xf32>
    %391 = vector.extract_strided_slice %389 {offsets = [0, 0], sizes = [16, 16], strides = [1, 1]} : vector<16x128xf32> to vector<16x16xf32>
    %cst_202 = arith.constant dense<0.000000e+00> : vector<64x16xf32>
    %392 = tpu.matmul %390, %391, %cst_202 {dimension_numbers = #tpu.dot_dimension_numbers<[1], [1], [0], [0], [0, 0, 1, 0], [], []>} : vector<64x16xf32>, vector<16x16xf32>, vector<64x16xf32> -> vector<64x16xf32>
    %393 = vector.extract_strided_slice %388 {offsets = [0, 16], sizes = [64, 16], strides = [1, 1]} : vector<64x64xf32> to vector<64x16xf32>
    %394 = vector.extract_strided_slice %389 {offsets = [0, 16], sizes = [16, 16], strides = [1, 1]} : vector<16x128xf32> to vector<16x16xf32>
    %cst_203 = arith.constant dense<0.000000e+00> : vector<64x16xf32>
    %395 = tpu.matmul %393, %394, %cst_203 {dimension_numbers = #tpu.dot_dimension_numbers<[1], [1], [0], [0], [0, 0, 1, 0], [], []>} : vector<64x16xf32>, vector<16x16xf32>, vector<64x16xf32> -> vector<64x16xf32>
    %396 = vector.extract_strided_slice %388 {offsets = [0, 32], sizes = [64, 16], strides = [1, 1]} : vector<64x64xf32> to vector<64x16xf32>
    %397 = vector.extract_strided_slice %389 {offsets = [0, 32], sizes = [16, 16], strides = [1, 1]} : vector<16x128xf32> to vector<16x16xf32>
    %cst_204 = arith.constant dense<0.000000e+00> : vector<64x16xf32>
    %398 = tpu.matmul %396, %397, %cst_204 {dimension_numbers = #tpu.dot_dimension_numbers<[1], [1], [0], [0], [0, 0, 1, 0], [], []>} : vector<64x16xf32>, vector<16x16xf32>, vector<64x16xf32> -> vector<64x16xf32>
    %399 = vector.extract_strided_slice %388 {offsets = [0, 48], sizes = [64, 16], strides = [1, 1]} : vector<64x64xf32> to vector<64x16xf32>
    %400 = vector.extract_strided_slice %389 {offsets = [0, 48], sizes = [16, 16], strides = [1, 1]} : vector<16x128xf32> to vector<16x16xf32>
    %cst_205 = arith.constant dense<0.000000e+00> : vector<64x16xf32>
    %401 = tpu.matmul %399, %400, %cst_205 {dimension_numbers = #tpu.dot_dimension_numbers<[1], [1], [0], [0], [0, 0, 1, 0], [], []>} : vector<64x16xf32>, vector<16x16xf32>, vector<64x16xf32> -> vector<64x16xf32>
    %cst_206 = arith.constant 0.000000e+00 : f32
    %402 = vector.broadcast %cst_206 : f32 to vector<64x32xf32>
    %c0_207 = arith.constant 0 : index
    %c0_208 = arith.constant 0 : index
    %403 = memref.load %arg13[%c0_207, %c0_208] : memref<4x4xf32, #tpu.memory_space<smem>>
    %404 = vector.broadcast %403 : f32 to vector<64x16xf32>
    %405 = arith.mulf %392, %404 : vector<64x16xf32>
    %c0_209 = arith.constant 0 : index
    %c1_210 = arith.constant 1 : index
    %406 = memref.load %arg13[%c0_209, %c1_210] : memref<4x4xf32, #tpu.memory_space<smem>>
    %407 = vector.broadcast %406 : f32 to vector<64x16xf32>
    %408 = arith.mulf %395, %407 : vector<64x16xf32>
    %409 = arith.addf %405, %408 : vector<64x16xf32>
    %c0_211 = arith.constant 0 : index
    %c2_212 = arith.constant 2 : index
    %410 = memref.load %arg13[%c0_211, %c2_212] : memref<4x4xf32, #tpu.memory_space<smem>>
    %411 = vector.broadcast %410 : f32 to vector<64x16xf32>
    %412 = arith.mulf %398, %411 : vector<64x16xf32>
    %413 = arith.addf %409, %412 : vector<64x16xf32>
    %c0_213 = arith.constant 0 : index
    %c3_214 = arith.constant 3 : index
    %414 = memref.load %arg13[%c0_213, %c3_214] : memref<4x4xf32, #tpu.memory_space<smem>>
    %415 = vector.broadcast %414 : f32 to vector<64x16xf32>
    %416 = arith.mulf %401, %415 : vector<64x16xf32>
    %417 = arith.addf %413, %416 : vector<64x16xf32>
    %c0_215 = arith.constant 0 : index
    %c0_216 = arith.constant 0 : index
    %418 = memref.load %arg14[%c0_215, %c0_216] : memref<1x4xf32, #tpu.memory_space<smem>>
    %419 = vector.broadcast %418 : f32 to vector<64x16xf32>
    %420 = arith.addf %417, %419 : vector<64x16xf32>
    %cst_217 = arith.constant -1.000000e+30 : f32
    %421 = vector.shape_cast %154 : vector<1x16xi1> to vector<1x16xi1>
    %422 = vector.broadcast %421 : vector<1x16xi1> to vector<64x16xi1>
    %423 = vector.broadcast %cst_217 : f32 to vector<64x16xf32>
    %424 = arith.select %422, %420, %423 : vector<64x16xi1>, vector<64x16xf32>
    %cst_218 = arith.constant dense<0xFF800000> : vector<64xf32>
    %425 = vector.multi_reduction <maximumf>, %424, %cst_218 [1] : vector<64x16xf32> to vector<64xf32>
    %426 = vector.shape_cast %425 : vector<64xf32> to vector<64x1xf32>
    %427 = vector.broadcast %426 : vector<64x1xf32> to vector<64x16xf32>
    %428 = arith.subf %424, %427 : vector<64x16xf32>
    %429 = math.exp %428 : vector<64x16xf32>
    %cst_219 = arith.constant dense<0.000000e+00> : vector<64xf32>
    %430 = vector.multi_reduction <add>, %429, %cst_219 [1] : vector<64x16xf32> to vector<64xf32>
    %431 = vector.shape_cast %430 : vector<64xf32> to vector<64x1xf32>
    %432 = vector.broadcast %431 : vector<64x1xf32> to vector<64x16xf32>
    %433 = arith.divf %429, %432 : vector<64x16xf32>
    %434 = arith.mulf %433, %433 : vector<64x16xf32>
    %435 = vector.shape_cast %434 : vector<64x16xf32> to vector<1x64x16xf32>
    %cst_220 = arith.constant dense<0.000000e+00> : vector<1xf32>
    %436 = vector.multi_reduction <add>, %435, %cst_220 [1, 2] : vector<1x64x16xf32> to vector<1xf32>
    %437 = vector.shape_cast %436 : vector<1xf32> to vector<1x1x1xf32>
    %438 = vector.extract %437[0, 0, 0] : f32 from vector<1x1x1xf32>
    %cst_221 = arith.constant 0.00173611112 : f32
    %439 = arith.mulf %438, %cst_221 : f32
    %cst_222 = arith.constant 0.0123456791 : f32
    %440 = arith.subf %439, %cst_222 : f32
    %cst_223 = arith.constant 0.111111112 : f32
    %441 = vector.broadcast %cst_223 : f32 to vector<64x16xf32>
    %442 = arith.subf %433, %441 : vector<64x16xf32>
    %cst_224 = arith.constant 9.99999974E-6 : f32
    %443 = arith.addf %440, %cst_224 : f32
    %444 = math.rsqrt %443 : f32
    %445 = vector.broadcast %444 : f32 to vector<64x16xf32>
    %446 = arith.mulf %442, %445 : vector<64x16xf32>
    %cst_225 = arith.constant 0.000000e+00 : f32
    %447 = vector.shape_cast %154 : vector<1x16xi1> to vector<1x16xi1>
    %448 = vector.broadcast %447 : vector<1x16xi1> to vector<64x16xi1>
    %449 = vector.broadcast %cst_225 : f32 to vector<64x16xf32>
    %450 = arith.select %448, %446, %449 : vector<64x16xi1>, vector<64x16xf32>
    %451 = vector.extract_strided_slice %389 {offsets = [0, 64], sizes = [16, 16], strides = [1, 1]} : vector<16x128xf32> to vector<16x16xf32>
    %cst_226 = arith.constant dense<0.000000e+00> : vector<64x16xf32>
    %452 = tpu.matmul %450, %451, %cst_226 {dimension_numbers = #tpu.dot_dimension_numbers<[1], [0], [0], [1], [0, 0, 1, 1], [], []>} : vector<64x16xf32>, vector<16x16xf32>, vector<64x16xf32> -> vector<64x16xf32>
    %c0_227 = arith.constant 0 : index
    %c0_228 = arith.constant 0 : index
    %453 = vector.load %arg7[%c0_227, %c0_228] : memref<64x32xf32, #tpu.memory_space<vmem>>, vector<16x32xf32>
    %cst_229 = arith.constant dense<0.000000e+00> : vector<64x32xf32>
    %454 = tpu.matmul %452, %453, %cst_229 {dimension_numbers = #tpu.dot_dimension_numbers<[1], [0], [0], [1], [0, 0, 1, 1], [], []>} : vector<64x16xf32>, vector<16x32xf32>, vector<64x32xf32> -> vector<64x32xf32>
    %455 = arith.addf %402, %454 : vector<64x32xf32>
    %c1_230 = arith.constant 1 : index
    %c0_231 = arith.constant 0 : index
    %456 = memref.load %arg13[%c1_230, %c0_231] : memref<4x4xf32, #tpu.memory_space<smem>>
    %457 = vector.broadcast %456 : f32 to vector<64x16xf32>
    %458 = arith.mulf %392, %457 : vector<64x16xf32>
    %c1_232 = arith.constant 1 : index
    %c1_233 = arith.constant 1 : index
    %459 = memref.load %arg13[%c1_232, %c1_233] : memref<4x4xf32, #tpu.memory_space<smem>>
    %460 = vector.broadcast %459 : f32 to vector<64x16xf32>
    %461 = arith.mulf %395, %460 : vector<64x16xf32>
    %462 = arith.addf %458, %461 : vector<64x16xf32>
    %c1_234 = arith.constant 1 : index
    %c2_235 = arith.constant 2 : index
    %463 = memref.load %arg13[%c1_234, %c2_235] : memref<4x4xf32, #tpu.memory_space<smem>>
    %464 = vector.broadcast %463 : f32 to vector<64x16xf32>
    %465 = arith.mulf %398, %464 : vector<64x16xf32>
    %466 = arith.addf %462, %465 : vector<64x16xf32>
    %c1_236 = arith.constant 1 : index
    %c3_237 = arith.constant 3 : index
    %467 = memref.load %arg13[%c1_236, %c3_237] : memref<4x4xf32, #tpu.memory_space<smem>>
    %468 = vector.broadcast %467 : f32 to vector<64x16xf32>
    %469 = arith.mulf %401, %468 : vector<64x16xf32>
    %470 = arith.addf %466, %469 : vector<64x16xf32>
    %c0_238 = arith.constant 0 : index
    %c1_239 = arith.constant 1 : index
    %471 = memref.load %arg14[%c0_238, %c1_239] : memref<1x4xf32, #tpu.memory_space<smem>>
    %472 = vector.broadcast %471 : f32 to vector<64x16xf32>
    %473 = arith.addf %470, %472 : vector<64x16xf32>
    %cst_240 = arith.constant -1.000000e+30 : f32
    %474 = vector.shape_cast %154 : vector<1x16xi1> to vector<1x16xi1>
    %475 = vector.broadcast %474 : vector<1x16xi1> to vector<64x16xi1>
    %476 = vector.broadcast %cst_240 : f32 to vector<64x16xf32>
    %477 = arith.select %475, %473, %476 : vector<64x16xi1>, vector<64x16xf32>
    %cst_241 = arith.constant dense<0xFF800000> : vector<64xf32>
    %478 = vector.multi_reduction <maximumf>, %477, %cst_241 [1] : vector<64x16xf32> to vector<64xf32>
    %479 = vector.shape_cast %478 : vector<64xf32> to vector<64x1xf32>
    %480 = vector.broadcast %479 : vector<64x1xf32> to vector<64x16xf32>
    %481 = arith.subf %477, %480 : vector<64x16xf32>
    %482 = math.exp %481 : vector<64x16xf32>
    %cst_242 = arith.constant dense<0.000000e+00> : vector<64xf32>
    %483 = vector.multi_reduction <add>, %482, %cst_242 [1] : vector<64x16xf32> to vector<64xf32>
    %484 = vector.shape_cast %483 : vector<64xf32> to vector<64x1xf32>
    %485 = vector.broadcast %484 : vector<64x1xf32> to vector<64x16xf32>
    %486 = arith.divf %482, %485 : vector<64x16xf32>
    %487 = arith.mulf %486, %486 : vector<64x16xf32>
    %488 = vector.shape_cast %487 : vector<64x16xf32> to vector<1x64x16xf32>
    %cst_243 = arith.constant dense<0.000000e+00> : vector<1xf32>
    %489 = vector.multi_reduction <add>, %488, %cst_243 [1, 2] : vector<1x64x16xf32> to vector<1xf32>
    %490 = vector.shape_cast %489 : vector<1xf32> to vector<1x1x1xf32>
    %491 = vector.extract %490[0, 0, 0] : f32 from vector<1x1x1xf32>
    %cst_244 = arith.constant 0.00173611112 : f32
    %492 = arith.mulf %491, %cst_244 : f32
    %cst_245 = arith.constant 0.0123456791 : f32
    %493 = arith.subf %492, %cst_245 : f32
    %cst_246 = arith.constant 0.111111112 : f32
    %494 = vector.broadcast %cst_246 : f32 to vector<64x16xf32>
    %495 = arith.subf %486, %494 : vector<64x16xf32>
    %cst_247 = arith.constant 9.99999974E-6 : f32
    %496 = arith.addf %493, %cst_247 : f32
    %497 = math.rsqrt %496 : f32
    %498 = vector.broadcast %497 : f32 to vector<64x16xf32>
    %499 = arith.mulf %495, %498 : vector<64x16xf32>
    %cst_248 = arith.constant 0.000000e+00 : f32
    %500 = vector.shape_cast %154 : vector<1x16xi1> to vector<1x16xi1>
    %501 = vector.broadcast %500 : vector<1x16xi1> to vector<64x16xi1>
    %502 = vector.broadcast %cst_248 : f32 to vector<64x16xf32>
    %503 = arith.select %501, %499, %502 : vector<64x16xi1>, vector<64x16xf32>
    %504 = vector.extract_strided_slice %389 {offsets = [0, 80], sizes = [16, 16], strides = [1, 1]} : vector<16x128xf32> to vector<16x16xf32>
    %cst_249 = arith.constant dense<0.000000e+00> : vector<64x16xf32>
    %505 = tpu.matmul %503, %504, %cst_249 {dimension_numbers = #tpu.dot_dimension_numbers<[1], [0], [0], [1], [0, 0, 1, 1], [], []>} : vector<64x16xf32>, vector<16x16xf32>, vector<64x16xf32> -> vector<64x16xf32>
    %c16_250 = arith.constant 16 : index
    %c0_251 = arith.constant 0 : index
    %506 = vector.load %arg7[%c16_250, %c0_251] : memref<64x32xf32, #tpu.memory_space<vmem>>, vector<16x32xf32>
    %cst_252 = arith.constant dense<0.000000e+00> : vector<64x32xf32>
    %507 = tpu.matmul %505, %506, %cst_252 {dimension_numbers = #tpu.dot_dimension_numbers<[1], [0], [0], [1], [0, 0, 1, 1], [], []>} : vector<64x16xf32>, vector<16x32xf32>, vector<64x32xf32> -> vector<64x32xf32>
    %508 = arith.addf %455, %507 : vector<64x32xf32>
    %c2_253 = arith.constant 2 : index
    %c0_254 = arith.constant 0 : index
    %509 = memref.load %arg13[%c2_253, %c0_254] : memref<4x4xf32, #tpu.memory_space<smem>>
    %510 = vector.broadcast %509 : f32 to vector<64x16xf32>
    %511 = arith.mulf %392, %510 : vector<64x16xf32>
    %c2_255 = arith.constant 2 : index
    %c1_256 = arith.constant 1 : index
    %512 = memref.load %arg13[%c2_255, %c1_256] : memref<4x4xf32, #tpu.memory_space<smem>>
    %513 = vector.broadcast %512 : f32 to vector<64x16xf32>
    %514 = arith.mulf %395, %513 : vector<64x16xf32>
    %515 = arith.addf %511, %514 : vector<64x16xf32>
    %c2_257 = arith.constant 2 : index
    %c2_258 = arith.constant 2 : index
    %516 = memref.load %arg13[%c2_257, %c2_258] : memref<4x4xf32, #tpu.memory_space<smem>>
    %517 = vector.broadcast %516 : f32 to vector<64x16xf32>
    %518 = arith.mulf %398, %517 : vector<64x16xf32>
    %519 = arith.addf %515, %518 : vector<64x16xf32>
    %c2_259 = arith.constant 2 : index
    %c3_260 = arith.constant 3 : index
    %520 = memref.load %arg13[%c2_259, %c3_260] : memref<4x4xf32, #tpu.memory_space<smem>>
    %521 = vector.broadcast %520 : f32 to vector<64x16xf32>
    %522 = arith.mulf %401, %521 : vector<64x16xf32>
    %523 = arith.addf %519, %522 : vector<64x16xf32>
    %c0_261 = arith.constant 0 : index
    %c2_262 = arith.constant 2 : index
    %524 = memref.load %arg14[%c0_261, %c2_262] : memref<1x4xf32, #tpu.memory_space<smem>>
    %525 = vector.broadcast %524 : f32 to vector<64x16xf32>
    %526 = arith.addf %523, %525 : vector<64x16xf32>
    %cst_263 = arith.constant -1.000000e+30 : f32
    %527 = vector.shape_cast %154 : vector<1x16xi1> to vector<1x16xi1>
    %528 = vector.broadcast %527 : vector<1x16xi1> to vector<64x16xi1>
    %529 = vector.broadcast %cst_263 : f32 to vector<64x16xf32>
    %530 = arith.select %528, %526, %529 : vector<64x16xi1>, vector<64x16xf32>
    %cst_264 = arith.constant dense<0xFF800000> : vector<64xf32>
    %531 = vector.multi_reduction <maximumf>, %530, %cst_264 [1] : vector<64x16xf32> to vector<64xf32>
    %532 = vector.shape_cast %531 : vector<64xf32> to vector<64x1xf32>
    %533 = vector.broadcast %532 : vector<64x1xf32> to vector<64x16xf32>
    %534 = arith.subf %530, %533 : vector<64x16xf32>
    %535 = math.exp %534 : vector<64x16xf32>
    %cst_265 = arith.constant dense<0.000000e+00> : vector<64xf32>
    %536 = vector.multi_reduction <add>, %535, %cst_265 [1] : vector<64x16xf32> to vector<64xf32>
    %537 = vector.shape_cast %536 : vector<64xf32> to vector<64x1xf32>
    %538 = vector.broadcast %537 : vector<64x1xf32> to vector<64x16xf32>
    %539 = arith.divf %535, %538 : vector<64x16xf32>
    %540 = arith.mulf %539, %539 : vector<64x16xf32>
    %541 = vector.shape_cast %540 : vector<64x16xf32> to vector<1x64x16xf32>
    %cst_266 = arith.constant dense<0.000000e+00> : vector<1xf32>
    %542 = vector.multi_reduction <add>, %541, %cst_266 [1, 2] : vector<1x64x16xf32> to vector<1xf32>
    %543 = vector.shape_cast %542 : vector<1xf32> to vector<1x1x1xf32>
    %544 = vector.extract %543[0, 0, 0] : f32 from vector<1x1x1xf32>
    %cst_267 = arith.constant 0.00173611112 : f32
    %545 = arith.mulf %544, %cst_267 : f32
    %cst_268 = arith.constant 0.0123456791 : f32
    %546 = arith.subf %545, %cst_268 : f32
    %cst_269 = arith.constant 0.111111112 : f32
    %547 = vector.broadcast %cst_269 : f32 to vector<64x16xf32>
    %548 = arith.subf %539, %547 : vector<64x16xf32>
    %cst_270 = arith.constant 9.99999974E-6 : f32
    %549 = arith.addf %546, %cst_270 : f32
    %550 = math.rsqrt %549 : f32
    %551 = vector.broadcast %550 : f32 to vector<64x16xf32>
    %552 = arith.mulf %548, %551 : vector<64x16xf32>
    %cst_271 = arith.constant 0.000000e+00 : f32
    %553 = vector.shape_cast %154 : vector<1x16xi1> to vector<1x16xi1>
    %554 = vector.broadcast %553 : vector<1x16xi1> to vector<64x16xi1>
    %555 = vector.broadcast %cst_271 : f32 to vector<64x16xf32>
    %556 = arith.select %554, %552, %555 : vector<64x16xi1>, vector<64x16xf32>
    %557 = vector.extract_strided_slice %389 {offsets = [0, 96], sizes = [16, 16], strides = [1, 1]} : vector<16x128xf32> to vector<16x16xf32>
    %cst_272 = arith.constant dense<0.000000e+00> : vector<64x16xf32>
    %558 = tpu.matmul %556, %557, %cst_272 {dimension_numbers = #tpu.dot_dimension_numbers<[1], [0], [0], [1], [0, 0, 1, 1], [], []>} : vector<64x16xf32>, vector<16x16xf32>, vector<64x16xf32> -> vector<64x16xf32>
    %c32_273 = arith.constant 32 : index
    %c0_274 = arith.constant 0 : index
    %559 = vector.load %arg7[%c32_273, %c0_274] : memref<64x32xf32, #tpu.memory_space<vmem>>, vector<16x32xf32>
    %cst_275 = arith.constant dense<0.000000e+00> : vector<64x32xf32>
    %560 = tpu.matmul %558, %559, %cst_275 {dimension_numbers = #tpu.dot_dimension_numbers<[1], [0], [0], [1], [0, 0, 1, 1], [], []>} : vector<64x16xf32>, vector<16x32xf32>, vector<64x32xf32> -> vector<64x32xf32>
    %561 = arith.addf %508, %560 : vector<64x32xf32>
    %c3_276 = arith.constant 3 : index
    %c0_277 = arith.constant 0 : index
    %562 = memref.load %arg13[%c3_276, %c0_277] : memref<4x4xf32, #tpu.memory_space<smem>>
    %563 = vector.broadcast %562 : f32 to vector<64x16xf32>
    %564 = arith.mulf %392, %563 : vector<64x16xf32>
    %c3_278 = arith.constant 3 : index
    %c1_279 = arith.constant 1 : index
    %565 = memref.load %arg13[%c3_278, %c1_279] : memref<4x4xf32, #tpu.memory_space<smem>>
    %566 = vector.broadcast %565 : f32 to vector<64x16xf32>
    %567 = arith.mulf %395, %566 : vector<64x16xf32>
    %568 = arith.addf %564, %567 : vector<64x16xf32>
    %c3_280 = arith.constant 3 : index
    %c2_281 = arith.constant 2 : index
    %569 = memref.load %arg13[%c3_280, %c2_281] : memref<4x4xf32, #tpu.memory_space<smem>>
    %570 = vector.broadcast %569 : f32 to vector<64x16xf32>
    %571 = arith.mulf %398, %570 : vector<64x16xf32>
    %572 = arith.addf %568, %571 : vector<64x16xf32>
    %c3_282 = arith.constant 3 : index
    %c3_283 = arith.constant 3 : index
    %573 = memref.load %arg13[%c3_282, %c3_283] : memref<4x4xf32, #tpu.memory_space<smem>>
    %574 = vector.broadcast %573 : f32 to vector<64x16xf32>
    %575 = arith.mulf %401, %574 : vector<64x16xf32>
    %576 = arith.addf %572, %575 : vector<64x16xf32>
    %c0_284 = arith.constant 0 : index
    %c3_285 = arith.constant 3 : index
    %577 = memref.load %arg14[%c0_284, %c3_285] : memref<1x4xf32, #tpu.memory_space<smem>>
    %578 = vector.broadcast %577 : f32 to vector<64x16xf32>
    %579 = arith.addf %576, %578 : vector<64x16xf32>
    %cst_286 = arith.constant -1.000000e+30 : f32
    %580 = vector.shape_cast %154 : vector<1x16xi1> to vector<1x16xi1>
    %581 = vector.broadcast %580 : vector<1x16xi1> to vector<64x16xi1>
    %582 = vector.broadcast %cst_286 : f32 to vector<64x16xf32>
    %583 = arith.select %581, %579, %582 : vector<64x16xi1>, vector<64x16xf32>
    %cst_287 = arith.constant dense<0xFF800000> : vector<64xf32>
    %584 = vector.multi_reduction <maximumf>, %583, %cst_287 [1] : vector<64x16xf32> to vector<64xf32>
    %585 = vector.shape_cast %584 : vector<64xf32> to vector<64x1xf32>
    %586 = vector.broadcast %585 : vector<64x1xf32> to vector<64x16xf32>
    %587 = arith.subf %583, %586 : vector<64x16xf32>
    %588 = math.exp %587 : vector<64x16xf32>
    %cst_288 = arith.constant dense<0.000000e+00> : vector<64xf32>
    %589 = vector.multi_reduction <add>, %588, %cst_288 [1] : vector<64x16xf32> to vector<64xf32>
    %590 = vector.shape_cast %589 : vector<64xf32> to vector<64x1xf32>
    %591 = vector.broadcast %590 : vector<64x1xf32> to vector<64x16xf32>
    %592 = arith.divf %588, %591 : vector<64x16xf32>
    %593 = arith.mulf %592, %592 : vector<64x16xf32>
    %594 = vector.shape_cast %593 : vector<64x16xf32> to vector<1x64x16xf32>
    %cst_289 = arith.constant dense<0.000000e+00> : vector<1xf32>
    %595 = vector.multi_reduction <add>, %594, %cst_289 [1, 2] : vector<1x64x16xf32> to vector<1xf32>
    %596 = vector.shape_cast %595 : vector<1xf32> to vector<1x1x1xf32>
    %597 = vector.extract %596[0, 0, 0] : f32 from vector<1x1x1xf32>
    %cst_290 = arith.constant 0.00173611112 : f32
    %598 = arith.mulf %597, %cst_290 : f32
    %cst_291 = arith.constant 0.0123456791 : f32
    %599 = arith.subf %598, %cst_291 : f32
    %cst_292 = arith.constant 0.111111112 : f32
    %600 = vector.broadcast %cst_292 : f32 to vector<64x16xf32>
    %601 = arith.subf %592, %600 : vector<64x16xf32>
    %cst_293 = arith.constant 9.99999974E-6 : f32
    %602 = arith.addf %599, %cst_293 : f32
    %603 = math.rsqrt %602 : f32
    %604 = vector.broadcast %603 : f32 to vector<64x16xf32>
    %605 = arith.mulf %601, %604 : vector<64x16xf32>
    %cst_294 = arith.constant 0.000000e+00 : f32
    %606 = vector.shape_cast %154 : vector<1x16xi1> to vector<1x16xi1>
    %607 = vector.broadcast %606 : vector<1x16xi1> to vector<64x16xi1>
    %608 = vector.broadcast %cst_294 : f32 to vector<64x16xf32>
    %609 = arith.select %607, %605, %608 : vector<64x16xi1>, vector<64x16xf32>
    %610 = vector.extract_strided_slice %389 {offsets = [0, 112], sizes = [16, 16], strides = [1, 1]} : vector<16x128xf32> to vector<16x16xf32>
    %cst_295 = arith.constant dense<0.000000e+00> : vector<64x16xf32>
    %611 = tpu.matmul %609, %610, %cst_295 {dimension_numbers = #tpu.dot_dimension_numbers<[1], [0], [0], [1], [0, 0, 1, 1], [], []>} : vector<64x16xf32>, vector<16x16xf32>, vector<64x16xf32> -> vector<64x16xf32>
    %c48_296 = arith.constant 48 : index
    %c0_297 = arith.constant 0 : index
    %612 = vector.load %arg7[%c48_296, %c0_297] : memref<64x32xf32, #tpu.memory_space<vmem>>, vector<16x32xf32>
    %cst_298 = arith.constant dense<0.000000e+00> : vector<64x32xf32>
    %613 = tpu.matmul %611, %612, %cst_298 {dimension_numbers = #tpu.dot_dimension_numbers<[1], [0], [0], [1], [0, 0, 1, 1], [], []>} : vector<64x16xf32>, vector<16x32xf32>, vector<64x32xf32> -> vector<64x32xf32>
    %614 = arith.addf %561, %613 : vector<64x32xf32>
    %c0_299 = arith.constant 0 : index
    %c0_300 = arith.constant 0 : index
    %615 = vector.load %arg8[%c0_299, %c0_300] : memref<1x32xf32, #tpu.memory_space<vmem>>, vector<1x32xf32>
    %616 = vector.broadcast %615 : vector<1x32xf32> to vector<64x32xf32>
    %617 = arith.addf %614, %616 : vector<64x32xf32>
    %c1_301 = arith.constant 1 : index
    %c0_302 = arith.constant 0 : index
    %c0_303 = arith.constant 0 : index
    %618 = vector.load %arg15[%c1_301, %c0_302, %c0_303] : memref<2x64x32xf32, #tpu.memory_space<vmem>>, vector<1x64x32xf32>
    %619 = vector.shape_cast %618 : vector<1x64x32xf32> to vector<64x32xf32>
    %620 = vector.shape_cast %617 : vector<64x32xf32> to vector<1x64x32xf32>
    tpu.vector_store %arg15[%c1_301, %c0_302, %c0_303], %620 {strides = array<i32>} : memref<2x64x32xf32, #tpu.memory_space<vmem>>, vector<1x64x32xf32>,
    return
  }
  func.func @transform_0(%arg0: i32) -> (i32, i32, i32) {
    %c0_i32 = arith.constant 0 : i32
    %c0_i32_0 = arith.constant 0 : i32
    %c0_i32_1 = arith.constant 0 : i32
    %c0_i32_2 = arith.constant 0 : i32
    return %c0_i32, %c0_i32_0, %c0_i32_1 : i32, i32, i32
  }
  func.func @transform_1(%arg0: i32) -> (i32, i32, i32, i32) {
    %c0_i32 = arith.constant 0 : i32
    %c0_i32_0 = arith.constant 0 : i32
    %c0_i32_1 = arith.constant 0 : i32
    %c0_i32_2 = arith.constant 0 : i32
    %c0_i32_3 = arith.constant 0 : i32
    return %c0_i32, %c0_i32_0, %c0_i32_1, %c0_i32_2 : i32, i32, i32, i32
  }
  func.func @transform_2(%arg0: i32) -> (i32, i32) {
    %c0_i32 = arith.constant 0 : i32
    %c0_i32_0 = arith.constant 0 : i32
    %c0_i32_1 = arith.constant 0 : i32
    return %c0_i32, %c0_i32_0 : i32, i32
  }
  func.func @transform_3(%arg0: i32) -> (i32, i32) {
    %c0_i32 = arith.constant 0 : i32
    %c0_i32_0 = arith.constant 0 : i32
    %c0_i32_1 = arith.constant 0 : i32
    return %c0_i32, %c0_i32_0 : i32, i32
  }
  func.func @transform_4(%arg0: i32) -> (i32, i32) {
    %c0_i32 = arith.constant 0 : i32
    %c0_i32_0 = arith.constant 0 : i32
    %c0_i32_1 = arith.constant 0 : i32
    return %c0_i32, %c0_i32_0 : i32, i32
  }
  func.func @transform_5(%arg0: i32) -> (i32, i32) {
    %c0_i32 = arith.constant 0 : i32
    %c0_i32_0 = arith.constant 0 : i32
    %c0_i32_1 = arith.constant 0 : i32
    return %c0_i32, %c0_i32_0 : i32, i32
  }
  func.func @transform_6(%arg0: i32) -> (i32, i32) {
    %c0_i32 = arith.constant 0 : i32
    %c0_i32_0 = arith.constant 0 : i32
    %c0_i32_1 = arith.constant 0 : i32
    return %c0_i32, %c0_i32_0 : i32, i32
  }
  func.func @transform_7(%arg0: i32) -> (i32, i32) {
    %c0_i32 = arith.constant 0 : i32
    %c0_i32_0 = arith.constant 0 : i32
    %c0_i32_1 = arith.constant 0 : i32
    return %c0_i32, %c0_i32_0 : i32, i32
  }
  func.func @transform_8(%arg0: i32) -> (i32, i32) {
    %c0_i32 = arith.constant 0 : i32
    %c0_i32_0 = arith.constant 0 : i32
    %c0_i32_1 = arith.constant 0 : i32
    return %c0_i32, %c0_i32_0 : i32, i32
  }
  func.func @transform_9(%arg0: i32) -> (i32, i32) {
    %c0_i32 = arith.constant 0 : i32
    %c0_i32_0 = arith.constant 0 : i32
    %c0_i32_1 = arith.constant 0 : i32
    return %c0_i32, %c0_i32_0 : i32, i32
  }
  func.func @transform_10(%arg0: i32) -> (i32, i32) {
    %c0_i32 = arith.constant 0 : i32
    %c0_i32_0 = arith.constant 0 : i32
    %c0_i32_1 = arith.constant 0 : i32
    return %c0_i32, %c0_i32_0 : i32, i32
  }
  func.func @transform_11(%arg0: i32) -> (i32, i32) {
    %c0_i32 = arith.constant 0 : i32
    %c0_i32_0 = arith.constant 0 : i32
    %c0_i32_1 = arith.constant 0 : i32
    return %c0_i32, %c0_i32_0 : i32, i32
  }
  func.func @transform_12(%arg0: i32) -> (i32, i32) {
    %c0_i32 = arith.constant 0 : i32
    %c0_i32_0 = arith.constant 0 : i32
    %c0_i32_1 = arith.constant 0 : i32
    return %c0_i32, %c0_i32_0 : i32, i32
  }
  func.func @transform_13(%arg0: i32) -> (i32, i32) {
    %c0_i32 = arith.constant 0 : i32
    %c0_i32_0 = arith.constant 0 : i32
    %c0_i32_1 = arith.constant 0 : i32
    return %c0_i32, %c0_i32_0 : i32, i32
  }
  func.func @transform_14(%arg0: i32) -> (i32, i32, i32) {
    %c0_i32 = arith.constant 0 : i32
    %c0_i32_0 = arith.constant 0 : i32
    %c0_i32_1 = arith.constant 0 : i32
    %c0_i32_2 = arith.constant 0 : i32
    return %c0_i32, %c0_i32_0, %c0_i32_1 : i32, i32, i32
  }
}

</mosaic_0001>

<bundles_post_ra>
// kernel: run.1
= control target key start
LH: loop header
LB: loop body
LE: loop exit
PB: predicated region body
PF: predicated region fallthrough
CT: control target
= control target key end

     0   :  { %19 = vsyncpa [#allocation3], 0  ;;  %s11101_s0 = inlined_call_operand.vmem [shape: f32[2,64,32], index: 0, kind: input, shape index: {}]   ;;  %s11102_s1 = inlined_call_operand.vmem [shape: f32[16,2,16,32], index: 1, kind: input, shape index: {}]   ;;  %s11103_s2 = inlined_call_operand.vmem [shape: bf16[32,64], index: 2, kind: input, shape index: {}]   ;;  %s11104_s3 = inlined_call_operand.vmem [shape: f32[1,64], index: 3, kind: input, shape index: {}]   ;;  %s11105_s4 = inlined_call_operand.vmem [shape: bf16[32,128], index: 4, kind: input, shape index: {}]   ;;  %s11106_s5 = inlined_call_operand.vmem [shape: f32[1,128], index: 5, kind: input, shape index: {}]   ;;  %s11107_s6 = inlined_call_operand.vmem [shape: f32[64,32], index: 6, kind: input, shape index: {}]   ;;  %s11108_s7 = inlined_call_operand.vmem [shape: f32[1,32], index: 7, kind: input, shape index: {}, may-alias: {7,9,11}]   ;;  %s11109_s8 = inlined_call_operand.vmem [shape: f32[16,32], index: 8, kind: input, shape index: {}]   ;;  %s11110_s9 = inlined_call_operand.vmem [shape: f32[1,32], index: 9, kind: input, shape index: {}, may-alias: {7,9,11}]   ;;  %s11111_s10 = inlined_call_operand.vmem [shape: f32[1,32], index: 10, kind: input, shape index: {}]   ;;  %s11112_s11 = inlined_call_operand.vmem [shape: f32[1,32], index: 11, kind: input, shape index: {}, may-alias: {7,9,11}]   ;;  %s11113_s12 = inlined_call_operand.vmem [shape: f32[4,4], index: 12, kind: input, shape index: {}]   ;;  %s11114_s13 = inlined_call_operand.vmem [shape: f32[1,4], index: 13, kind: input, shape index: {}]   ;;  %s11115_s14 = inlined_call_operand.vmem [shape: f32[2,64,32], index: 14, kind: output, shape index: {}]  }
   0x1   :  { %s51_s15 = sshll.u32 %s11113_s12, 4  ;;  %s52_s15 = int_to_ptr.vmem [resolvable:$true] %s51_s15 }
   0x2   :  { %20 = vsyncpa [#allocation5], 0  ;;  %s61_s18 = sshll.u32 %s11114_s13, 4  ;;  %s7559_s19 = scalar_lea.vmem %s52_s15, 64  ;;  %s62_s18 = int_to_ptr.vmem [resolvable:$true] %s61_s18 }
   0x3   :  { %p7560_p0 = scmp.ne.s32.totalorder %s52_s15, %s7559_s19  ;;  %p7564_p1 = scmp.lt.s32.totalorder %s52_s15, %s52_s15 }
   0x4   :  { %p7565_p2 = scmp.lt.s32.totalorder %s7559_s19, %s7559_s19 }
   0x6   :  { %p7566_p3 = por %p7565_p2, %p7564_p1 }
   0x8   :  { %p7567_p4 = pnand %p7566_p3, %p7560_p0 }
   0xa   :  { %7570 = shalt.err (!%p7567_p4)
}
   0xb   :  { %s7587_s20 = smov [#allocation2]   ;;  %s7571_s21 = scalar_lea.vmem %s62_s18, 16 }
   0xc   :  { %54 = dma.vmem_to_smem %s52_s15, 64, %s7587_s20, [#allocation3]  }
   0xd   :  { %p7572_p5 = scmp.ne.s32.totalorder %s62_s18, %s7571_s21  ;;  %p7576_p6 = scmp.lt.s32.totalorder %s62_s18, %s62_s18 }
   0xe   :  { %p7577_p7 = scmp.lt.s32.totalorder %s7571_s21, %s7571_s21 }
  0x10   :  { %p7578_p8 = por %p7577_p7, %p7576_p6 }
  0x12   :  { %p7579_p9 = pnand %p7578_p8, %p7572_p5 }
  0x14   :  { %7582 = shalt.err (!%p7579_p9)
}
  0x15   :  { %s7588_s12 = smov [#allocation4]  }
  0x16   :  { %64 = dma.vmem_to_smem %s62_s18, 16, %s7588_s12, [#allocation5]  }
  0x17   :  { %7583 = dma.done.wait [#allocation3], 64  }
  0x18   :  { %7584 = vsyncadd [#allocation3], 4294967232 }
  0x19   :  { %7585 = dma.done.wait [#allocation5], 16  }
  0x1a   :  { %7586 = vsyncadd [#allocation5], 4294967280 }
  0x1b   :  { %71 = sfence }
  0x1c   :  { %v89_v0 = vld [vmem:[%s11102_s1] sm:$0xff]  ;;  %v7754_v24 = vld [vmem:[%s11109_s8 + $0x8] ss:$0 sm:$0xff]  ;;  %v7764_v30 = vld [vmem:[%s11109_s8 + $0x9] ss:$0 sm:$0xff]  ;;  %vm383_vm0 = vcmask 261120  }
  0x1d   :  { %v7683_v1 = vld [vmem:[%s11109_s8] ss:$0 sm:$0xff]  ;;  %v7691_v3 = vld [vmem:[%s11109_s8 + $0x1] ss:$0 sm:$0xff]  ;;  %v7699_v5 = vld [vmem:[%s11109_s8 + $0x2] ss:$0 sm:$0xff] }
  0x1e   :  { %v5915_v2 = vld [vmem:[%s11102_s1 + $0x20] sm:$0xff]  ;;  %v98_v6 = vmul.f32 %v7683_v1, %v89_v0  ;;  %v7773_v34 = vld [vmem:[%s11109_s8 + $0xa] ss:$0 sm:$0xff]  ;;  %v7781_v36 = vld [vmem:[%s11109_s8 + $0xb] ss:$0 sm:$0xff]  ;;  %s7589_s18 = smov 112  }
  0x1f   :  { %v5920_v4 = vld [vmem:[%s11102_s1 + $0x40] sm:$0xff]  ;;  %v112_v7 = vmul.f32 %v7691_v3, %v5915_v2  ;;  %v7791_v42 = vld [vmem:[%s11109_s8 + $0xc] ss:$0 sm:$0xff]  ;;  %v7800_v46 = vld [vmem:[%s11109_s8 + $0xd] ss:$0 sm:$0xff]  ;;  %vm694_vm1 = vcmask 130048  }
  0x20   :  { %v5925_v8 = vld [vmem:[%s11102_s1 + $0x60] sm:$0xff]  ;;  %v126_v11 = vmul.f32 %v7699_v5, %v5920_v4  ;;  %v7808_v48 = vld [vmem:[%s11109_s8 + $0xe] ss:$0 sm:$0xff]  ;;  %v7818_v54 = vld [vmem:[%s11109_s8 + $0xf] ss:$0 sm:$0xff]  ;;  %s7590_s28 = smov 96  }
  0x21   :  { %v7709_v9 = vld [vmem:[%s11109_s8 + $0x3] ss:$0 sm:$0xff]  ;;  %v7718_v12 = vld [vmem:[%s11109_s8 + $0x4] ss:$0 sm:$0xff]  ;;  %v7726_v14 = vld [vmem:[%s11109_s8 + $0x5] ss:$0 sm:$0xff] }
  0x22   :  { %v5930_v10 = vld [vmem:[%s11102_s1 + $0x80] sm:$0xff]  ;;  %v140_v15 = vmul.f32 %v7709_v9, %v5925_v8  ;;  %v91_v57 = vld [vmem:[%s11102_s1 + $0x10] sm:$0xff]  ;;  %vm8147_vm2 = vmpackc.low %vm694_vm1, %vm694_vm1  ;;  %s6137_s30 = sld [smem:[#allocation2 + $0x180]]  ;;  %s6108_s19 = sld [smem:[#allocation2 + $0x101]] }
  0x23   :  { %v5935_v13 = vld [vmem:[%s11102_s1 + $0xa0] sm:$0xff]  ;;  %v154_v16 = vmul.f32 %v7718_v12, %v5930_v10  ;;  %v5917_v58 = vld [vmem:[%s11102_s1 + $0x30] sm:$0xff]  ;;  %v100_v62 = vmul.f32 %v7683_v1, %v91_v57  ;;  %v5926_v57 = vld [vmem:[%s11102_s1 + $0x68] sm:$0xff]  ;;  %s1265_s15 = sld [smem:[#allocation2]]  ;;  %s6138_s20 = sld [smem:[#allocation2 + $0x181]] }
  0x24   :  { %v172_v17 = vmul.f32 %v7726_v14, %v5935_v13  ;;  %v5940_v18 = vld [vmem:[%s11102_s1 + $0xc0] sm:$0xff]  ;;  %v5922_v59 = vld [vmem:[%s11102_s1 + $0x50] sm:$0xff]  ;;  %v114_v63 = vmul.f32 %v7691_v3, %v5917_v58  ;;  %s6069_s16 = sld [smem:[#allocation2 + $0x80]]  ;;  %s6071_s21 = sld [smem:[#allocation2 + $0x82]] }
  0x25   :  { %v7737_v19 = vld [vmem:[%s11109_s8 + $0x6] ss:$0 sm:$0xff]  ;;  %v7746_v22 = vld [vmem:[%s11109_s8 + $0x7] ss:$0 sm:$0xff]  ;;  %v158_v25 = vadd.f32 %v154_v16, %v98_v6  ;;  %v5927_v0 = vld [vmem:[%s11102_s1 + $0x70] sm:$0xff]  ;;  %s6107_s17 = sld [smem:[#allocation2 + $0x100]] }
  0x26   :  { %v5945_v20 = vld [vmem:[%s11102_s1 + $0xe0] sm:$0xff]  ;;  %v190_v21 = vmul.f32 %v7737_v19, %v5940_v18  ;;  %v176_v26 = vadd.f32 %v172_v17, %v112_v7  ;;  %v5932_v2 = vld [vmem:[%s11102_s1 + $0x90] sm:$0xff]  ;;  %v128_v7 = vmul.f32 %v7699_v5, %v5922_v59  ;;  %v142_v8 = vmul.f32 %v7709_v9, %v5927_v0  ;;  %v5941_v0 = vld [vmem:[%s11102_s1 + $0xc8] sm:$0xff]  ;;  %s6050_s8 = sld [smem:[#allocation2 + $0x2]]  ;;  %s8391_s22 = sld [smem:[#allocation2 + $0x3]] }
  0x27   :  { %v5950_v23 = vld [vmem:[%s11102_s1 + $0x100] sm:$0xff]  ;;  %v208_v27 = vmul.f32 %v7746_v22, %v5945_v20  ;;  %v5937_v4 = vld [vmem:[%s11102_s1 + $0xb0] sm:$0xff]  ;;  %v156_v10 = vmul.f32 %v7718_v12, %v5932_v2  ;;  %s6139_s12 = sld [smem:[#allocation2 + $0x182]]  ;;  %s8397_s23 = sld [smem:[#allocation2 + $0x83]] }
  0x28   :  { %v226_v28 = vmul.f32 %v7754_v24, %v5950_v23  ;;  %v5955_v29 = vld [vmem:[%s11102_s1 + $0x120] sm:$0xff]  ;;  %v194_v32 = vadd.f32 %v190_v21, %v126_v11  ;;  %v5942_v11 = vld [vmem:[%s11102_s1 + $0xd0] sm:$0xff]  ;;  %v174_v17 = vmul.f32 %v7726_v14, %v5937_v4  ;;  %s8389_s13 = sld [smem:[#allocation2 + $0x102]]  ;;  %s8498_s24 = sld [smem:[#allocation4]] }
  0x29   :  { %v5960_v31 = vld [vmem:[%s11102_s1 + $0x140] sm:$0xff]  ;;  %v244_v33 = vmul.f32 %v7764_v30, %v5955_v29  ;;  %v212_v37 = vadd.f32 %v208_v27, %v140_v15  ;;  %v5947_v13 = vld [vmem:[%s11102_s1 + $0xf0] sm:$0xff]  ;;  %v192_v18 = vmul.f32 %v7737_v19, %v5942_v11  ;;  %v160_v27 = vadd.f32 %v156_v10, %v100_v62  ;;  %v5931_v62 = vld [vmem:[%s11102_s1 + $0x88] sm:$0xff]  ;;  %s8581_s25 = sld [smem:[#allocation4 + $0x1]]  ;;  %s6141_s26 = sld [smem:[#allocation4 + $0x3]] }
  0x2a   :  { %v5965_v35 = vld [vmem:[%s11102_s1 + $0x160] sm:$0xff]  ;;  %v230_v38 = vadd.f32 %v226_v28, %v158_v25  ;;  %v262_v39 = vmul.f32 %v7773_v34, %v5960_v31  ;;  %v5952_v15 = vld [vmem:[%s11102_s1 + $0x110] sm:$0xff]  ;;  %v210_v20 = vmul.f32 %v7746_v22, %v5947_v13  ;;  %v5951_v10 = vld [vmem:[%s11102_s1 + $0x108] sm:$0xff]  ;;  %s6111_s27 = sld [smem:[#allocation4 + $0x2]] }
  0x2b   :  { %v280_v40 = vmul.f32 %v7781_v36, %v5965_v35  ;;  %v5970_v41 = vld [vmem:[%s11102_s1 + $0x180] sm:$0xff]  ;;  %v248_v44 = vadd.f32 %v244_v33, %v176_v26  ;;  %v5957_v21 = vld [vmem:[%s11102_s1 + $0x130] sm:$0xff]  ;;  %v228_v28 = vmul.f32 %v7754_v24, %v5952_v15  ;;  %v5956_v11 = vld [vmem:[%s11102_s1 + $0x128] sm:$0xff] }
  0x2c   :  { %v5975_v43 = vld [vmem:[%s11102_s1 + $0x1a0] sm:$0xff]  ;;  %v298_v45 = vmul.f32 %v7791_v42, %v5970_v41  ;;  %v266_v49 = vadd.f32 %v262_v39, %v194_v32  ;;  %v5962_v23 = vld [vmem:[%s11102_s1 + $0x150] sm:$0xff]  ;;  %v246_v29 = vmul.f32 %v7764_v30, %v5957_v21  ;;  %v214_v39 = vadd.f32 %v210_v20, %v142_v8  ;;  %v5946_v8 = vld [vmem:[%s11102_s1 + $0xe8] sm:$0xff] }
  0x2d   :  { %v5980_v47 = vld [vmem:[%s11102_s1 + $0x1c0] sm:$0xff]  ;;  %v284_v50 = vadd.f32 %v280_v40, %v212_v37  ;;  %v316_v51 = vmul.f32 %v7800_v46, %v5975_v43  ;;  %v5967_v25 = vld [vmem:[%s11102_s1 + $0x170] sm:$0xff]  ;;  %v178_v37 = vadd.f32 %v174_v17, %v114_v63  ;;  %v264_v40 = vmul.f32 %v7773_v34, %v5962_v23  ;;  %v5936_v63 = vld [vmem:[%s11102_s1 + $0xa8] sm:$0xff] }
  0x2e   :  { %v334_v52 = vmul.f32 %v7808_v48, %v5980_v47  ;;  %v5985_v53 = vld [vmem:[%s11102_s1 + $0x1e0] sm:$0xff]  ;;  %v302_v55 = vadd.f32 %v298_v45, %v230_v38  ;;  %v5972_v31 = vld [vmem:[%s11102_s1 + $0x190] sm:$0xff]  ;;  %v196_v38 = vadd.f32 %v192_v18, %v128_v7  ;;  %v282_v45 = vmul.f32 %v7781_v36, %v5967_v25  ;;  %v5961_v18 = vld [vmem:[%s11102_s1 + $0x148] sm:$0xff] }
  0x2f   :  { %v352_v56 = vmul.f32 %v7818_v54, %v5985_v53  ;;  %v320_v60 = vadd.f32 %v316_v51, %v248_v44  ;;  %v5977_v32 = vld [vmem:[%s11102_s1 + $0x1b0] sm:$0xff]  ;;  %v7879_v35 = vld [vmem:[%s11110_s9] ss:$0 sm:$0xff]  ;;  %v232_v44 = vadd.f32 %v228_v28, %v160_v27  ;;  %v300_v47 = vmul.f32 %v7791_v42, %v5972_v31  ;;  %v5971_v27 = vld [vmem:[%s11102_s1 + $0x188] sm:$0xff] }
  0x30   :  { %v338_v61 = vadd.f32 %v334_v52, %v266_v49  ;;  %v5982_v33 = vld [vmem:[%s11102_s1 + $0x1d0] sm:$0xff]  ;;  %v90_v49 = vld [vmem:[%s11102_s1 + $0x8] sm:$0xff]  ;;  %v250_v51 = vadd.f32 %v246_v29, %v178_v37  ;;  %v268_v52 = vadd.f32 %v264_v40, %v196_v38  ;;  %v318_v53 = vmul.f32 %v7800_v46, %v5977_v32 }
  0x31   :  { %v356_v6 = vadd.f32 %v352_v56, %v284_v50  ;;  %v360_v16 = vadd.f32 %v320_v60, %v302_v55  ;;  %v5987_v41 = vld [vmem:[%s11102_s1 + $0x1f0] sm:$0xff]  ;;  %v5916_v50 = vld [vmem:[%s11102_s1 + $0x28] sm:$0xff]  ;;  %v336_v55 = vmul.f32 %v7808_v48, %v5982_v33  ;;  %v286_v59 = vadd.f32 %v282_v45, %v214_v39  ;;  %v5918_v45 = vld [vmem:[%s11102_s1 + $0x38] sm:$0xff] }
  0x32   :  { %v5921_v56 = vld [vmem:[%s11102_s1 + $0x48] sm:$0xff]  ;;  %v304_v60 = vadd.f32 %v300_v47, %v232_v44  ;;  %v322_v2 = vadd.f32 %v318_v53, %v250_v51  ;;  %v113_v7 = vmul.f32 %v7691_v3, %v5916_v50  ;;  %v141_v17 = vmul.f32 %v7709_v9, %v5926_v57  ;;  %v92_v44 = vld [vmem:[%s11102_s1 + $0x18] sm:$0xff] }
  0x33   :  { %v364_v26 = vadd.f32 %v356_v6, %v338_v61  ;;  %v354_v61 = vmul.f32 %v7818_v54, %v5987_v41  ;;  %v340_v4 = vadd.f32 %v336_v55, %v268_v52  ;;  %v99_v6 = vmul.f32 %v7683_v1, %v90_v49  ;;  %v5976_v33 = vld [vmem:[%s11102_s1 + $0x1a8] sm:$0xff]  ;;  %v5923_v47 = vld [vmem:[%s11102_s1 + $0x58] sm:$0xff] }
  0x34   :  { %v362_v20 = vadd.f32 %v322_v2, %v304_v60  ;;  %v155_v21 = vmul.f32 %v7718_v12, %v5931_v62  ;;  %v173_v23 = vmul.f32 %v7726_v14, %v5936_v63  ;;  %v191_v25 = vmul.f32 %v7737_v19, %v5941_v0  ;;  %v5981_v37 = vld [vmem:[%s11102_s1 + $0x1c8] sm:$0xff]  ;;  %v5928_v53 = vld [vmem:[%s11102_s1 + $0x78] sm:$0xff] }
  0x35   :  { %v368_v43 = vadd.f32 %v364_v26, %v360_v16  ;;  %v358_v15 = vadd.f32 %v354_v61, %v286_v59  ;;  %v127_v16 = vmul.f32 %v7699_v5, %v5921_v56  ;;  %v5966_v26 = vld [vmem:[%s11102_s1 + $0x168] sm:$0xff]  ;;  %v209_v29 = vmul.f32 %v7746_v22, %v5946_v8  ;;  %v5933_v55 = vld [vmem:[%s11102_s1 + $0x98] sm:$0xff] }
  0x36   :  { %v227_v31 = vmul.f32 %v7754_v24, %v5951_v10  ;;  %v245_v32 = vmul.f32 %v7764_v30, %v5956_v11  ;;  %v5986_v38 = vld [vmem:[%s11102_s1 + $0x1e8] sm:$0xff]  ;;  %v159_v39 = vadd.f32 %v155_v21, %v99_v6  ;;  %v177_v40 = vadd.f32 %v173_v23, %v113_v7  ;;  %v5938_v56 = vld [vmem:[%s11102_s1 + $0xb8] sm:$0xff] }
  0x37   :  { %v7902_v58 = vadd.f32 %v7879_v35, %v368_v43  ;;  %v366_v28 = vadd.f32 %v358_v15, %v340_v4  ;;  %v195_v41 = vadd.f32 %v191_v25, %v127_v16  ;;  %v263_v43 = vmul.f32 %v7773_v34, %v5961_v18  ;;  %v5943_v62 = vld [vmem:[%s11102_s1 + $0xd8] sm:$0xff] }
  0x38   :  { %v213_v50 = vadd.f32 %v209_v29, %v141_v17  ;;  %v281_v51 = vmul.f32 %v7781_v36, %v5966_v26  ;;  %v299_v52 = vmul.f32 %v7791_v42, %v5971_v27  ;;  %v231_v57 = vadd.f32 %v227_v31, %v159_v39  ;;  %v5948_v63 = vld [vmem:[%s11102_s1 + $0xf8] sm:$0xff] }
  0x39   :  { %v384_v13 = vsel %vm383_vm0, %v7902_v58, 0.0  ;;  %v370_v49 = vadd.f32 %v366_v28, %v362_v20  ;;  %v249_v59 = vadd.f32 %v245_v32, %v177_v40  ;;  %v267_v60 = vadd.f32 %v263_v43, %v195_v41  ;;  %v5953_v0 = vld [vmem:[%s11102_s1 + $0x118] sm:$0xff] }
  0x3a   :  { %385 = vadd.xlane.f32.xlu0 %v384_v13  ;;  %v317_v61 = vmul.f32 %v7800_v46, %v5976_v33  ;;  %v285_v4 = vadd.f32 %v281_v51, %v213_v50  ;;  %v335_v6 = vmul.f32 %v7808_v48, %v5981_v37  ;;  %v353_v7 = vmul.f32 %v7818_v54, %v5986_v38  ;;  %v5958_v8 = vld [vmem:[%s11102_s1 + $0x138] sm:$0xff] }
  0x3b   :  { %v7985_v2 = vadd.f32 %v7879_v35, %v370_v49  ;;  %v303_v10 = vadd.f32 %v299_v52, %v231_v57  ;;  %v101_v13 = vmul.f32 %v7683_v1, %v92_v44  ;;  %v115_v15 = vmul.f32 %v7691_v3, %v5918_v45  ;;  %v5963_v21 = vld [vmem:[%s11102_s1 + $0x158] sm:$0xff] }
  0x3c   :  { %v321_v11 = vadd.f32 %v317_v61, %v249_v59  ;;  %v339_v17 = vadd.f32 %v335_v6, %v267_v60  ;;  %v357_v18 = vadd.f32 %v353_v7, %v285_v4  ;;  %v129_v20 = vmul.f32 %v7699_v5, %v5923_v47  ;;  %v5968_v3 = vld [vmem:[%s11102_s1 + $0x178] sm:$0xff] }
  0x3d   :  { %v390_v16 = vsel %vm383_vm0, %v7985_v2, 0.0  ;;  %v143_v25 = vmul.f32 %v7709_v9, %v5928_v53  ;;  %v157_v26 = vmul.f32 %v7718_v12, %v5933_v55  ;;  %v175_v1 = vmul.f32 %v7726_v14, %v5938_v56  ;;  %v5973_v31 = vld [vmem:[%s11102_s1 + $0x198] sm:$0xff] }
  0x3e   :  { %391 = vadd.xlane.f32.xlu1 %v390_v16  ;;  %v361_v23 = vadd.f32 %v321_v11, %v303_v10  ;;  %v365_v27 = vadd.f32 %v357_v18, %v339_v17  ;;  %v193_v28 = vmul.f32 %v7737_v19, %v5943_v62  ;;  %v211_v5 = vmul.f32 %v7746_v22, %v5948_v63  ;;  %v5978_v9 = vld [vmem:[%s11102_s1 + $0x1b8] sm:$0xff]  ;;  %v7274_v17 = vld [vmem:[%s11103_s2] sm:$0xff]   ;;  %v7275_v18 = vld [vmem:[%s11103_s2 + $0x8] sm:$0xff]   ;;  %s8399_s2 = sld [smem:[#allocation2 + $0x183]] }
  0x3f   :  { %v229_v29 = vmul.f32 %v7754_v24, %v5953_v0  ;;  %v161_v12 = vadd.f32 %v157_v26, %v101_v13  ;;  %v179_v14 = vadd.f32 %v175_v1, %v115_v15  ;;  %v247_v32 = vmul.f32 %v7764_v30, %v5958_v8  ;;  %v5983_v19 = vld [vmem:[%s11102_s1 + $0x1d8] sm:$0xff]  ;;  %6589 = vmatprep.subr.bf16.mxu0 %v7274_v17  ;;  %v7276_v1 = vld [vmem:[%s11105_s4] sm:$0xff]  }
  0x40   :  { %v265_v33 = vmul.f32 %v7773_v34, %v5963_v21  ;;  %v369_v22 = vadd.f32 %v365_v27, %v361_v23  ;;  %v197_v24 = vadd.f32 %v193_v28, %v129_v20  ;;  %v215_v37 = vadd.f32 %v211_v5, %v143_v25  ;;  %v5988_v39 = vld [vmem:[%s11102_s1 + $0x1f8] sm:$0xff]  ;;  %6590 = vmatpush3.bf16.msra.mxu0 %v7274_v17  ;;  %v73_v20 = vld [vmem:[%s11101_s0] sm:$0xff]  ;;  %v74_v21 = vld [vmem:[%s11101_s0 + $0x8] sm:$0xff] }
  0x41   :  { %v283_v38 = vmul.f32 %v7781_v36, %v5968_v3  ;;  %v233_v40 = vadd.f32 %v229_v29, %v161_v12  ;;  %v251_v41 = vadd.f32 %v247_v32, %v179_v14  ;;  %v301_v43 = vmul.f32 %v7791_v42, %v5973_v31  ;;  %v75_v25 = vld [vmem:[%s11101_s0 + $0x10] sm:$0xff]  ;;  %v76_v26 = vld [vmem:[%s11101_s0 + $0x18] sm:$0xff]  ;;  %6591 = vmatprep.subr.bf16.mxu0 %v7275_v18  ;;  %v7277_v3 = vld [vmem:[%s11105_s4 + $0x8] sm:$0xff]  }
  0x42   :  { %v319_v30 = vmul.f32 %v7800_v46, %v5978_v9  ;;  %v380_v34 = vadd.f32 %v7879_v35, %v369_v22  ;;  %v269_v44 = vadd.f32 %v265_v33, %v197_v24  ;;  %v337_v47 = vmul.f32 %v7808_v48, %v5983_v19  ;;  %6609 = vmatprep.subr.bf16.mxu1 %v7276_v1  ;;  %v77_v28 = vld [vmem:[%s11101_s0 + $0x20] sm:$0xff]  ;;  %v78_v5 = vld [vmem:[%s11101_s0 + $0x28] sm:$0xff]  ;;  %v79_v29 = vld [vmem:[%s11101_s0 + $0x30] sm:$0xff] }
  0x43   :  { %v287_v45 = vadd.f32 %v283_v38, %v215_v37  ;;  %v305_v49 = vadd.f32 %v301_v43, %v233_v40  ;;  %v355_v36 = vmul.f32 %v7818_v54, %v5988_v39  ;;  %v459_v23 = vpack.c.bf16 %v74_v21, %v73_v20  ;;  %6610 = vmatpush3.bf16.msra.mxu1 %v7276_v1  ;;  %v80_v9 = vld [vmem:[%s11101_s0 + $0x38] sm:$0xff]  ;;  %v82_v17 = vld [vmem:[%s11101_s0 + $0x48] sm:$0xff] }
  0x44   :  { %v323_v50 = vadd.f32 %v319_v30, %v251_v41  ;;  %v387_v51 = vsel %vm383_vm0, %v380_v34, 0.0  ;;  %v341_v52 = vadd.f32 %v337_v47, %v269_v44  ;;  %v460_v27 = vpack.c.bf16 %v76_v26, %v75_v25  ;;  %6592 = vmatpush3.bf16.msra.mxu0 %v7275_v18  ;;  %6611 = vmatprep.subr.bf16.mxu1 %v7277_v3  ;;  %v5991_v44 = vld [vmem:[%s11111_s10] ss:$0 sm:$0xff]  ;;  %v84_v25 = vld [vmem:[%s11101_s0 + $0x58] sm:$0xff]  ;;  %s6049_s10 = sld [smem:[#allocation2 + $0x1]] }
  0x45   :  { %388 = vadd.xlane.f32.xlu0 %v387_v51  ;;  %v359_v53 = vadd.f32 %v355_v36, %v287_v45  ;;  %6593 = vmatprep.mubr.msk.bf16.mxu0 %vm383_vm0, %v459_v23  ;;  %v461_v31 = vpack.c.bf16 %v78_v5, %v77_v28  ;;  %v462_v12 = vpack.c.bf16 %v80_v9, %v79_v29  ;;  %v83_v23 = vld [vmem:[%s11101_s0 + $0x50] sm:$0xff]  ;;  %v11147_v29 = vmov 0 }
  0x46   :  { %v363_v55 = vadd.f32 %v323_v50, %v305_v49  ;;  %v5992_v50 = vld [vmem:[%s11112_s11] ss:$0 sm:$0xff]  ;;  %v464_v1 = vpack.c.bf16 %v84_v25, %v83_v23  ;;  %v11148_v29 = vsel %vm8147_vm2, 4294967295, %v11147_v29  ;;  %s6070_s11 = sld [smem:[#allocation2 + $0x81]] }
  0x47   :  { %v367_v56 = vadd.f32 %v359_v53, %v341_v52  ;;  %6594 = vmatmul.mubr.msk.bf16.vlgmr.msra.gmra.mrb[0].mxu0 %vm383_vm0, %v460_v27  ;;  %6612 = vmatpush3.bf16.msra.mxu1 %v7277_v3  ;;  %11149 = vst [vmem:[#allocation8_spill] sm:$0xff] %v11148_v29 }
  0x48   :  { %6597 = vmatprep.mubr.msk.bf16.mxu0 %vm383_vm0, %v461_v31 }
  0x49   :  { %v371_v42 = vadd.f32 %v367_v56, %v363_v55 }
  0x4b   :  { %v382_v46 = vadd.f32 %v7879_v35, %v371_v42 }
  0x4d   :  { %v393_v57 = vsel %vm383_vm0, %v382_v46, 0.0 }
  0x4e   :  { %394 = vadd.xlane.f32.xlu1 %v393_v57 }
  0x4f   :  { %6598 = vmatmul.mubr.msk.bf16.gmra.mrb[4].mxu0 %vm383_vm0, %v462_v12 }
  0xc7   :  { %v386_v59 = vpop.xlane.xlu0 %385 }
  0xc8   :  { %v397_v60 = vmul.f32 0.03125, %v386_v59 }
  0xca   :  { %v8033_v48 = vsub.f32 %v7902_v58, %v397_v60 }
  0xcb   :  { %v392_v62 = vpop.xlane.xlu1 %391 }
  0xcc   :  { %v405_v54 = vmul.f32 %v8033_v48, %v8033_v48  ;;  %v399_v63 = vmul.f32 0.03125, %v392_v62 }
  0xce   :  { %v409_v61 = vsel %vm383_vm0, %v405_v54, 0.0  ;;  %v8039_v0 = vsub.f32 %v7985_v2, %v399_v63 }
  0xcf   :  { %410 = vadd.xlane.f32.xlu0 %v409_v61  ;;  %v8104_v61 = vld [vmem:[%s11104_s3] ss:$0 sm:$0xff] }
  0xd0   :  { %v407_v35 = vmul.f32 %v8039_v0, %v8039_v0 }
  0xd2   :  { %v415_v4 = vsel %vm383_vm0, %v407_v35, 0.0  ;;  %v389_v6 = vpop.xlane.xlu0 %388 }
  0xd3   :  { %416 = vadd.xlane.f32.xlu0 %v415_v4  ;;  %v398_v58 = vmul.f32 0.03125, %v389_v6 }
  0xd5   :  { %v402_v7 = vsub.f32 %v380_v34, %v398_v58 }
  0xd7   :  { %v406_v8 = vmul.f32 %v402_v7, %v402_v7 }
  0xd9   :  { %v412_v10 = vsel %vm383_vm0, %v406_v8, 0.0 }
  0xda   :  { %413 = vadd.xlane.f32.xlu1 %v412_v10 }
  0xdb   :  { %v395_v11 = vpop.xlane.xlu1 %394 }
  0xdc   :  { %v400_v13 = vmul.f32 0.03125, %v395_v11 }
  0xde   :  { %v8045_v15 = vsub.f32 %v382_v46, %v400_v13 }
  0xe0   :  { %v408_v2 = vmul.f32 %v8045_v15, %v8045_v15 }
  0xe2   :  { %v418_v16 = vsel %vm383_vm0, %v408_v2, 0.0 }
  0xe3   :  { %419 = vadd.xlane.f32.xlu1 %v418_v16  ;;  %v81_v16 = vld [vmem:[%s11101_s0 + $0x40] sm:$0xff] }
  0xe4   :  { %v463_v21 = vpack.c.bf16 %v82_v17, %v81_v16 }
  0xe6   :  { %6601 = vmatprep.mubr.msk.bf16.mxu0 %vm383_vm0, %v463_v21 }
  0xe7   :  { %6602 = vmatmul.mubr.msk.bf16.gmra.mrb[8].mxu0 %vm383_vm0, %v464_v1 }
 0x11a   :  { %v6595_v62 = vpop.f32.mrb[0].mxu0 }
 0x11b   :  { %v548_v63 = vpop.f32.mrb[1].mxu0  ;;  %v8115_v58 = vadd.f32 %v6595_v62, %v8104_v61 }
 0x11c   :  { %v6596_v35 = vpop.f32.mrb[2].mxu0 }
 0x11d   :  { %v551_v4 = vpop.f32.mrb[3].mxu0 }
 0x11e   :  { %v8112_v6 = vadd.f32 %v8104_v61, %v551_v4 }
 0x15c   :  { %v411_v14 = vpop.xlane.xlu0 %410 }
 0x15d   :  { %v421_v32 = vmul.f32 0.03125, %v411_v14 }
 0x15f   :  { %v425_v33 = vadd.f32 1e-05, %v421_v32  ;;  %v85_v32 = vld [vmem:[%s11101_s0 + $0x60] sm:$0xff] }
 0x160   :  { %v417_v19 = vpop.xlane.xlu0 %416 }
 0x161   :  { %7278 = vrsqrt.f32 %v425_v33  ;;  %v423_v24 = vmul.f32 0.03125, %v417_v19  ;;  %v86_v33 = vld [vmem:[%s11101_s0 + $0x68] sm:$0xff] }
 0x163   :  { %v427_v39 = vadd.f32 1e-05, %v423_v24  ;;  %v87_v24 = vld [vmem:[%s11101_s0 + $0x70] sm:$0xff] }
 0x167   :  { %v414_v22 = vpop.xlane.xlu1 %413 }
 0x168   :  { %v422_v37 = vmul.f32 0.03125, %v414_v22  ;;  %v465_v22 = vpack.c.bf16 %v86_v33, %v85_v32 }
 0x16a   :  { %v426_v38 = vadd.f32 1e-05, %v422_v37  ;;  %v88_v37 = vld [vmem:[%s11101_s0 + $0x78] sm:$0xff]  ;;  %6605 = vmatprep.mubr.msk.bf16.mxu0 %vm383_vm0, %v465_v22  ;;  %s7591_s0 = smov 80  }
 0x16b   :  { %v7279_v40 = vpop.eup %7278 }
 0x16c   :  { %7280 = vrsqrt.f32 %v426_v38  ;;  %v433_v34 = vmul.f32 %v7279_v40, %v8033_v48  ;;  %v560_v38 = vadd.f32 %v6596_v35, %v8104_v61 }
 0x16d   :  { %7282 = vrsqrt.f32 %v427_v39  ;;  %v466_v39 = vpack.c.bf16 %v88_v37, %v87_v24 }
 0x16e   :  { %v444_v49 = vmul.f32 %v5991_v44, %v433_v34 }
 0x16f   :  { %6606 = vmatmul.mubr.msk.bf16.gmra.mrb[12].mxu0 %vm383_vm0, %v466_v39  ;;  %v1266_v39 = vstv %s1265_s15  ;;  %s7593_s15 = smov 32  }
 0x170   :  { %v420_v41 = vpop.xlane.xlu1 %419  ;;  %v455_v52 = vadd.f32 %v5992_v50, %v444_v49 }
 0x171   :  { %v424_v43 = vmul.f32 0.03125, %v420_v41 }
 0x173   :  { %v428_v30 = vadd.f32 1e-05, %v424_v43 }
 0x175   :  { %7284 = vrsqrt.f32 %v428_v30 }
 0x176   :  { %v7281_v45 = vpop.eup %7280 }
 0x177   :  { %v434_v47 = vmul.f32 %v7281_v45, %v402_v7  ;;  %v7283_v36 = vpop.eup %7282  ;;  %v6599_v7 = vpop.f32.mrb[4].mxu0 }
 0x178   :  { %v435_v55 = vmul.f32 %v7283_v36, %v8039_v0  ;;  %v8107_v0 = vadd.f32 %v8104_v61, %v548_v63  ;;  %v564_v8 = vpop.f32.mrb[5].mxu0  ;;  %v573_v41 = vadd.f32 %v6599_v7, %v8104_v61 }
 0x179   :  { %v445_v51 = vmul.f32 %v5991_v44, %v434_v47  ;;  %v6600_v10 = vpop.f32.mrb[6].mxu0  ;;  %v565_v40 = vadd.f32 %v8104_v61, %v564_v8 }
 0x17a   :  { %v446_v57 = vmul.f32 %v5991_v44, %v435_v55  ;;  %830 = vrot.lane.b32.xlu1 %v8107_v0, %s7589_s18  ;;  %v567_v11 = vpop.f32.mrb[7].mxu0  ;;  %v576_v19 = vadd.f32 %v6600_v10, %v8104_v61 }
 0x17b   :  { %v456_v53 = vadd.f32 %v5992_v50, %v445_v51  ;;  %v8122_v13 = vadd.f32 %v8104_v61, %v567_v11 }
 0x17c   :  { %v457_v60 = vadd.f32 %v5992_v50, %v446_v57 }
 0x17d   :  { %v611_v56 = vpack.c.bf16 %v456_v53, %v455_v52 }
 0x17e   :  { %832 = vrot.lane.b32.xlu1 %v8112_v6, %s7589_s18 }
 0x17f   :  { %v7285_v42 = vpop.eup %7284  ;;  %6613 = vmatprep.mubr.msk.bf16.mxu1 %vm383_vm0, %v611_v56 }
 0x180   :  { %v436_v46 = vmul.f32 %v7285_v42, %v8045_v15  ;;  %v6004_v15 = vld [vmem:[%s11106_s5] ss:$0 sm:$0xff]  ;;  %s6110_s5 = sld [smem:[#allocation2 + $0x103]] }
 0x182   :  { %v447_v59 = vmul.f32 %v5991_v44, %v436_v46  ;;  %834 = vrot.lane.b32.xlu1 %v8115_v58, %s7589_s18 }
 0x184   :  { %v458_v48 = vadd.f32 %v5992_v50, %v447_v59 }
 0x186   :  { %v612_v54 = vpack.c.bf16 %v458_v48, %v457_v60  ;;  %840 = vrot.lane.b32.xlu1 %v8122_v13, %s7589_s18 }
 0x188   :  { %6614 = vmatmul.mubr.msk.bf16.vlgmr.msra.gmra.mrb[0].mxu1 %vm383_vm0, %v612_v54 }
 0x189   :  { %6621 = vmatprep.mubr.msk.f32.mxu1 %vm694_vm1, %v8107_v0 }
 0x1ba   :  { %v8263_v16 = vpop.f32.mrb[8].mxu0 }
 0x1bb   :  { %11153 = vst [vmem:[#allocation12_spill] sm:$0xff] %v8263_v16  ;;  %v8265_v17 = vpop.f32.mrb[9].mxu0 }
 0x1bc   :  { %11154 = vst [vmem:[#allocation13_spill] sm:$0xff] %v8265_v17 }
 0x1ec   :  { %v831_v43 = vpop.permute.xlu1 %830 }
 0x1f0   :  { %v833_v30 = vpop.permute.xlu1 %832 }
 0x1f4   :  { %v835_v34 = vpop.permute.xlu1 %834 }
 0x1f8   :  { %v841_v44 = vpop.permute.xlu1 %840 }
 0x25b   :  { %v6615_v2 = vpop.f32.mrb[0].mxu1 }
 0x25c   :  { %v685_v18 = vadd.f32 %v6615_v2, %v6004_v15  ;;  %v676_v20 = vpop.f32.mrb[1].mxu1 }
 0x25d   :  { %v6616_v26 = vpop.f32.mrb[2].mxu1  ;;  %v677_v28 = vadd.f32 %v6004_v15, %v676_v20  ;;  %v8269_v20 = vpop.f32.mrb[10].mxu0 }
 0x25e   :  { %v688_v3 = vadd.f32 %v6616_v26, %v6004_v15  ;;  %v679_v27 = vpop.f32.mrb[3].mxu1  ;;  %11155 = vst [vmem:[#allocation14_spill] sm:$0xff] %v8269_v20  ;;  %v8271_v21 = vpop.f32.mrb[11].mxu0 }
 0x25f   :  { %v680_v5 = vadd.f32 %v6004_v15, %v679_v27  ;;  %11156 = vst [vmem:[#allocation15_spill] sm:$0xff] %v8271_v21  ;;  %v8273_v25 = vpop.f32.mrb[12].mxu0 }
 0x260   :  { %v8151_v31 = vpack.i.bf16 %v688_v3, %v685_v18  ;;  %v8153_v9 = vpack.c.bf16 %v688_v3, %v685_v18  ;;  %v8267_v18 = vstv %s6137_s30  ;;  %11157 = vst [vmem:[#allocation16_spill] sm:$0xff] %v8273_v25  ;;  %v8278_v3 = vpop.f32.mrb[13].mxu0  ;;  %s7592_s30 = smov 48  }
 0x261   :  { %v8155_v12 = vpack.i.bf16 %v680_v5, %v677_v28  ;;  %v7001_v14 = vpack.c.bf16 %v680_v5, %v677_v28  ;;  %11158 = vst [vmem:[#allocation17_spill] sm:$0xff] %v8278_v3  ;;  %v8280_v27 = vpop.f32.mrb[14].mxu0 }
 0x262   :  { %11150 = vst [vmem:[#allocation9_spill] sm:$0xff] %v8151_v31  ;;  %11151 = vst [vmem:[#allocation10_spill] sm:$0xff] %v8153_v9  ;;  %v8282_v28 = vpop.f32.mrb[15].mxu0 }
 0x263   :  { %11152 = vst [vmem:[#allocation11_spill] sm:$0xff] %v8155_v12  ;;  %7205 = vrot.lane.b32.xlu0 %v8155_v12, %s7589_s18  ;;  %7003 = vmatprep.subr.msk.bf16.mxu1 %vm8147_vm2, %v7001_v14  ;;  %11159 = vst [vmem:[#allocation18_spill] sm:$0xff] %v8280_v27 }
 0x264   :  { %7210 = vrot.lane.b32.xlu1 %v8155_v12, %s7590_s28  ;;  %7006 = vmatpush3.bf16.xpose.msk.msra.mxu1 %vm8147_vm2, %v7001_v14  ;;  %11160 = vst [vmem:[#allocation19_spill] sm:$0xff] %v8282_v28 }
 0x267   :  { %836 = vrot.lane.b32.xlu0 %v560_v38, %s7589_s18 }
 0x268   :  { %844 = vrot.lane.b32.xlu1 %v576_v19, %s7589_s18 }
 0x26b   :  { %838 = vrot.lane.b32.xlu0 %v565_v40, %s7589_s18  ;;  %6622 = vmatmul.mubr.msk.f32.vlgmr.msra.gmra.mrb[4].mxu1 %vm694_vm1, %v8112_v6 }
 0x26c   :  { %981 = vrot.lane.b32.xlu1 %v560_v38, %s7590_s28  ;;  %6624 = vmatprep.mubr.msk.f32.mxu1 %vm694_vm1, %v8115_v58 }
 0x26f   :  { %842 = vrot.lane.b32.xlu0 %v573_v41, %s7589_s18  ;;  %6625 = vmatmul.mubr.msk.f32.gmra.mrb[6].mxu1 %vm694_vm1, %v560_v38 }
 0x270   :  { %983 = vrot.lane.b32.xlu1 %v565_v40, %s7590_s28  ;;  %6627 = vmatprep.mubr.msk.f32.mxu1 %vm694_vm1, %v565_v40 }
 0x273   :  { %979 = vrot.lane.b32.xlu0 %v8115_v58, %s7590_s28  ;;  %6628 = vmatmul.mubr.msk.f32.gmra.mrb[8].mxu1 %vm694_vm1, %v8122_v13 }
 0x274   :  { %987 = vrot.lane.b32.xlu1 %v573_v41, %s7590_s28  ;;  %6630 = vmatprep.mubr.msk.f32.mxu1 %vm694_vm1, %v573_v41 }
 0x277   :  { %985 = vrot.lane.b32.xlu0 %v8122_v13, %s7590_s28  ;;  %6631 = vmatmul.mubr.msk.f32.gmra.mrb[10].mxu1 %vm694_vm1, %v576_v19 }
 0x278   :  { %975 = vrot.lane.b32.xlu1 %v8107_v0, %s7590_s28  ;;  %6637 = vmatprep.mubr.msk.f32.mxu1 %vm694_vm1, %v831_v43  ;;  %v8299_v43 = vstv %s6049_s10  ;;  %s6269_s10 = sld [smem:[#allocation2 + $0x103]] }
 0x27b   :  { %7215 = vrot.lane.b32.xlu0 %v8155_v12, %s7591_s0 }
 0x27c   :  { %977 = vrot.lane.b32.xlu1 %v8112_v6, %s7590_s28 }
 0x27f   :  { %989 = vrot.lane.b32.xlu0 %v576_v19, %s7590_s28 }
 0x280   :  { %1124 = vrot.lane.b32.xlu1 %v8115_v58, %s7591_s0 }
 0x283   :  { %1120 = vrot.lane.b32.xlu0 %v8107_v0, %s7591_s0 }
 0x284   :  { %1128 = vrot.lane.b32.xlu1 %v565_v40, %s7591_s0  ;;  %v8295_v40 = vstv %s6069_s16  ;;  %s7594_s16 = smov 16  }
 0x287   :  { %1122 = vrot.lane.b32.xlu0 %v8112_v6, %s7591_s0 }
 0x288   :  { %1132 = vrot.lane.b32.xlu1 %v573_v41, %s7591_s0  ;;  %v8297_v41 = vstv %s6107_s17 }
 0x28b   :  { %1126 = vrot.lane.b32.xlu0 %v560_v38, %s7591_s0 }
 0x28f   :  { %1130 = vrot.lane.b32.xlu0 %v8122_v13, %s7591_s0 }
 0x293   :  { %1134 = vrot.lane.b32.xlu0 %v576_v19, %s7591_s0 }
 0x2d5   :  { %v7206_v45 = vpop.permute.xlu0 %7205 }
 0x2d6   :  { %v7208_v47 = vunpack.i.h.bf16 %v7206_v45  ;;  %v7207_v49 = vunpack.i.l.bf16 %v7206_v45  ;;  %v7211_v50 = vpop.permute.xlu1 %7210 }
 0x2d7   :  { %v7213_v36 = vunpack.i.h.bf16 %v7211_v50  ;;  %v7212_v51 = vunpack.i.l.bf16 %v7211_v50 }
 0x2d8   :  { %v7007_v52 = vpack.c.bf16 %v7208_v47, %v7207_v49 }
 0x2d9   :  { %v7013_v53 = vpack.c.bf16 %v7213_v36, %v7212_v51  ;;  %v837_v55 = vpop.permute.xlu0 %836 }
 0x2da   :  { %v845_v56 = vpop.permute.xlu1 %844  ;;  %7009 = vmatprep.subr.msk.bf16.mxu1 %vm8147_vm2, %v7007_v52 }
 0x2db   :  { %7015 = vmatprep.subr.msk.bf16.mxu0 %vm8147_vm2, %v7013_v53  ;;  %7012 = vmatpush3.bf16.xpose.msk.msra.mxu1 %vm8147_vm2, %v7007_v52 }
 0x2dc   :  { %7018 = vmatpush3.bf16.xpose.msk.msra.mxu0 %vm8147_vm2, %v7013_v53  ;;  %7113 = vmatprep.subr.msk.bf16.mxu1 %vm8147_vm2, %v7013_v53 }
 0x2dd   :  { %v839_v42 = vpop.permute.xlu0 %838 }
 0x2de   :  { %v982_v46 = vpop.permute.xlu1 %981 }
 0x2e1   :  { %v843_v57 = vpop.permute.xlu0 %842 }
 0x2e2   :  { %v984_v59 = vpop.permute.xlu1 %983  ;;  %6638 = vmatmul.mubr.msk.f32.vlgmr.msra.gmra.mrb[12].mxu1 %vm694_vm1, %v833_v30  ;;  %v8301_v30 = vstv %s6070_s11 }
 0x2e3   :  { %6640 = vmatprep.mubr.msk.f32.mxu1 %vm694_vm1, %v835_v34  ;;  %7114 = vmatpush3.bf16.xpose.msk.msra.mxu1 %vm8147_vm2, %v7013_v53  ;;  %v8303_v34 = vstv %s6108_s19  ;;  %v8312_v53 = vstv %s6050_s8 }
 0x2e5   :  { %v980_v60 = vpop.permute.xlu0 %979 }
 0x2e6   :  { %v988_v48 = vpop.permute.xlu1 %987  ;;  %6641 = vmatmul.mubr.msk.f32.gmra.mrb[14].mxu1 %vm694_vm1, %v837_v55 }
 0x2e7   :  { %6643 = vmatprep.mubr.msk.f32.mxu1 %vm694_vm1, %v839_v42 }
 0x2e9   :  { %v986_v54 = vpop.permute.xlu0 %985 }
 0x2ea   :  { %v976_v61 = vpop.permute.xlu1 %975  ;;  %6644 = vmatmul.mubr.msk.f32.gmra.mrb[16].mxu1 %vm694_vm1, %v841_v44  ;;  %v8305_v44 = vstv %s6138_s20 }
 0x2eb   :  { %6653 = vmatprep.mubr.msk.f32.mxu0 %vm694_vm1, %v976_v61  ;;  %6646 = vmatprep.mubr.msk.f32.mxu1 %vm694_vm1, %v843_v57 }
 0x2ed   :  { %v7216_v62 = vpop.permute.xlu0 %7215 }
 0x2ee   :  { %v7218_v63 = vunpack.i.h.bf16 %v7216_v62  ;;  %v7217_v0 = vunpack.i.l.bf16 %v7216_v62  ;;  %v978_v35 = vpop.permute.xlu1 %977  ;;  %6647 = vmatmul.mubr.msk.f32.gmra.mrb[18].mxu1 %vm694_vm1, %v845_v56 }
 0x2ef   :  { %6654 = vmatmul.mubr.msk.f32.vlgmr.msra.gmra.mrb[16].mxu0 %vm694_vm1, %v978_v35  ;;  %6656 = vmatprep.mubr.msk.f32.mxu1 %vm694_vm1, %v980_v60 }
 0x2f0   :  { %v7019_v4 = vpack.c.bf16 %v7218_v63, %v7217_v0  ;;  %v8323_v63 = vstv %s6139_s12  ;;  %s7595_s12 = smov 64  }
 0x2f1   :  { %v990_v6 = vpop.permute.xlu0 %989 }
 0x2f2   :  { %6657 = vmatmul.mubr.msk.f32.vlgmr.msra.gmra.mrb[20].mxu1 %vm694_vm1, %v982_v46  ;;  %7021 = vmatprep.subr.msk.bf16.mxu1 %vm8147_vm2, %v7019_v4  ;;  %v1125_v8 = vpop.permute.xlu1 %1124  ;;  %v8316_v46 = vstv %s6071_s21 }
 0x2f3   :  { %6659 = vmatprep.mubr.msk.f32.mxu1 %vm694_vm1, %v984_v59  ;;  %7024 = vmatpush3.bf16.xpose.msk.msra.mxu1 %vm8147_vm2, %v7019_v4 }
 0x2f5   :  { %v1121_v58 = vpop.permute.xlu0 %1120 }
 0x2f6   :  { %6660 = vmatmul.mubr.msk.f32.gmra.mrb[22].mxu1 %vm694_vm1, %v986_v54  ;;  %v1129_v11 = vpop.permute.xlu1 %1128 }
 0x2f7   :  { %6662 = vmatprep.mubr.msk.f32.mxu1 %vm694_vm1, %v988_v48 }
 0x2f9   :  { %v1123_v7 = vpop.permute.xlu0 %1122 }
 0x2fa   :  { %6663 = vmatmul.mubr.msk.f32.gmra.mrb[24].mxu1 %vm694_vm1, %v990_v6  ;;  %v1133_v15 = vpop.permute.xlu1 %1132 }
 0x2fb   :  { %6669 = vmatprep.mubr.msk.f32.mxu1 %vm694_vm1, %v1121_v58 }
 0x2fd   :  { %v1127_v10 = vpop.permute.xlu0 %1126 }
 0x2fe   :  { %6670 = vmatmul.mubr.msk.f32.vlgmr.msra.gmra.mrb[26].mxu1 %vm694_vm1, %v1123_v7 }
 0x2ff   :  { %6672 = vmatprep.mubr.msk.f32.mxu1 %vm694_vm1, %v1125_v8 }
 0x301   :  { %v1131_v13 = vpop.permute.xlu0 %1130 }
 0x302   :  { %6673 = vmatmul.mubr.msk.f32.gmra.mrb[28].mxu1 %vm694_vm1, %v1127_v10 }
 0x303   :  { %6675 = vmatprep.mubr.msk.f32.mxu1 %vm694_vm1, %v1129_v11 }
 0x305   :  { %v1135_v2 = vpop.permute.xlu0 %1134 }
 0x306   :  { %6676 = vmatmul.mubr.msk.f32.gmra.mrb[30].mxu1 %vm694_vm1, %v1131_v13 }
 0x307   :  { %6678 = vmatprep.mubr.msk.f32.mxu1 %vm694_vm1, %v1133_v15 }
 0x30a   :  { %6679 = vmatmul.mubr.msk.f32.gmra.mrb[32].mxu1 %vm694_vm1, %v1135_v2 }
 0x33e   :  { %v6623_v23 = vpop.f32.mrb[4].mxu1 }
 0x33f   :  { %v8276_v26 = vmul.f32 %v6623_v23, %v8267_v18  ;;  %v791_v1 = vpop.f32.mrb[5].mxu1  ;;  %v1268_v45 = vmul.f32 %v6623_v23, %v1266_v39  ;;  %v1640_v47 = vmul.f32 %v6623_v23, %v8295_v40  ;;  %v2268_v49 = vmul.f32 %v6623_v23, %v8297_v41 }
 0x340   :  { %v1267_v50 = vmul.f32 %v1266_v39, %v791_v1  ;;  %v1639_v36 = vmul.f32 %v8295_v40, %v791_v1  ;;  %v2267_v51 = vmul.f32 %v8297_v41, %v791_v1  ;;  %v2774_v52 = vmul.f32 %v8267_v18, %v791_v1 }
 0x342   :  { %v6626_v5 = vpop.f32.mrb[6].mxu1 }
 0x343   :  { %v8285_v14 = vmul.f32 %v6626_v5, %v8267_v18  ;;  %v801_v32 = vpop.f32.mrb[7].mxu1  ;;  %v1270_v55 = vmul.f32 %v6626_v5, %v1266_v39  ;;  %v1642_v56 = vmul.f32 %v6626_v5, %v8295_v40  ;;  %v2270_v42 = vmul.f32 %v6626_v5, %v8297_v41 }
 0x344   :  { %v1269_v57 = vmul.f32 %v1266_v39, %v801_v32  ;;  %v1641_v59 = vmul.f32 %v8295_v40, %v801_v32  ;;  %v2269_v60 = vmul.f32 %v8297_v41, %v801_v32  ;;  %v2776_v48 = vmul.f32 %v8267_v18, %v801_v32 }
 0x346   :  { %v6629_v33 = vpop.f32.mrb[8].mxu1 }
 0x347   :  { %v8288_v19 = vmul.f32 %v6629_v33, %v8267_v18  ;;  %v811_v22 = vpop.f32.mrb[9].mxu1  ;;  %v1272_v54 = vmul.f32 %v6629_v33, %v1266_v39  ;;  %v1644_v61 = vmul.f32 %v6629_v33, %v8295_v40  ;;  %v2272_v62 = vmul.f32 %v6629_v33, %v8297_v41 }
 0x348   :  { %v1271_v0 = vmul.f32 %v1266_v39, %v811_v22  ;;  %v1643_v35 = vmul.f32 %v8295_v40, %v811_v22  ;;  %v2271_v4 = vmul.f32 %v8297_v41, %v811_v22  ;;  %v2778_v6 = vmul.f32 %v8267_v18, %v811_v22 }
 0x34a   :  { %v6632_v24 = vpop.f32.mrb[10].mxu1 }
 0x34b   :  { %v8291_v37 = vmul.f32 %v6632_v24, %v8267_v18  ;;  %v8293_v38 = vpop.f32.mrb[11].mxu1  ;;  %v8328_v58 = vmul.f32 %v6632_v24, %v1266_v39  ;;  %v8331_v7 = vmul.f32 %v6632_v24, %v8295_v40  ;;  %v8334_v8 = vmul.f32 %v6632_v24, %v8297_v41 }
 0x34c   :  { %v8337_v10 = vmul.f32 %v1266_v39, %v8293_v38 }
 0x3b5   :  { %v6639_v11 = vpop.f32.mrb[12].mxu1 }
 0x3b6   :  { %v1278_v13 = vmul.f32 %v6639_v11, %v8299_v43  ;;  %v1650_v15 = vmul.f32 %v6639_v11, %v8301_v30  ;;  %v2278_v2 = vmul.f32 %v6639_v11, %v8303_v34  ;;  %v2785_v23 = vmul.f32 %v6639_v11, %v8305_v44  ;;  %v936_v1 = vpop.f32.mrb[13].mxu1 }
 0x3b7   :  { %v1277_v5 = vmul.f32 %v8299_v43, %v936_v1  ;;  %v1649_v32 = vmul.f32 %v8301_v30, %v936_v1  ;;  %v2277_v33 = vmul.f32 %v8303_v34, %v936_v1  ;;  %v2784_v22 = vmul.f32 %v8305_v44, %v936_v1 }
 0x3b8   :  { %v8347_v24 = vadd.f32 %v1278_v13, %v1268_v45  ;;  %v8349_v39 = vadd.f32 %v1650_v15, %v1640_v47  ;;  %v8351_v29 = vadd.f32 %v2278_v2, %v2268_v49  ;;  %v8354_v9 = vadd.f32 %v2785_v23, %v8276_v26 }
 0x3b9   :  { %v8356_v25 = vadd.f32 %v1277_v5, %v1267_v50  ;;  %v8358_v11 = vadd.f32 %v1649_v32, %v1639_v36  ;;  %v8360_v3 = vadd.f32 %v2277_v33, %v2267_v51  ;;  %v8362_v16 = vadd.f32 %v2784_v22, %v2774_v52  ;;  %v6642_v17 = vpop.f32.mrb[14].mxu1 }
 0x3ba   :  { %v1280_v1 = vmul.f32 %v6642_v17, %v8299_v43  ;;  %v1652_v45 = vmul.f32 %v6642_v17, %v8301_v30  ;;  %v2280_v47 = vmul.f32 %v6642_v17, %v8303_v34  ;;  %v2787_v49 = vmul.f32 %v6642_v17, %v8305_v44  ;;  %v946_v13 = vpop.f32.mrb[15].mxu1 }
 0x3bb   :  { %v1279_v26 = vmul.f32 %v8299_v43, %v946_v13  ;;  %v1651_v50 = vmul.f32 %v8301_v30, %v946_v13  ;;  %v2279_v36 = vmul.f32 %v8303_v34, %v946_v13  ;;  %v2786_v51 = vmul.f32 %v8305_v44, %v946_v13 }
 0x3bc   :  { %v8372_v52 = vadd.f32 %v1280_v1, %v1270_v55  ;;  %v8374_v15 = vadd.f32 %v1652_v45, %v1642_v56  ;;  %v8376_v2 = vadd.f32 %v2280_v47, %v2270_v42  ;;  %v8379_v23 = vadd.f32 %v2787_v49, %v8285_v14 }
 0x3bd   :  { %v8381_v5 = vadd.f32 %v1279_v26, %v1269_v57  ;;  %v8383_v17 = vadd.f32 %v1651_v50, %v1641_v59  ;;  %v8385_v32 = vadd.f32 %v2279_v36, %v2269_v60  ;;  %v8387_v33 = vadd.f32 %v2786_v51, %v2776_v48  ;;  %v6645_v22 = vpop.f32.mrb[16].mxu1 }
 0x3be   :  { %11161 = vst [vmem:[#allocation20_spill] sm:$0xff] %v8379_v23  ;;  %v1282_v55 = vmul.f32 %v6645_v22, %v8299_v43  ;;  %v1654_v56 = vmul.f32 %v6645_v22, %v8301_v30  ;;  %v2282_v14 = vmul.f32 %v6645_v22, %v8303_v34  ;;  %v2789_v42 = vmul.f32 %v6645_v22, %v8305_v44  ;;  %v956_v57 = vpop.f32.mrb[17].mxu1 }
 0x3bf   :  { %v1281_v59 = vmul.f32 %v8299_v43, %v956_v57  ;;  %v1653_v60 = vmul.f32 %v8301_v30, %v956_v57  ;;  %v2281_v48 = vmul.f32 %v8303_v34, %v956_v57  ;;  %v2788_v1 = vmul.f32 %v8305_v44, %v956_v57 }
 0x3c0   :  { %v8405_v45 = vadd.f32 %v1282_v55, %v1272_v54  ;;  %v8407_v47 = vadd.f32 %v1654_v56, %v1644_v61  ;;  %v8409_v49 = vadd.f32 %v2282_v14, %v2272_v62  ;;  %v8412_v13 = vadd.f32 %v2789_v42, %v8288_v19 }
 0x3c1   :  { %v1289_v26 = vadd.f32 %v1281_v59, %v1271_v0  ;;  %v8414_v50 = vadd.f32 %v1653_v60, %v1643_v35  ;;  %v8416_v36 = vadd.f32 %v2281_v48, %v2271_v4  ;;  %v8418_v51 = vadd.f32 %v2788_v1, %v2778_v6  ;;  %v6648_v22 = vpop.f32.mrb[18].mxu1 }
 0x3c2   :  { %11162 = vst [vmem:[#allocation21_spill] sm:$0xff] %v8412_v13  ;;  %v1284_v27 = vmul.f32 %v6648_v22, %v8299_v43  ;;  %v1656_v54 = vmul.f32 %v6648_v22, %v8301_v30  ;;  %v2284_v61 = vmul.f32 %v6648_v22, %v8303_v34  ;;  %v2791_v62 = vmul.f32 %v6648_v22, %v8305_v44  ;;  %v6655_v55 = vpop.f32.mrb[16].mxu0  ;;  %v966_v19 = vpop.f32.mrb[19].mxu1 }
 0x3c3   :  { %v1645_v0 = vmul.f32 %v8295_v40, %v8293_v38  ;;  %v2273_v35 = vmul.f32 %v8297_v41, %v8293_v38  ;;  %v2780_v4 = vmul.f32 %v8267_v18, %v8293_v38  ;;  %v8431_v6 = vmul.f32 %v6655_v55, %v8323_v63  ;;  %v8433_v56 = vpop.f32.mrb[17].mxu0 }
 0x3c4   :  { %v1292_v14 = vadd.f32 %v1284_v27, %v8328_v58  ;;  %v1664_v42 = vadd.f32 %v1656_v54, %v8331_v7  ;;  %v8438_v40 = vadd.f32 %v2284_v61, %v8334_v8  ;;  %v8441_v57 = vadd.f32 %v2791_v62, %v8291_v37 }
 0x3c5   :  { %11163 = vst [vmem:[#allocation22_spill] sm:$0xff] %v8431_v6  ;;  %v1283_v41 = vmul.f32 %v8299_v43, %v966_v19  ;;  %v1655_v18 = vmul.f32 %v8301_v30, %v966_v19  ;;  %v2283_v38 = vmul.f32 %v8303_v34, %v966_v19  ;;  %v2790_v59 = vmul.f32 %v8305_v44, %v966_v19  ;;  %v6658_v60 = vpop.f32.mrb[20].mxu1 }
 0x3c6   :  { %11164 = vst [vmem:[#allocation23_spill] sm:$0xff] %v8441_v57  ;;  %v8448_v48 = vstv %s8389_s13  ;;  %v8450_v27 = vpop.f32.mrb[21].mxu1  ;;  %v8453_v58 = vstv %s8391_s22  ;;  %v8456_v7 = vstv %s8397_s23  ;;  %v8459_v8 = vstv %s8399_s2 }
 0x3c7   :  { %v1291_v37 = vadd.f32 %v1283_v41, %v8337_v10  ;;  %v1663_v43 = vadd.f32 %v1655_v18, %v1645_v0  ;;  %v8462_v1 = vadd.f32 %v2283_v38, %v2273_v35  ;;  %v8464_v30 = vadd.f32 %v2790_v59, %v2780_v4 }
 0x3c8   :  { %v1296_v34 = vmul.f32 %v6655_v55, %v8312_v53  ;;  %v1295_v44 = vmul.f32 %v8312_v53, %v8433_v56  ;;  %v1298_v22 = vmul.f32 %v6658_v60, %v8312_v53  ;;  %v8471_v54 = vmul.f32 %v6658_v60, %v8323_v63 }
 0x3c9   :  { %v1668_v61 = vmul.f32 %v6655_v55, %v8316_v46  ;;  %v1667_v10 = vmul.f32 %v8316_v46, %v8433_v56  ;;  %v1297_v62 = vmul.f32 %v8312_v53, %v8450_v27  ;;  %v8478_v19 = vpop.f32.mrb[22].mxu1  ;;  %v691_v0 = vlaneseq }
 0x3ca   :  { %11165 = vst [vmem:[#allocation24_spill] sm:$0xff] %v8471_v54  ;;  %v2296_v35 = vmul.f32 %v6655_v55, %v8448_v48  ;;  %v1670_v4 = vmul.f32 %v6658_v60, %v8316_v46  ;;  %v1300_v41 = vmul.f32 %v8478_v19, %v8312_v53  ;;  %v8486_v18 = vmul.f32 %v8478_v19, %v8323_v63  ;;  %v8488_v38 = vpop.f32.mrb[23].mxu1 }
 0x3cb   :  { %v1669_v59 = vmul.f32 %v8316_v46, %v8450_v27  ;;  %v1672_v28 = vmul.f32 %v8478_v19, %v8316_v46  ;;  %v1299_v55 = vmul.f32 %v8312_v53, %v8488_v38  ;;  %v1671_v20 = vmul.f32 %v8316_v46, %v8488_v38 }
 0x3cc   :  { %11166 = vst [vmem:[#allocation25_spill] sm:$0xff] %v8486_v18  ;;  %v1304_v21 = vadd.f32 %v1296_v34, %v8347_v24  ;;  %v1303_v31 = vadd.f32 %v1295_v44, %v8356_v25  ;;  %v1305_v12 = vadd.f32 %v1297_v62, %v8381_v5  ;;  %v1306_v57 = vadd.f32 %v1298_v22, %v8372_v52 }
 0x3cd   :  { %v8504_v18 = vpop.f32.mrb[24].mxu1  ;;  %v8506_v13 = vadd.f32 %v1299_v55, %v1289_v26  ;;  %v8509_v54 = vadd.f32 %v1300_v41, %v8405_v45  ;;  %v1675_v23 = vadd.f32 %v1667_v10, %v8358_v11  ;;  %v1676_v6 = vadd.f32 %v1668_v61, %v8349_v39 }
 0x3ce   :  { %v2295_v24 = vmul.f32 %v8448_v48, %v8433_v56  ;;  %v1302_v25 = vmul.f32 %v8504_v18, %v8312_v53  ;;  %v1674_v52 = vmul.f32 %v8504_v18, %v8316_v46  ;;  %v8521_v5 = vmul.f32 %v8504_v18, %v8323_v63  ;;  %v8523_v26 = vpop.f32.mrb[25].mxu1 }
 0x3cf   :  { %v2298_v45 = vmul.f32 %v6658_v60, %v8448_v48  ;;  %v2297_v39 = vmul.f32 %v8448_v48, %v8450_v27  ;;  %v1301_v11 = vmul.f32 %v8312_v53, %v8523_v26  ;;  %v1673_v34 = vmul.f32 %v8316_v46, %v8523_v26 }
 0x3d0   :  { %v8532_v44 = vadd.f32 %v1302_v25, %v1292_v14  ;;  %v1677_v22 = vadd.f32 %v1669_v59, %v8383_v17  ;;  %v1678_v61 = vadd.f32 %v1670_v4, %v8374_v15  ;;  %v8537_v10 = vadd.f32 %v1671_v20, %v8414_v50 }
 0x3d1   :  { %v8539_v60 = vpop.f32.mrb[26].mxu1  ;;  %v8541_v62 = vadd.f32 %v1301_v11, %v1291_v37  ;;  %v8544_v41 = vadd.f32 %v1672_v28, %v8407_v47  ;;  %v8546_v53 = vadd.f32 %v1673_v34, %v1663_v43  ;;  %v8548_v46 = vadd.f32 %v1674_v52, %v1664_v42 }
 0x3d2   :  { %v1314_v14 = vmul.f32 %v8539_v60, %v8453_v58  ;;  %v1686_v15 = vmul.f32 %v8539_v60, %v8456_v7  ;;  %v8556_v20 = vmul.f32 %v8539_v60, %v8459_v8  ;;  %v8558_v17 = vpop.f32.mrb[27].mxu1  ;;  %v8564_v50 = vand.u32 127, %v691_v0 }
 0x3d3   :  { %v1313_v28 = vmul.f32 %v8453_v58, %v8558_v17  ;;  %v1685_v47 = vmul.f32 %v8456_v7, %v8558_v17  ;;  %v8567_v42 = vstv %s8498_s24  ;;  %v8572_v4 = vadd.f32 %v2295_v24, %v8360_v3  ;;  %s6229_s24 = sld [smem:[#allocation2 + $0x81]] }
 0x3d4   :  { %v1322_v37 = vadd.f32 %v1314_v14, %v1304_v21  ;;  %v8569_v43 = vadd.f32 %v1686_v15, %v1676_v6  ;;  %v8575_v59 = vadd.f32 %v2296_v35, %v8351_v29  ;;  %v8584_v0 = vadd.f32 %v2297_v39, %v8385_v32 }
 0x3d5   :  { %v8577_v55 = vpop.f32.mrb[28].mxu1  ;;  %v1321_v25 = vadd.f32 %v1313_v28, %v1303_v31  ;;  %v8579_v52 = vadd.f32 %v1685_v47, %v1675_v23  ;;  %v8587_v21 = vadd.f32 %v2298_v45, %v8376_v2  ;;  %vm693_vm3 = vcmp.lt.s32.totalorder %v8564_v50, 9 }
 0x3d6   :  { %v1316_v3 = vmul.f32 %v8577_v55, %v8453_v58  ;;  %v1688_v29 = vmul.f32 %v8577_v55, %v8456_v7  ;;  %v8595_v6 = vmul.f32 %v8577_v55, %v8459_v8  ;;  %v8597_v31 = vpop.f32.mrb[29].mxu1  ;;  %v1332_v2 = vadd.f32 %v8567_v42, %v1322_v37 }
 0x3d7   :  { %v1315_v23 = vmul.f32 %v8453_v58, %v8597_v31  ;;  %v1687_v32 = vmul.f32 %v8456_v7, %v8597_v31  ;;  %v1331_v35 = vadd.f32 %v8567_v42, %v1321_v25 }
 0x3d8   :  { %v1324_v24 = vadd.f32 %v1316_v3, %v1306_v57  ;;  %v8608_v34 = vadd.f32 %v1688_v29, %v1678_v61  ;;  %v8620_v47 = vsel %vm693_vm3, %v1332_v2, -1e+30  ;;  %v8624_v57 = vstv %s6110_s5  ;;  %s6267_s5 = sld [smem:[#allocation2 + $0x101]] }
 0x3d9   :  { %v8606_v45 = vpop.f32.mrb[30].mxu1  ;;  %v1323_v39 = vadd.f32 %v1315_v23, %v1305_v12  ;;  %v1695_v11 = vadd.f32 %v1687_v32, %v1677_v22  ;;  %11168 = vst [vmem:[#allocation27_spill] sm:$0xff] %v8620_v47  ;;  %v1352_v22 = vsel %vm694_vm1, %v8620_v47, -inf  ;;  %v8630_v61 = vsel %vm693_vm3, %v1331_v35, -1e+30 }
 0x3da   :  { %v1318_v14 = vmul.f32 %v8606_v45, %v8453_v58  ;;  %v8614_v15 = vmul.f32 %v8606_v45, %v8459_v8  ;;  %v8616_v28 = vpop.f32.mrb[31].mxu1  ;;  %11169 = vst [vmem:[#allocation28_spill] sm:$0xff] %v8630_v61  ;;  %1353 = vmax.xlane.f32.xlu0 %v1352_v22  ;;  %v1349_v25 = vsel %vm694_vm1, %v8630_v61, -inf  ;;  %v8640_v32 = vstv %s8581_s25 }
 0x3db   :  { %v1317_v12 = vmul.f32 %v8453_v58, %v8616_v28  ;;  %v1333_v37 = vadd.f32 %v8567_v42, %v1323_v39  ;;  %v8644_v2 = vmul.f32 %v8323_v63, %v8433_v56  ;;  %1350 = vmax.xlane.f32.xlu1 %v1349_v25  ;;  %v8661_v56 = vmul.f32 %v8478_v19, %v8448_v48 }
 0x3dc   :  { %11167 = vst [vmem:[#allocation26_spill] sm:$0xff] %v8614_v15  ;;  %v1326_v23 = vadd.f32 %v1318_v14, %v8509_v54  ;;  %v8657_v54 = vmul.f32 %v8323_v63, %v8450_v27  ;;  %v8665_v14 = vmul.f32 %v8448_v48, %v8488_v38  ;;  %v8671_v25 = vmul.f32 %v8323_v63, %v8488_v38 }
 0x3dd   :  { %v8635_v3 = vpop.f32.mrb[32].mxu1  ;;  %v1325_v29 = vadd.f32 %v1317_v12, %v8506_v13  ;;  %v1334_v13 = vadd.f32 %v8567_v42, %v1324_v24  ;;  %v8675_v24 = vmul.f32 %v8504_v18, %v8448_v48  ;;  %v8679_v27 = vsel %vm693_vm3, %v1333_v37, -1e+30 }
 0x3de   :  { %v1320_v35 = vmul.f32 %v8635_v3, %v8453_v58  ;;  %v8650_v39 = vmul.f32 %v8635_v3, %v8459_v8  ;;  %v8652_v22 = vpop.f32.mrb[33].mxu1  ;;  %11171 = vst [vmem:[#allocation30_spill] sm:$0xff] %v8679_v27  ;;  %v1690_v61 = vmul.f32 %v8606_v45, %v8456_v7  ;;  %v1689_v18 = vmul.f32 %v8456_v7, %v8616_v28 }
 0x3df   :  { %v1319_v12 = vmul.f32 %v8453_v58, %v8652_v22  ;;  %v1335_v19 = vadd.f32 %v8567_v42, %v1325_v29  ;;  %v1355_v58 = vsel %vm694_vm1, %v8679_v27, -inf  ;;  %v8692_v37 = vsel %vm693_vm3, %v1334_v13, -1e+30 }
 0x3e0   :  { %11170 = vst [vmem:[#allocation29_spill] sm:$0xff] %v8650_v39  ;;  %v1328_v38 = vadd.f32 %v1320_v35, %v8532_v44  ;;  %1356 = vmax.xlane.f32.xlu0 %v1355_v58  ;;  %11172 = vst [vmem:[#allocation31_spill] sm:$0xff] %v8692_v37  ;;  %v1336_v39 = vadd.f32 %v8567_v42, %v1326_v23  ;;  %v1692_v27 = vmul.f32 %v8635_v3, %v8456_v7 }
 0x3e1   :  { %v1327_v47 = vadd.f32 %v1319_v12, %v8541_v62  ;;  %v8696_v29 = vsel %vm693_vm3, %v1335_v19, -1e+30  ;;  %v1691_v44 = vmul.f32 %v8456_v7, %v8652_v22  ;;  %v2314_v13 = vmul.f32 %v8539_v60, %v8624_v57 }
 0x3e2   :  { %11173 = vst [vmem:[#allocation32_spill] sm:$0xff] %v8696_v29  ;;  %v1361_v62 = vsel %vm694_vm1, %v8696_v29, -inf  ;;  %v2313_v12 = vmul.f32 %v8624_v57, %v8558_v17  ;;  %v2315_v23 = vmul.f32 %v8624_v57, %v8597_v31  ;;  %v1703_v19 = vadd.f32 %v8640_v32, %v8579_v52 }
 0x3e3   :  { %v1337_v35 = vadd.f32 %v8567_v42, %v1327_v47  ;;  %1362 = vmax.xlane.f32.xlu1 %v1361_v62  ;;  %v2316_v7 = vmul.f32 %v8577_v55, %v8624_v57  ;;  %v1358_v58 = vsel %vm694_vm1, %v8692_v37, -inf  ;;  %v1704_v60 = vadd.f32 %v8640_v32, %v8569_v43 }
 0x3e4   :  { %1359 = vmax.xlane.f32.xlu0 %v1358_v58  ;;  %v8726_v62 = vsel %vm693_vm3, %v1336_v39, -1e+30  ;;  %v1338_v55 = vadd.f32 %v8567_v42, %v1328_v38  ;;  %v1697_v29 = vadd.f32 %v1689_v18, %v8537_v10  ;;  %v1705_v37 = vadd.f32 %v8640_v32, %v1695_v11 }
 0x3e5   :  { %v8720_v47 = vsel %vm693_vm3, %v1337_v35, -1e+30  ;;  %v1698_v35 = vadd.f32 %v1690_v61, %v8544_v41  ;;  %v1699_v15 = vadd.f32 %v1691_v44, %v8546_v53  ;;  %v1700_v43 = vadd.f32 %v1692_v27, %v8548_v46 }
 0x3e6   :  { %v1367_v52 = vsel %vm694_vm1, %v8720_v47, -inf  ;;  %v8738_v39 = vsel %vm693_vm3, %v1703_v19, -1e+30  ;;  %v8741_v58 = vadd.f32 %v2313_v12, %v8572_v4  ;;  %v8744_v42 = vadd.f32 %v2314_v13, %v8575_v59 }
 0x3e7   :  { %1368 = vmax.xlane.f32.xlu1 %v1367_v52  ;;  %v8747_v10 = vadd.f32 %v2315_v23, %v8584_v0  ;;  %v2301_v41 = vmul.f32 %v8448_v48, %v8523_v26  ;;  %v2808_v53 = vmul.f32 %v8323_v63, %v8523_v26  ;;  %v1364_v46 = vsel %vm694_vm1, %v8726_v62, -inf  ;;  %v11174_v52 = vld [vmem:[#allocation22_spill] sm:$0xff] }
 0x3e8   :  { %v8756_v11 = vadd.f32 %v2316_v7, %v8587_v21  ;;  %v2820_v4 = vmul.f32 %v8459_v8, %v8558_v17  ;;  %1365 = vmax.xlane.f32.xlu0 %v1364_v46  ;;  %v8762_v59 = vsel %vm693_vm3, %v1338_v55, -1e+30  ;;  %v8766_v48 = vsel %vm693_vm3, %v1704_v60, -1e+30 }
 0x3e9   :  { %v1706_v63 = vadd.f32 %v8640_v32, %v8608_v34  ;;  %v2822_v26 = vmul.f32 %v8459_v8, %v8597_v31  ;;  %v1719_v0 = vsel %vm694_vm1, %v8738_v39, -inf  ;;  %v8776_v17 = vsel %vm693_vm3, %v1705_v37, -1e+30 }
 0x3ea   :  { %v1707_v21 = vadd.f32 %v8640_v32, %v1697_v29  ;;  %v2318_v61 = vmul.f32 %v8606_v45, %v8624_v57  ;;  %v2317_v27 = vmul.f32 %v8624_v57, %v8616_v28  ;;  %v2824_v34 = vmul.f32 %v8459_v8, %v8616_v28 }
 0x3eb   :  { %v2320_v31 = vmul.f32 %v8635_v3, %v8624_v57  ;;  %1720 = vmax.xlane.f32.xlu1 %v1719_v0  ;;  %v2319_v38 = vmul.f32 %v8624_v57, %v8652_v22  ;;  %v2826_v18 = vmul.f32 %v8459_v8, %v8652_v22  ;;  %v1370_v37 = vsel %vm694_vm1, %v8762_v59, -inf  ;;  %v11179_v0 = vld [vmem:[#allocation23_spill] sm:$0xff] }
 0x3ec   :  { %v1722_v45 = vsel %vm694_vm1, %v8766_v48, -inf  ;;  %1371 = vmax.xlane.f32.xlu0 %v1370_v37  ;;  %v1725_v28 = vsel %vm694_vm1, %v8776_v17, -inf  ;;  %v8799_v3 = vsel %vm693_vm3, %v1706_v63, -1e+30  ;;  %v1709_v29 = vadd.f32 %v8640_v32, %v1699_v15  ;;  %v11178_v63 = vld [vmem:[#allocation25_spill] sm:$0xff] }
 0x3ed   :  { %v2307_v57 = vadd.f32 %v8665_v14, %v8416_v36  ;;  %v8806_v8 = vsel %vm693_vm3, %v1707_v21, -1e+30  ;;  %v2308_v22 = vadd.f32 %v8661_v56, %v8409_v49  ;;  %v2309_v44 = vadd.f32 %v2301_v41, %v8462_v1  ;;  %v11175_v41 = vld [vmem:[#allocation20_spill] sm:$0xff] }
 0x3ee   :  { %v2310_v13 = vadd.f32 %v8675_v24, %v8438_v40  ;;  %v2810_v15 = vadd.f32 %v8644_v2, %v8362_v16  ;;  %v2812_v36 = vadd.f32 %v8657_v54, %v8387_v33  ;;  %v2814_v14 = vadd.f32 %v8671_v25, %v8418_v51 }
 0x3ef   :  { %1726 = vmax.xlane.f32.xlu1 %v1725_v28  ;;  %v8813_v12 = vadd.f32 %v2317_v27, %v2307_v57  ;;  %v8821_v23 = vadd.f32 %v2318_v61, %v2308_v22  ;;  %v8823_v49 = vadd.f32 %v2319_v38, %v2309_v44  ;;  %v2816_v40 = vadd.f32 %v2808_v53, %v8464_v30  ;;  %v11176_v53 = vld [vmem:[#allocation24_spill] sm:$0xff]  ;;  %v11180_v61 = vld [vmem:[#allocation26_spill] sm:$0xff] }
 0x3f0   :  { %v8825_v1 = vadd.f32 %v2320_v31, %v2310_v13  ;;  %1723 = vmax.xlane.f32.xlu0 %v1722_v45  ;;  %v1708_v56 = vadd.f32 %v8640_v32, %v1698_v35  ;;  %v8829_v24 = vadd.f32 %v2820_v4, %v2810_v15  ;;  %v8831_v16 = vadd.f32 %v2822_v26, %v2812_v36  ;;  %v11177_v4 = vld [vmem:[#allocation21_spill] sm:$0xff]  ;;  %v11182_v45 = vld [vmem:[#allocation27_spill] sm:$0xff]  ;;  %v11183_v57 = vld [vmem:[#allocation28_spill] sm:$0xff] }
 0x3f1   :  { %v8833_v2 = vadd.f32 %v2824_v34, %v2814_v14  ;;  %v1731_v33 = vsel %vm694_vm1, %v8806_v8, -inf  ;;  %v8837_v51 = vadd.f32 %v2826_v18, %v2816_v40  ;;  %v8841_v54 = vsel %vm693_vm3, %v1709_v29, -1e+30  ;;  %v11181_v34 = vld [vmem:[#allocation29_spill] sm:$0xff]  ;;  %v11184_v36 = vld [vmem:[#allocation30_spill] sm:$0xff] }
 0x3f2   :  { %v1728_v30 = vsel %vm694_vm1, %v8799_v3, -inf  ;;  %v8847_v25 = vsel %vm693_vm3, %v1708_v56, -1e+30  ;;  %v1710_v19 = vadd.f32 %v8640_v32, %v1700_v43  ;;  %v1737_v7 = vsel %vm694_vm1, %v8841_v54, -inf }
 0x3f3   :  { %1732 = vmax.xlane.f32.xlu1 %v1731_v33  ;;  %v8852_v60 = vstv %s6141_s26  ;;  %v2811_v55 = vadd.f32 %v11174_v52, %v8354_v9  ;;  %v1734_v35 = vsel %vm694_vm1, %v8847_v25, -inf  ;;  %v2813_v46 = vadd.f32 %v11176_v53, %v11175_v41  ;;  %v11185_v33 = vld [vmem:[#allocation32_spill] sm:$0xff] }
 0x3f4   :  { %1729 = vmax.xlane.f32.xlu0 %v1728_v30  ;;  %v2815_v26 = vadd.f32 %v11178_v63, %v11177_v4  ;;  %v2817_v32 = vadd.f32 %v8521_v5, %v11179_v0  ;;  %v8866_v43 = vsel %vm693_vm3, %v1710_v19, -1e+30 }
 0x3f5   :  { %v2829_v21 = vadd.f32 %v8556_v20, %v2811_v55  ;;  %v2831_v9 = vadd.f32 %v8595_v6, %v2813_v46  ;;  %v1740_v18 = vsel %vm694_vm1, %v8866_v43, -inf }
 0x3f6   :  { %v2833_v27 = vadd.f32 %v11180_v61, %v2815_v26  ;;  %v2835_v31 = vadd.f32 %v11181_v34, %v2817_v32 }
 0x3f7   :  { %1738 = vmax.xlane.f32.xlu1 %v1737_v7  ;;  %v8873_v38 = vadd.f32 %v8852_v60, %v2829_v21  ;;  %v8878_v5 = vadd.f32 %v8852_v60, %v2831_v9  ;;  %v11186_v7 = vld [vmem:[#allocation31_spill] sm:$0xff] }
 0x3f8   :  { %1735 = vmax.xlane.f32.xlu0 %v1734_v35  ;;  %v8881_v37 = vadd.f32 %v8852_v60, %v2833_v27  ;;  %v8884_v20 = vadd.f32 %v8852_v60, %v2835_v31 }
 0x3fc   :  { %1741 = vmax.xlane.f32.xlu0 %v1740_v18 }
 0x467   :  { %v1354_v6 = vpop.xlane.xlu0 %1353 }
 0x468   :  { %v1374_v28 = vsub.f32 %v11182_v45, %v1354_v6  ;;  %v1351_v29 = vpop.xlane.xlu1 %1350 }
 0x469   :  { %v1373_v22 = vsub.f32 %v11183_v57, %v1351_v29 }
 0x46a   :  { %v1383_v44 = vmul.f32 1.442695, %v1374_v28  ;;  %v2330_v28 = vstv %s6111_s27 }
 0x46b   :  { %v1381_v13 = vmul.f32 1.442695, %v1373_v22 }
 0x46c   :  { %7286 = vpow2.f32 %v1383_v44  ;;  %v2331_v44 = vadd.f32 %v2330_v28, %v8741_v58  ;;  %v2332_v58 = vadd.f32 %v2330_v28, %v8744_v42 }
 0x46d   :  { %v1357_v15 = vpop.xlane.xlu0 %1356  ;;  %7288 = vpow2.f32 %v1381_v13 }
 0x46e   :  { %v1375_v14 = vsub.f32 %v11184_v36, %v1357_v15  ;;  %v8940_v42 = vsel %vm693_vm3, %v2332_v58, -1e+30 }
 0x470   :  { %v1363_v40 = vpop.xlane.xlu1 %1362  ;;  %v1385_v56 = vmul.f32 1.442695, %v1375_v14 }
 0x471   :  { %v1377_v30 = vsub.f32 %v11185_v33, %v1363_v40  ;;  %v1360_v19 = vpop.xlane.xlu0 %1359  ;;  %v8926_v33 = vsel %vm693_vm3, %v2331_v44, -1e+30 }
 0x472   :  { %7290 = vpow2.f32 %v1385_v56  ;;  %v1376_v52 = vsub.f32 %v11186_v7, %v1360_v19 }
 0x473   :  { %v1389_v55 = vmul.f32 1.442695, %v1377_v30  ;;  %v2333_v30 = vadd.f32 %v2330_v28, %v8747_v10 }
 0x474   :  { %v1369_v35 = vpop.xlane.xlu1 %1368  ;;  %v1387_v41 = vmul.f32 1.442695, %v1376_v52 }
 0x475   :  { %7292 = vpow2.f32 %v1389_v55  ;;  %v1379_v53 = vsub.f32 %v8720_v47, %v1369_v35  ;;  %v1366_v46 = vpop.xlane.xlu0 %1365  ;;  %v2347_v35 = vsel %vm694_vm1, %v8926_v33, -inf  ;;  %v8944_v10 = vsel %vm693_vm3, %v2333_v30, -1e+30 }
 0x476   :  { %7294 = vpow2.f32 %v1387_v41  ;;  %v1378_v4 = vsub.f32 %v8726_v62, %v1366_v46  ;;  %v8893_v26 = vpop.eup %7286 }
 0x477   :  { %v1393_v63 = vmul.f32 1.442695, %v1379_v53  ;;  %v8895_v0 = vpop.eup %7288  ;;  %v1400_v21 = vsel %vm694_vm1, %v8893_v26, 0.0 }
 0x478   :  { %v1391_v32 = vmul.f32 1.442695, %v1378_v4  ;;  %1401 = vadd.xlane.f32.xlu0 %v1400_v21  ;;  %v1397_v47 = vsel %vm694_vm1, %v8895_v0, 0.0  ;;  %v1721_v62 = vpop.xlane.xlu1 %1720  ;;  %v2350_v21 = vsel %vm694_vm1, %v8940_v42, -inf }
 0x479   :  { %7296 = vpow2.f32 %v1393_v63  ;;  %v1372_v9 = vpop.xlane.xlu0 %1371  ;;  %1398 = vadd.xlane.f32.xlu1 %v1397_v47  ;;  %v1743_v36 = vsub.f32 %v8738_v39, %v1721_v62 }
 0x47a   :  { %7298 = vpow2.f32 %v1391_v32  ;;  %v1380_v61 = vsub.f32 %v8762_v59, %v1372_v9  ;;  %v2353_v9 = vsel %vm694_vm1, %v8944_v10, -inf }
 0x47b   :  { %v1751_v39 = vmul.f32 1.442695, %v1743_v36 }
 0x47c   :  { %v8902_v27 = vpop.eup %7290  ;;  %v1395_v34 = vmul.f32 1.442695, %v1380_v61  ;;  %v1727_v59 = vpop.xlane.xlu1 %1726 }
 0x47d   :  { %v1403_v31 = vsel %vm694_vm1, %v8902_v27, 0.0  ;;  %v1724_v6 = vpop.xlane.xlu0 %1723  ;;  %v1745_v19 = vsub.f32 %v8776_v17, %v1727_v59  ;;  %v2334_v17 = vadd.f32 %v2330_v28, %v8756_v11 }
 0x47e   :  { %7300 = vpow2.f32 %v1395_v34  ;;  %1404 = vadd.xlane.f32.xlu1 %v1403_v31  ;;  %v1744_v52 = vsub.f32 %v8766_v48, %v1724_v6  ;;  %v2335_v48 = vadd.f32 %v2330_v28, %v8813_v12  ;;  %v2336_v12 = vadd.f32 %v2330_v28, %v8821_v23 }
 0x47f   :  { %v8906_v18 = vpop.eup %7292  ;;  %v1755_v41 = vmul.f32 1.442695, %v1745_v19  ;;  %7302 = vpow2.f32 %v1751_v39  ;;  %v8956_v11 = vsel %vm693_vm3, %v2334_v17, -1e+30 }
 0x480   :  { %v1409_v45 = vsel %vm694_vm1, %v8906_v18, 0.0  ;;  %v8910_v29 = vpop.eup %7294  ;;  %v1733_v56 = vpop.xlane.xlu1 %1732  ;;  %v1753_v4 = vmul.f32 1.442695, %v1744_v52  ;;  %v2356_v6 = vsel %vm694_vm1, %v8956_v11, -inf  ;;  %v8972_v23 = vsel %vm693_vm3, %v2336_v12, -1e+30 }
 0x481   :  { %v1406_v57 = vsel %vm694_vm1, %v8910_v29, 0.0  ;;  %v1730_v14 = vpop.xlane.xlu0 %1729  ;;  %v1747_v53 = vsub.f32 %v8806_v8, %v1733_v56  ;;  %v8960_v8 = vsel %vm693_vm3, %v2335_v48, -1e+30  ;;  %7304 = vpow2.f32 %v1755_v41 }
 0x482   :  { %1407 = vadd.xlane.f32.xlu0 %v1406_v57  ;;  %1410 = vadd.xlane.f32.xlu1 %v1409_v45  ;;  %v1746_v63 = vsub.f32 %v8799_v3, %v1730_v14  ;;  %v2337_v3 = vadd.f32 %v2330_v28, %v8823_v49  ;;  %7306 = vpow2.f32 %v1753_v4  ;;  %v2359_v45 = vsel %vm694_vm1, %v8960_v8, -inf }
 0x483   :  { %v8914_v22 = vpop.eup %7296  ;;  %v1759_v47 = vmul.f32 1.442695, %v1747_v53  ;;  %v2362_v44 = vsel %vm694_vm1, %v8972_v23, -inf }
 0x484   :  { %v1415_v13 = vsel %vm694_vm1, %v8914_v22, 0.0  ;;  %v8919_v15 = vpop.eup %7298  ;;  %v1739_v32 = vpop.xlane.xlu1 %1738  ;;  %v1757_v62 = vmul.f32 1.442695, %v1746_v63  ;;  %v8976_v49 = vsel %vm693_vm3, %v2337_v3, -1e+30 }
 0x485   :  { %v1412_v40 = vsel %vm694_vm1, %v8919_v15, 0.0  ;;  %v1736_v46 = vpop.xlane.xlu0 %1735  ;;  %v1749_v61 = vsub.f32 %v8841_v54, %v1739_v32  ;;  %v2338_v54 = vadd.f32 %v2330_v28, %v8825_v1  ;;  %7308 = vpow2.f32 %v1759_v47 }
 0x486   :  { %1413 = vadd.xlane.f32.xlu0 %v1412_v40  ;;  %1416 = vadd.xlane.f32.xlu1 %v1415_v13  ;;  %v1748_v34 = vsub.f32 %v8847_v25, %v1736_v46  ;;  %7310 = vpow2.f32 %v1757_v62  ;;  %v2365_v13 = vsel %vm694_vm1, %v8976_v49, -inf  ;;  %v2838_v46 = vadd.f32 %v8852_v60, %v8829_v24 }
 0x487   :  { %v1763_v25 = vmul.f32 1.442695, %v1749_v61  ;;  %v8988_v14 = vsel %vm693_vm3, %v2338_v54, -1e+30  ;;  %v2840_v32 = vadd.f32 %v8852_v60, %v8831_v16  ;;  %v2842_v24 = vadd.f32 %v8852_v60, %v8833_v2 }
 0x488   :  { %v8931_v7 = vpop.eup %7300  ;;  %v1761_v59 = vmul.f32 1.442695, %v1748_v34  ;;  %v9026_v63 = vsel %vm693_vm3, %v2838_v46, -1e+30  ;;  %v2844_v16 = vadd.f32 %v8852_v60, %v8837_v51 }
 0x489   :  { %v1418_v55 = vsel %vm694_vm1, %v8931_v7, 0.0  ;;  %v1742_v31 = vpop.xlane.xlu0 %1741  ;;  %v8984_v36 = vpop.eup %7302  ;;  %7312 = vpow2.f32 %v1763_v25  ;;  %v9042_v3 = vsel %vm693_vm3, %v2842_v24, -1e+30 }
 0x48a   :  { %1419 = vadd.xlane.f32.xlu0 %v1418_v55  ;;  %2348 = vmax.xlane.f32.xlu1 %v2347_v35  ;;  %v1750_v57 = vsub.f32 %v8866_v43, %v1742_v31  ;;  %7314 = vpow2.f32 %v1761_v59  ;;  %v2368_v43 = vsel %vm694_vm1, %v8988_v14, -inf  ;;  %v1767_v40 = vsel %vm694_vm1, %v8984_v36, 0.0 }
 0x48b   :  { %v8990_v28 = vpop.eup %7304  ;;  %v2866_v47 = vsel %vm694_vm1, %v9042_v3, -inf  ;;  %v9050_v61 = vsel %vm693_vm3, %v2844_v16, -1e+30 }
 0x48c   :  { %v1765_v1 = vmul.f32 1.442695, %v1750_v57  ;;  %v8996_v56 = vpop.eup %7306  ;;  %v1773_v19 = vsel %vm694_vm1, %v8990_v28, 0.0  ;;  %v2872_v2 = vsel %vm694_vm1, %v9050_v61, -inf }
 0x48d   :  { %v1770_v30 = vsel %vm694_vm1, %v8996_v56, 0.0 }
 0x48e   :  { %2351 = vmax.xlane.f32.xlu0 %v2350_v21  ;;  %2354 = vmax.xlane.f32.xlu1 %v2353_v9  ;;  %7316 = vpow2.f32 %v1765_v1  ;;  %v2854_v21 = vsel %vm694_vm1, %v9026_v63, -inf  ;;  %v9034_v9 = vsel %vm693_vm3, %v2840_v32, -1e+30 }
 0x48f   :  { %v8998_v58 = vpop.eup %7308  ;;  %v2860_v12 = vsel %vm694_vm1, %v9034_v9, -inf }
 0x490   :  { %v9004_v39 = vpop.eup %7310  ;;  %v1779_v35 = vsel %vm694_vm1, %v8998_v58, 0.0 }
 0x491   :  { %v1776_v55 = vsel %vm694_vm1, %v9004_v39, 0.0 }
 0x492   :  { %2357 = vmax.xlane.f32.xlu0 %v2356_v6  ;;  %2360 = vmax.xlane.f32.xlu1 %v2359_v45 }
 0x493   :  { %v9006_v52 = vpop.eup %7312 }
 0x494   :  { %v9012_v17 = vpop.eup %7314  ;;  %v1785_v41 = vsel %vm694_vm1, %v9006_v52, 0.0 }
 0x495   :  { %v1782_v48 = vsel %vm694_vm1, %v9012_v17, 0.0 }
 0x496   :  { %2363 = vmax.xlane.f32.xlu0 %v2362_v44  ;;  %2366 = vmax.xlane.f32.xlu1 %v2365_v13 }
 0x498   :  { %v9018_v53 = vpop.eup %7316 }
 0x499   :  { %v1788_v4 = vsel %vm694_vm1, %v9018_v53, 0.0 }
 0x49a   :  { %2369 = vmax.xlane.f32.xlu0 %v2368_v43  ;;  %1768 = vadd.xlane.f32.xlu1 %v1767_v40 }
 0x49e   :  { %1771 = vadd.xlane.f32.xlu0 %v1770_v30  ;;  %1774 = vadd.xlane.f32.xlu1 %v1773_v19 }
 0x4a2   :  { %1777 = vadd.xlane.f32.xlu0 %v1776_v55  ;;  %1780 = vadd.xlane.f32.xlu1 %v1779_v35 }
 0x4a6   :  { %1783 = vadd.xlane.f32.xlu0 %v1782_v48  ;;  %1786 = vadd.xlane.f32.xlu1 %v1785_v41 }
 0x4aa   :  { %1789 = vadd.xlane.f32.xlu0 %v1788_v4 }
 0x4ae   :  { %2855 = vmax.xlane.f32.xlu0 %v2854_v21 }
 0x4b2   :  { %2861 = vmax.xlane.f32.xlu0 %v2860_v12 }
 0x4b6   :  { %2867 = vmax.xlane.f32.xlu0 %v2866_v47 }
 0x4ba   :  { %2873 = vmax.xlane.f32.xlu0 %v2872_v2 }
 0x505   :  { %v1402_v62 = vpop.xlane.xlu0 %1401 }
 0x506   :  { %7318 = vrcp.f32 %v1402_v62  ;;  %v1399_v34 = vpop.xlane.xlu1 %1398 }
 0x507   :  { %7320 = vrcp.f32 %v1399_v34 }
 0x50b   :  { %v1405_v31 = vpop.xlane.xlu1 %1404 }
 0x50c   :  { %7322 = vrcp.f32 %v1405_v31 }
 0x50f   :  { %v1408_v6 = vpop.xlane.xlu0 %1407  ;;  %v1411_v51 = vpop.xlane.xlu1 %1410 }
 0x510   :  { %7324 = vrcp.f32 %v1408_v6  ;;  %v7319_v60 = vpop.eup %7318 }
 0x511   :  { %7326 = vrcp.f32 %v1411_v51  ;;  %v7321_v45 = vpop.eup %7320  ;;  %v9055_v54 = vmul.f32 %v7319_v60, %v8893_v26 }
 0x512   :  { %v9058_v25 = vmul.f32 %v7321_v45, %v8895_v0 }
 0x513   :  { %v1414_v59 = vpop.xlane.xlu0 %1413  ;;  %v1417_v57 = vpop.xlane.xlu1 %1416  ;;  %v1438_v13 = vmul.f32 %v9055_v54, %v9055_v54 }
 0x514   :  { %7328 = vrcp.f32 %v1414_v59  ;;  %v1437_v1 = vmul.f32 %v9058_v25, %v9058_v25 }
 0x515   :  { %7330 = vrcp.f32 %v1417_v57  ;;  %v1446_v48 = vsel %vm694_vm1, %v1438_v13, 0.0 }
 0x516   :  { %v7323_v44 = vpop.eup %7322  ;;  %v1445_v35 = vsel %vm694_vm1, %v1437_v1, 0.0 }
 0x517   :  { %v9065_v43 = vmul.f32 %v7323_v44, %v8902_v27  ;;  %v1420_v40 = vpop.xlane.xlu0 %1419  ;;  %v2349_v26 = vpop.xlane.xlu1 %2348  ;;  %v1447_v12 = vadd.f32 %v1446_v48, %v1445_v35 }
 0x518   :  { %7332 = vrcp.f32 %v1420_v40  ;;  %v2371_v0 = vsub.f32 %v8926_v33, %v2349_v26 }
 0x519   :  { %v1439_v30 = vmul.f32 %v9065_v43, %v9065_v43 }
 0x51a   :  { %v7325_v19 = vpop.eup %7324  ;;  %v2379_v55 = vmul.f32 1.442695, %v2371_v0 }
 0x51b   :  { %v7327_v41 = vpop.eup %7326  ;;  %v9073_v46 = vmul.f32 %v7325_v19, %v8910_v29  ;;  %v2352_v27 = vpop.xlane.xlu0 %2351  ;;  %v1448_v21 = vsel %vm694_vm1, %v1439_v30, 0.0 }
 0x51c   :  { %v2355_v4 = vpop.xlane.xlu1 %2354  ;;  %7334 = vpow2.f32 %v2379_v55  ;;  %v9077_v33 = vmul.f32 %v7327_v41, %v8906_v18  ;;  %v2372_v48 = vsub.f32 %v8940_v42, %v2352_v27  ;;  %v9117_v27 = vsel %vm693_vm3, %v8873_v38, -1e+30 }
 0x51d   :  { %v2373_v32 = vsub.f32 %v8944_v10, %v2355_v4  ;;  %v1440_v24 = vmul.f32 %v9073_v46, %v9073_v46  ;;  %v1449_v10 = vadd.f32 %v1448_v21, %v1447_v12  ;;  %v9128_v38 = vsel %vm693_vm3, %v8878_v5, -1e+30 }
 0x51e   :  { %v7329_v16 = vpop.eup %7328  ;;  %v1441_v29 = vmul.f32 %v9077_v33, %v9077_v33  ;;  %v2381_v12 = vmul.f32 1.442695, %v2372_v48  ;;  %v9140_v5 = vsel %vm693_vm3, %v8881_v37, -1e+30 }
 0x51f   :  { %v2383_v47 = vmul.f32 1.442695, %v2373_v32  ;;  %v7331_v2 = vpop.eup %7330  ;;  %v2358_v62 = vpop.xlane.xlu0 %2357  ;;  %v9085_v31 = vmul.f32 %v7329_v16, %v8919_v15  ;;  %v1450_v18 = vsel %vm694_vm1, %v1440_v24, 0.0 }
 0x520   :  { %v2361_v34 = vpop.xlane.xlu1 %2360  ;;  %v9090_v51 = vmul.f32 %v7331_v2, %v8914_v22  ;;  %v1451_v45 = vadd.f32 %v1450_v18, %v1449_v10  ;;  %v1452_v15 = vsel %vm694_vm1, %v1441_v29, 0.0  ;;  %v2374_v16 = vsub.f32 %v8956_v11, %v2358_v62 }
 0x521   :  { %v2375_v6 = vsub.f32 %v8960_v8, %v2361_v34  ;;  %7336 = vpow2.f32 %v2383_v47  ;;  %v1442_v60 = vmul.f32 %v9085_v31, %v9085_v31  ;;  %v2857_v2 = vsel %vm694_vm1, %v9117_v27, -inf }
 0x522   :  { %v7333_v59 = vpop.eup %7332  ;;  %v1443_v44 = vmul.f32 %v9090_v51, %v9090_v51  ;;  %v1453_v8 = vadd.f32 %v1452_v15, %v1451_v45  ;;  %v2385_v11 = vmul.f32 1.442695, %v2374_v16 }
 0x523   :  { %v2387_v57 = vmul.f32 1.442695, %v2375_v6  ;;  %v2364_v13 = vpop.xlane.xlu0 %2363  ;;  %v9098_v40 = vmul.f32 %v7333_v59, %v8931_v7  ;;  %v1454_v22 = vsel %vm694_vm1, %v1442_v60, 0.0  ;;  %v2863_v60 = vsel %vm694_vm1, %v9128_v38, -inf }
 0x524   :  { %v2367_v1 = vpop.xlane.xlu1 %2366  ;;  %v1455_v30 = vadd.f32 %v1454_v22, %v1453_v8  ;;  %v1456_v35 = vsel %vm694_vm1, %v1443_v44, 0.0  ;;  %v2376_v6 = vsub.f32 %v8972_v23, %v2364_v13  ;;  %v2869_v8 = vsel %vm694_vm1, %v9140_v5, -inf }
 0x525   :  { %v2377_v26 = vsub.f32 %v8976_v49, %v2367_v1  ;;  %7338 = vpow2.f32 %v2387_v57  ;;  %v1444_v0 = vmul.f32 %v9098_v40, %v9098_v40 }
 0x526   :  { %v9104_v19 = vpop.eup %7334  ;;  %v1457_v32 = vadd.f32 %v1456_v35, %v1455_v30  ;;  %v2389_v15 = vmul.f32 1.442695, %v2376_v6 }
 0x527   :  { %v2391_v55 = vmul.f32 1.442695, %v2377_v26  ;;  %v2370_v41 = vpop.xlane.xlu0 %2369  ;;  %v2395_v4 = vsel %vm694_vm1, %v9104_v19, 0.0  ;;  %v1458_v49 = vsel %vm694_vm1, %v1444_v0, 0.0  ;;  %v9153_v26 = vsel %vm693_vm3, %v8884_v20, -1e+30 }
 0x528   :  { %v1769_v7 = vpop.xlane.xlu1 %1768  ;;  %2396 = vadd.xlane.f32.xlu0 %v2395_v4  ;;  %v1459_v21 = vadd.f32 %v1458_v49, %v1457_v32  ;;  %v2378_v13 = vsub.f32 %v8988_v14, %v2370_v41  ;;  %v2875_v41 = vsel %vm694_vm1, %v9153_v26, -inf }
 0x529   :  { %7340 = vpow2.f32 %v2391_v55 }
 0x52a   :  { %7342 = vrcp.f32 %v1769_v7  ;;  %1460 = vadd.xlane.f32.xlu1 %v1459_v21  ;;  %v2393_v55 = vmul.f32 1.442695, %v2378_v13 }
 0x52b   :  { %v9111_v24 = vpop.eup %7336  ;;  %v1772_v47 = vpop.xlane.xlu0 %1771 }
 0x52c   :  { %v1775_v42 = vpop.xlane.xlu1 %1774  ;;  %v2401_v29 = vsel %vm694_vm1, %v9111_v24, 0.0  ;;  %7344 = vrcp.f32 %v1772_v47 }
 0x52d   :  { %2402 = vadd.xlane.f32.xlu0 %v2401_v29  ;;  %7346 = vrcp.f32 %v1775_v42 }
 0x52e   :  { %7348 = vpow2.f32 %v2381_v12  ;;  %2858 = vmax.xlane.f32.xlu1 %v2857_v2 }
 0x52f   :  { %v9123_v34 = vpop.eup %7338  ;;  %v1778_v62 = vpop.xlane.xlu0 %1777 }
 0x530   :  { %v1781_v10 = vpop.xlane.xlu1 %1780  ;;  %7350 = vrcp.f32 %v1778_v62  ;;  %v2407_v18 = vsel %vm694_vm1, %v9123_v34, 0.0 }
 0x531   :  { %7352 = vrcp.f32 %v1781_v10  ;;  %2408 = vadd.xlane.f32.xlu0 %v2407_v18 }
 0x532   :  { %7354 = vpow2.f32 %v2385_v11  ;;  %2864 = vmax.xlane.f32.xlu1 %v2863_v60 }
 0x533   :  { %v9135_v45 = vpop.eup %7340  ;;  %v1784_v59 = vpop.xlane.xlu0 %1783 }
 0x534   :  { %v1787_v57 = vpop.xlane.xlu1 %1786  ;;  %v7343_v44 = vpop.eup %7342  ;;  %7356 = vrcp.f32 %v1784_v59  ;;  %v2413_v23 = vsel %vm694_vm1, %v9135_v45, 0.0 }
 0x535   :  { %v9146_v1 = vmul.f32 %v7343_v44, %v8984_v36  ;;  %7358 = vrcp.f32 %v1787_v57  ;;  %2414 = vadd.xlane.f32.xlu0 %v2413_v23 }
 0x536   :  { %v7345_v22 = vpop.eup %7344  ;;  %2870 = vmax.xlane.f32.xlu1 %v2869_v8 }
 0x537   :  { %v1790_v37 = vpop.xlane.xlu0 %1789  ;;  %v7347_v0 = vpop.eup %7346  ;;  %v1807_v14 = vmul.f32 %v9146_v1, %v9146_v1  ;;  %v9158_v36 = vmul.f32 %v7345_v22, %v8996_v56 }
 0x538   :  { %7360 = vrcp.f32 %v1790_v37  ;;  %v9160_v30 = vpop.eup %7348  ;;  %v9163_v35 = vmul.f32 %v7347_v0, %v8990_v28 }
 0x539   :  { %7362 = vpow2.f32 %v2389_v15  ;;  %v1808_v20 = vmul.f32 %v9158_v36, %v9158_v36  ;;  %v1815_v21 = vsel %vm694_vm1, %v1807_v14, 0.0  ;;  %v2398_v2 = vsel %vm694_vm1, %v9160_v30, 0.0 }
 0x53a   :  { %v7351_v48 = vpop.eup %7350  ;;  %2876 = vmax.xlane.f32.xlu1 %v2875_v41  ;;  %v1809_v32 = vmul.f32 %v9163_v35, %v9163_v35  ;;  %7364 = vpow2.f32 %v2393_v55 }
 0x53b   :  { %v7353_v7 = vpop.eup %7352  ;;  %v9170_v4 = vmul.f32 %v7351_v48, %v9004_v39  ;;  %v2856_v56 = vpop.xlane.xlu0 %2855  ;;  %v1816_v12 = vsel %vm694_vm1, %v1808_v20, 0.0 }
 0x53c   :  { %v2878_v49 = vsub.f32 %v9026_v63, %v2856_v56  ;;  %v9176_v28 = vmul.f32 %v7353_v7, %v8998_v58  ;;  %v9180_v16 = vpop.eup %7354  ;;  %v1817_v47 = vadd.f32 %v1816_v12, %v1815_v21  ;;  %v1818_v63 = vsel %vm694_vm1, %v1809_v32, 0.0 }
 0x53d   :  { %v1810_v39 = vmul.f32 %v9170_v4, %v9170_v4  ;;  %v2404_v13 = vsel %vm694_vm1, %v9180_v16, 0.0 }
 0x53e   :  { %v7357_v42 = vpop.eup %7356  ;;  %v2886_v29 = vmul.f32 1.442695, %v2878_v49  ;;  %v1811_v58 = vmul.f32 %v9176_v28, %v9176_v28  ;;  %2399 = vadd.xlane.f32.xlu1 %v2398_v2  ;;  %v1819_v18 = vadd.f32 %v1818_v63, %v1817_v47 }
 0x53f   :  { %v7359_v11 = vpop.eup %7358  ;;  %v2862_v62 = vpop.xlane.xlu0 %2861  ;;  %v9190_v10 = vmul.f32 %v7357_v42, %v9012_v17  ;;  %v1820_v6 = vsel %vm694_vm1, %v1810_v39, 0.0 }
 0x540   :  { %v2880_v60 = vsub.f32 %v9034_v9, %v2862_v62  ;;  %v9195_v59 = vmul.f32 %v7359_v11, %v9006_v52  ;;  %7366 = vpow2.f32 %v2886_v29  ;;  %v1821_v44 = vadd.f32 %v1820_v6, %v1819_v18 }
 0x541   :  { %v1812_v57 = vmul.f32 %v9190_v10, %v9190_v10  ;;  %v1822_v8 = vsel %vm694_vm1, %v1811_v58, 0.0 }
 0x542   :  { %v7361_v23 = vpop.eup %7360  ;;  %v2890_v15 = vmul.f32 1.442695, %v2880_v60  ;;  %v1813_v17 = vmul.f32 %v9195_v59, %v9195_v59  ;;  %2405 = vadd.xlane.f32.xlu1 %v2404_v13  ;;  %v1823_v37 = vadd.f32 %v1822_v8, %v1821_v44 }
 0x543   :  { %v9204_v22 = vpop.eup %7362  ;;  %v2868_v52 = vpop.xlane.xlu0 %2867  ;;  %v9207_v9 = vmul.f32 %v7361_v23, %v9018_v53  ;;  %v1824_v0 = vsel %vm694_vm1, %v1812_v57, 0.0 }
 0x544   :  { %v2882_v14 = vsub.f32 %v9042_v3, %v2868_v52  ;;  %7368 = vpow2.f32 %v2890_v15  ;;  %v1825_v48 = vadd.f32 %v1824_v0, %v1823_v37  ;;  %v2410_v41 = vsel %vm694_vm1, %v9204_v22, 0.0  ;;  %v9216_v56 = vpop.eup %7364 }
 0x545   :  { %v1814_v55 = vmul.f32 %v9207_v9, %v9207_v9  ;;  %v1826_v7 = vsel %vm694_vm1, %v1813_v17, 0.0  ;;  %v2416_v39 = vsel %vm694_vm1, %v9216_v56, 0.0 }
 0x546   :  { %v2894_v20 = vmul.f32 1.442695, %v2882_v14  ;;  %2411 = vadd.xlane.f32.xlu1 %v2410_v41  ;;  %v1827_v32 = vadd.f32 %v1826_v7, %v1825_v48 }
 0x547   :  { %v2874_v53 = vpop.xlane.xlu0 %2873  ;;  %v1828_v49 = vsel %vm694_vm1, %v1814_v55, 0.0 }
 0x548   :  { %v2884_v3 = vsub.f32 %v9050_v61, %v2874_v53  ;;  %7370 = vpow2.f32 %v2894_v20  ;;  %v1829_v21 = vadd.f32 %v1828_v49, %v1827_v32 }
 0x54a   :  { %v2898_v12 = vmul.f32 1.442695, %v2884_v3  ;;  %v9222_v47 = vpop.eup %7366  ;;  %2417 = vadd.xlane.f32.xlu1 %v2416_v39  ;;  %1830 = vadd.xlane.f32.xlu0 %v1829_v21 }
 0x54b   :  { %v2902_v42 = vsel %vm694_vm1, %v9222_v47, 0.0 }
 0x54c   :  { %7372 = vpow2.f32 %v2898_v12 }
 0x54e   :  { %v9226_v29 = vpop.eup %7368  ;;  %2903 = vadd.xlane.f32.xlu1 %v2902_v42 }
 0x54f   :  { %v2908_v61 = vsel %vm694_vm1, %v9226_v29, 0.0 }
 0x552   :  { %v9230_v2 = vpop.eup %7370  ;;  %2909 = vadd.xlane.f32.xlu1 %v2908_v61 }
 0x553   :  { %v2914_v58 = vsel %vm694_vm1, %v9230_v2, 0.0 }
 0x556   :  { %v9234_v63 = vpop.eup %7372  ;;  %2915 = vadd.xlane.f32.xlu1 %v2914_v58 }
 0x557   :  { %v2920_v11 = vsel %vm694_vm1, %v9234_v63, 0.0 }
 0x55a   :  { %2921 = vadd.xlane.f32.xlu1 %v2920_v11 }
 0x5b5   :  { %v2397_v57 = vpop.xlane.xlu0 %2396 }
 0x5b7   :  { %v1461_v62 = vpop.xlane.xlu1 %1460 }
 0x5b8   :  { %v1462_v18 = vrot.slane %v1461_v62, 4 }
 0x5ba   :  { %v1463_v6 = vadd.f32 %v1462_v18, %v1461_v62  ;;  %v2403_v37 = vpop.xlane.xlu0 %2402 }
 0x5bb   :  { %v2859_v60 = vpop.xlane.xlu1 %2858 }
 0x5bc   :  { %v2879_v44 = vsub.f32 %v9117_v27, %v2859_v60  ;;  %v1464_v23 = vrot.slane %v1463_v6, 2 }
 0x5be   :  { %v2888_v15 = vmul.f32 1.442695, %v2879_v44  ;;  %v1465_v13 = vadd.f32 %v1464_v23, %v1463_v6  ;;  %v2409_v27 = vpop.xlane.xlu0 %2408 }
 0x5bf   :  { %v2865_v17 = vpop.xlane.xlu1 %2864 }
 0x5c0   :  { %7374 = vpow2.f32 %v2888_v15  ;;  %v2881_v8 = vsub.f32 %v9128_v38, %v2865_v17  ;;  %v1466_v52 = vrot.slane %v1465_v13, 1 }
 0x5c2   :  { %v2892_v0 = vmul.f32 1.442695, %v2881_v8  ;;  %v1467_v14 = vadd.f32 %v1466_v52, %v1465_v13  ;;  %v2415_v3 = vpop.xlane.xlu0 %2414 }
 0x5c3   :  { %v2871_v55 = vpop.xlane.xlu1 %2870 }
 0x5c4   :  { %7376 = vpow2.f32 %v2892_v0  ;;  %v2883_v48 = vsub.f32 %v9140_v5, %v2871_v55  ;;  %7163 = vpush %v1467_v14 }
 0x5c5   :  { %7378 = vrcp.f32 %v2397_v57 }
 0x5c6   :  { %v2896_v20 = vmul.f32 1.442695, %v2883_v48 }
 0x5c7   :  { %v2877_v41 = vpop.xlane.xlu1 %2876 }
 0x5c8   :  { %7380 = vpow2.f32 %v2896_v20  ;;  %v2885_v7 = vsub.f32 %v9153_v26, %v2877_v41 }
 0x5c9   :  { %7382 = vrcp.f32 %v2403_v37 }
 0x5ca   :  { %v9242_v53 = vpop.eup %7374  ;;  %v2900_v38 = vmul.f32 1.442695, %v2885_v7  ;;  %7384 = vrcp.f32 %v2409_v27 }
 0x5cb   :  { %v2400_v32 = vpop.xlane.xlu1 %2399  ;;  %v2905_v49 = vsel %vm694_vm1, %v9242_v53, 0.0 }
 0x5cc   :  { %7386 = vpow2.f32 %v2900_v38  ;;  %2906 = vadd.xlane.f32.xlu0 %v2905_v49 }
 0x5cd   :  { %7388 = vrcp.f32 %v2400_v32 }
 0x5ce   :  { %v9246_v5 = vpop.eup %7376 }
 0x5cf   :  { %v2406_v21 = vpop.xlane.xlu1 %2405  ;;  %v2911_v12 = vsel %vm694_vm1, %v9246_v5, 0.0  ;;  %v7379_v26 = vpop.eup %7378 }
 0x5d0   :  { %7390 = vrcp.f32 %v2406_v21  ;;  %2912 = vadd.xlane.f32.xlu0 %v2911_v12  ;;  %v9255_v11 = vmul.f32 %v7379_v26, %v9104_v19 }
 0x5d1   :  { %7392 = vrcp.f32 %v2415_v3 }
 0x5d2   :  { %v9250_v39 = vpop.eup %7380  ;;  %v2435_v23 = vmul.f32 %v9255_v11, %v9255_v11 }
 0x5d3   :  { %v7383_v42 = vpop.eup %7382  ;;  %v2412_v61 = vpop.xlane.xlu1 %2411  ;;  %v2917_v58 = vsel %vm694_vm1, %v9250_v39, 0.0 }
 0x5d4   :  { %7394 = vrcp.f32 %v2412_v61  ;;  %2918 = vadd.xlane.f32.xlu0 %v2917_v58  ;;  %v7385_v62 = vpop.eup %7384  ;;  %v9260_v6 = vmul.f32 %v7383_v42, %v9111_v24  ;;  %v2443_v37 = vsel %vm694_vm1, %v2435_v23, 0.0 }
 0x5d5   :  { %v9272_v24 = vmul.f32 %v7385_v62, %v9123_v34 }
 0x5d6   :  { %v9257_v18 = vpop.eup %7386  ;;  %v2437_v13 = vmul.f32 %v9260_v6, %v9260_v6 }
 0x5d7   :  { %v7389_v60 = vpop.eup %7388  ;;  %v2418_v57 = vpop.xlane.xlu1 %2417  ;;  %v2923_v44 = vsel %vm694_vm1, %v9257_v18, 0.0  ;;  %v2439_v34 = vmul.f32 %v9272_v24, %v9272_v24 }
 0x5d8   :  { %v9267_v15 = vmul.f32 %v7389_v60, %v9160_v30  ;;  %7396 = vrcp.f32 %v2418_v57  ;;  %2924 = vadd.xlane.f32.xlu0 %v2923_v44  ;;  %v2446_v20 = vsel %vm694_vm1, %v2437_v13, 0.0  ;;  %v1831_v60 = vpop.xlane.xlu0 %1830 }
 0x5d9   :  { %v2450_v49 = vsel %vm694_vm1, %v2439_v34, 0.0  ;;  %v1832_v57 = vrot.slane %v1831_v60, 4  ;;  %v11190_v34 = vld [vmem:[#allocation14_spill] sm:$0xff] }
 0x5da   :  { %v7391_v19 = vpop.eup %7390  ;;  %v2436_v17 = vmul.f32 %v9267_v15, %v9267_v15 }
 0x5db   :  { %v7393_v8 = vpop.eup %7392  ;;  %v9277_v52 = vmul.f32 %v7391_v19, %v9180_v16  ;;  %v11187_v19 = vld [vmem:[#allocation11_spill] sm:$0xff] }
 0x5dc   :  { %v2444_v30 = vsel %vm694_vm1, %v2436_v17, 0.0  ;;  %v9284_v48 = vmul.f32 %v7393_v8, %v9135_v45 }
 0x5dd   :  { %v2438_v0 = vmul.f32 %v9277_v52, %v9277_v52  ;;  %v2445_v14 = vadd.f32 %v2444_v30, %v2443_v37  ;;  %v11188_v30 = vld [vmem:[#allocation9_spill] sm:$0xff] }
 0x5de   :  { %v7395_v55 = vpop.eup %7394  ;;  %v2441_v45 = vmul.f32 %v9284_v48, %v9284_v48 }
 0x5df   :  { %v9290_v16 = vmul.f32 %v7395_v55, %v9204_v22  ;;  %v2447_v41 = vadd.f32 %v2446_v20, %v2445_v14  ;;  %v2448_v27 = vsel %vm694_vm1, %v2438_v0, 0.0  ;;  %v9317_v0 = vld [vmem:[%s11104_s3] ss:$0 sm:$0xff]  ;;  %v11189_v14 = vld [vmem:[#allocation15_spill] sm:$0xff] }
 0x5e0   :  { %v2454_v42 = vsel %vm694_vm1, %v2441_v45, 0.0  ;;  %v9321_v55 = vadd.f32 %v9317_v0, %v11189_v14  ;;  %v9327_v20 = vadd.f32 %v9317_v0, %v11190_v34  ;;  %v6054_v45 = vadd.f32 -0.11111111, %v9055_v54 }
 0x5e1   :  { %v2440_v7 = vmul.f32 %v9290_v16, %v9290_v16  ;;  %v2449_v38 = vadd.f32 %v2448_v27, %v2447_v41  ;;  %v11191_v41 = vld [vmem:[#allocation19_spill] sm:$0xff] }
 0x5e2   :  { %v7397_v32 = vpop.eup %7396  ;;  %v9335_v27 = vadd.f32 %v9317_v0, %v11191_v41 }
 0x5e3   :  { %v9299_v3 = vmul.f32 %v7397_v32, %v9216_v56  ;;  %v2451_v21 = vadd.f32 %v2450_v49, %v2449_v38  ;;  %v2452_v22 = vsel %vm694_vm1, %v2440_v7, 0.0  ;;  %v1833_v56 = vadd.f32 %v1832_v57, %v1831_v60  ;;  %v11192_v7 = vld [vmem:[#allocation18_spill] sm:$0xff]  ;;  %v2904_v60 = vpop.xlane.xlu1 %2903 }
 0x5e4   :  { %v9341_v38 = vadd.f32 %v9317_v0, %v11192_v7  ;;  %v6053_v32 = vadd.f32 -0.11111111, %v9058_v25  ;;  %v6055_v49 = vadd.f32 -0.11111111, %v9065_v43 }
 0x5e5   :  { %v2442_v12 = vmul.f32 %v9299_v3, %v9299_v3  ;;  %v2453_v26 = vadd.f32 %v2452_v22, %v2451_v21  ;;  %v1834_v44 = vrot.slane %v1833_v56, 2  ;;  %v6056_v21 = vadd.f32 -0.11111111, %v9073_v46 }
 0x5e6   :  { %v6057_v22 = vadd.f32 -0.11111111, %v9077_v33 }
 0x5e7   :  { %v2455_v61 = vadd.f32 %v2454_v42, %v2453_v26  ;;  %v2456_v58 = vsel %vm694_vm1, %v2442_v12, 0.0  ;;  %v1835_v13 = vadd.f32 %v1834_v44, %v1833_v56  ;;  %v6058_v26 = vadd.f32 -0.11111111, %v9085_v31  ;;  %v2910_v56 = vpop.xlane.xlu1 %2909 }
 0x5e8   :  { %v6059_v42 = vadd.f32 -0.11111111, %v9090_v51 }
 0x5e9   :  { %v2457_v62 = vadd.f32 %v2456_v58, %v2455_v61  ;;  %v1836_v17 = vrot.slane %v1835_v13, 1  ;;  %v6060_v61 = vadd.f32 -0.11111111, %v9098_v40 }
 0x5eb   :  { %2458 = vadd.xlane.f32.xlu1 %v2457_v62  ;;  %v1837_v37 = vadd.f32 %v1836_v17, %v1835_v13  ;;  %v2916_v44 = vpop.xlane.xlu1 %2915 }
 0x5ef   :  { %v2922_v13 = vpop.xlane.xlu1 %2921 }
 0x5f5   :  { %s7164_s9 = spop %7163 }
 0x5f6   :  { %s1469_s4 = smul.f32 0.0017361111, %s7164_s9 }
 0x5f8   :  { %s6052_s29 = sadd.f32 -0.012345679, %s1469_s4  ;;  %s6210_s4 = sld [smem:[#allocation2 + $0x3]] }
 0x5fa   :  { %s1479_s1 = sadd.f32 1e-05, %s6052_s29  ;;  %s6231_s29 = sld [smem:[#allocation2 + $0x83]] }
 0x5fc   :  { %v1480_v23 = vstv %s1479_s1  ;;  %7220 = vrot.lane.b32.xlu1 %v11187_v19, %s7592_s30  ;;  %s6270_s1 = sld [smem:[#allocation4 + $0x2]] }
 0x5fd   :  { %7398 = vrsqrt.f32 %v1480_v23 }
 0x600   :  { %7230 = vrot.lane.b32.xlu1 %v11187_v19, %s7593_s15 }
 0x604   :  { %7235 = vrot.lane.b32.xlu1 %v11187_v19, %s7594_s16 }
 0x607   :  { %v7399_v8 = vpop.eup %7398 }
 0x608   :  { %7240 = vrot.lane.b32.xlu1 %v11188_v30, %s7589_s18  ;;  %7165 = vpush %v7399_v8 }
 0x609   :  { %7167 = vpush %v1837_v37 }
 0x60c   :  { %3439 = vrot.lane.b32.xlu1 %v9321_v55, %s7589_s18 }
 0x610   :  { %3443 = vrot.lane.b32.xlu1 %v9327_v20, %s7589_s18 }
 0x614   :  { %7250 = vrot.lane.b32.xlu1 %v11188_v30, %s7591_s0 }
 0x618   :  { %3447 = vrot.lane.b32.xlu1 %v9335_v27, %s7589_s18 }
 0x61c   :  { %3451 = vrot.lane.b32.xlu1 %v9341_v38, %s7589_s18 }
 0x620   :  { %3584 = vrot.lane.b32.xlu1 %v9321_v55, %s7590_s28 }
 0x624   :  { %3729 = vrot.lane.b32.xlu1 %v9321_v55, %s7591_s0 }
 0x628   :  { %3588 = vrot.lane.b32.xlu1 %v9327_v20, %s7590_s28 }
 0x62c   :  { %3733 = vrot.lane.b32.xlu1 %v9327_v20, %s7591_s0 }
 0x630   :  { %3592 = vrot.lane.b32.xlu1 %v9335_v27, %s7590_s28 }
 0x634   :  { %3737 = vrot.lane.b32.xlu1 %v9335_v27, %s7591_s0 }
 0x638   :  { %3596 = vrot.lane.b32.xlu1 %v9341_v38, %s7590_s28 }
 0x639   :  { %s7166_s3 = spop %7165 }
 0x63a   :  { %v1483_v12 = vstv %s7166_s3  ;;  %s7168_s11 = spop %7167 }
 0x63b   :  { %s1839_s19 = smul.f32 0.0017361111, %s7168_s11  ;;  %v1484_v58 = vmul.f32 %v6053_v32, %v1483_v12  ;;  %v9367_v25 = vmul.f32 %v6054_v45, %v1483_v12  ;;  %v9369_v54 = vmul.f32 %v6055_v49, %v1483_v12  ;;  %v9371_v62 = vmul.f32 %v6056_v21, %v1483_v12 }
 0x63c   :  { %3741 = vrot.lane.b32.xlu1 %v9341_v38, %s7591_s0  ;;  %v9375_v43 = vmul.f32 %v6057_v22, %v1483_v12  ;;  %v9377_v46 = vmul.f32 %v6058_v26, %v1483_v12  ;;  %v9379_v33 = vmul.f32 %v6059_v42, %v1483_v12  ;;  %v9381_v31 = vmul.f32 %v6060_v61, %v1483_v12 }
 0x63d   :  { %s6074_s20 = sadd.f32 -0.012345679, %s1839_s19  ;;  %v1492_v51 = vsel %vm693_vm3, %v1484_v58, 0.0  ;;  %s6209_s19 = sld [smem:[#allocation2 + $0x2]] }
 0x63e   :  { %6685 = vmatprep.mubr.msk.f32.mxu0 %vm694_vm1, %v1492_v51 }
 0x63f   :  { %s1849_s8 = sadd.f32 1e-05, %s6074_s20 }
 0x641   :  { %v1850_v40 = vstv %s1849_s8  ;;  %s6268_s8 = sld [smem:[#allocation2 + $0x102]] }
 0x642   :  { %7400 = vrsqrt.f32 %v1850_v40 }
 0x643   :  { %7402 = vrcp.f32 %v2904_v60 }
 0x644   :  { %7404 = vrcp.f32 %v2910_v56 }
 0x645   :  { %7406 = vrcp.f32 %v2916_v44 }
 0x64c   :  { %v7401_v57 = vpop.eup %7400 }
 0x64d   :  { %7169 = vpush %v7401_v57  ;;  %v7403_v8 = vpop.eup %7402 }
 0x64e   :  { %v7405_v37 = vpop.eup %7404  ;;  %v9387_v14 = vmul.f32 %v7403_v8, %v9222_v47 }
 0x64f   :  { %v7407_v41 = vpop.eup %7406  ;;  %v9390_v7 = vmul.f32 %v7405_v37, %v9226_v29 }
 0x650   :  { %v2942_v45 = vmul.f32 %v9387_v14, %v9387_v14  ;;  %v9400_v12 = vmul.f32 %v7407_v41, %v9230_v2 }
 0x651   :  { %v2944_v47 = vmul.f32 %v9390_v7, %v9390_v7 }
 0x652   :  { %v2950_v42 = vsel %vm694_vm1, %v2942_v45, 0.0  ;;  %v2946_v2 = vmul.f32 %v9400_v12, %v9400_v12 }
 0x653   :  { %v2953_v60 = vsel %vm694_vm1, %v2944_v47, 0.0 }
 0x659   :  { %v2907_v23 = vpop.xlane.xlu0 %2906 }
 0x65a   :  { %7408 = vrcp.f32 %v2907_v23 }
 0x65b   :  { %7410 = vrcp.f32 %v2922_v13 }
 0x65d   :  { %v2913_v17 = vpop.xlane.xlu0 %2912 }
 0x65e   :  { %7412 = vrcp.f32 %v2913_v17  ;;  %v2957_v17 = vsel %vm694_vm1, %v2946_v2, 0.0  ;;  %v6075_v2 = vadd.f32 -0.11111111, %v9146_v1  ;;  %v6078_v1 = vadd.f32 -0.11111111, %v9170_v4 }
 0x661   :  { %v2919_v34 = vpop.xlane.xlu0 %2918 }
 0x662   :  { %7414 = vrcp.f32 %v2919_v34 }
 0x664   :  { %v7409_v32 = vpop.eup %7408 }
 0x665   :  { %v9395_v49 = vmul.f32 %v7409_v32, %v9242_v53  ;;  %v2925_v21 = vpop.xlane.xlu0 %2924  ;;  %v7411_v22 = vpop.eup %7410 }
 0x666   :  { %7416 = vrcp.f32 %v2925_v21  ;;  %v9412_v40 = vmul.f32 %v7411_v22, %v9234_v63 }
 0x667   :  { %v2943_v29 = vmul.f32 %v9395_v49, %v9395_v49 }
 0x668   :  { %v7413_v26 = vpop.eup %7412  ;;  %v2948_v63 = vmul.f32 %v9412_v40, %v9412_v40 }
 0x669   :  { %v2951_v61 = vsel %vm694_vm1, %v2943_v29, 0.0  ;;  %v9407_v53 = vmul.f32 %v7413_v26, %v9246_v5 }
 0x66a   :  { %v2952_v58 = vadd.f32 %v2951_v61, %v2950_v42  ;;  %v2961_v45 = vsel %vm694_vm1, %v2948_v63, 0.0 }
 0x66b   :  { %v2945_v51 = vmul.f32 %v9407_v53, %v9407_v53 }
 0x66c   :  { %v7415_v57 = vpop.eup %7414  ;;  %v2954_v56 = vadd.f32 %v2953_v60, %v2952_v58  ;;  %v6076_v60 = vadd.f32 -0.11111111, %v9158_v36 }
 0x66d   :  { %v9418_v44 = vmul.f32 %v7415_v57, %v9250_v39  ;;  %v2955_v5 = vsel %vm694_vm1, %v2945_v51, 0.0 }
 0x66e   :  { %v2956_v23 = vadd.f32 %v2955_v5, %v2954_v56 }
 0x66f   :  { %v2947_v13 = vmul.f32 %v9418_v44, %v9418_v44 }
 0x670   :  { %v7417_v8 = vpop.eup %7416  ;;  %v2958_v37 = vadd.f32 %v2957_v17, %v2956_v23  ;;  %v6077_v23 = vadd.f32 -0.11111111, %v9163_v35  ;;  %v6079_v35 = vadd.f32 -0.11111111, %v9176_v28  ;;  %v6080_v28 = vadd.f32 -0.11111111, %v9190_v10 }
 0x671   :  { %v9427_v34 = vmul.f32 %v7417_v8, %v9257_v18  ;;  %v2959_v41 = vsel %vm694_vm1, %v2947_v13, 0.0 }
 0x672   :  { %v2960_v39 = vadd.f32 %v2959_v41, %v2958_v37 }
 0x673   :  { %v2949_v32 = vmul.f32 %v9427_v34, %v9427_v34 }
 0x674   :  { %v2962_v21 = vadd.f32 %v2961_v45, %v2960_v39 }
 0x675   :  { %v2963_v22 = vsel %vm694_vm1, %v2949_v32, 0.0 }
 0x676   :  { %v2964_v47 = vadd.f32 %v2963_v22, %v2962_v21 }
 0x678   :  { %v2459_v29 = vpop.xlane.xlu1 %2458  ;;  %2965 = vadd.xlane.f32.xlu0 %v2964_v47 }
 0x679   :  { %v2460_v26 = vrot.slane %v2459_v29, 4 }
 0x67b   :  { %v2461_v42 = vadd.f32 %v2460_v26, %v2459_v29 }
 0x67c   :  { %v7221_v61 = vpop.permute.xlu1 %7220 }
 0x67d   :  { %v7223_v58 = vunpack.i.h.bf16 %v7221_v61  ;;  %v7222_v18 = vunpack.i.l.bf16 %v7221_v61  ;;  %v2462_v51 = vrot.slane %v2461_v42, 2 }
 0x67e   :  { %s7170_s21 = spop %7169 }
 0x67f   :  { %v1853_v57 = vstv %s7170_s21  ;;  %v7029_v56 = vpack.c.bf16 %v7223_v58, %v7222_v18  ;;  %v2463_v5 = vadd.f32 %v2462_v51, %v2461_v42  ;;  %v6081_v58 = vadd.f32 -0.11111111, %v9195_v59  ;;  %s6298_s21 = sld [smem:[#allocation2 + $0x182]] }
 0x680   :  { %v7231_v13 = vpop.permute.xlu1 %7230  ;;  %v1854_v63 = vmul.f32 %v6075_v2, %v1853_v57  ;;  %v1855_v17 = vmul.f32 %v6076_v60, %v1853_v57  ;;  %v1856_v39 = vmul.f32 %v6077_v23, %v1853_v57  ;;  %v1857_v47 = vmul.f32 %v6078_v1, %v1853_v57  ;;  %v11193_v23 = vld [vmem:[#allocation13_spill] sm:$0xff] }
 0x681   :  { %v7233_v8 = vunpack.i.h.bf16 %v7231_v13  ;;  %v7232_v37 = vunpack.i.l.bf16 %v7231_v13  ;;  %7030 = vmatprep.subr.bf16.mxu1 %v7029_v56  ;;  %v2464_v41 = vrot.slane %v2463_v5, 1  ;;  %v1858_v42 = vmul.f32 %v6079_v35, %v1853_v57 }
 0x682   :  { %7032 = vmatpush3.bf16.msra.mxu1 %v7029_v56  ;;  %v1862_v32 = vsel %vm693_vm3, %v1854_v63, 0.0  ;;  %v1863_v22 = vsel %vm693_vm3, %v1855_v17, 0.0  ;;  %v1864_v4 = vsel %vm693_vm3, %v1856_v39, 0.0  ;;  %v1865_v18 = vsel %vm693_vm3, %v1857_v47, 0.0 }
 0x683   :  { %6701 = vmatprep.mubr.msk.f32.mxu1 %vm694_vm1, %v1862_v32  ;;  %v2465_v36 = vadd.f32 %v2464_v41, %v2463_v5  ;;  %v7041_v45 = vpack.c.bf16 %v7233_v8, %v7232_v37  ;;  %v1859_v51 = vmul.f32 %v6080_v28, %v1853_v57  ;;  %v1866_v2 = vsel %vm693_vm3, %v1858_v42, 0.0  ;;  %v11196_v8 = vld [vmem:[#allocation16_spill] sm:$0xff] }
 0x684   :  { %v7236_v21 = vpop.permute.xlu1 %7235  ;;  %v1860_v60 = vmul.f32 %v6081_v58, %v1853_v57  ;;  %v6082_v56 = vadd.f32 -0.11111111, %v9207_v9  ;;  %v9467_v13 = vadd.f32 %v9317_v0, %v11193_v23  ;;  %v9490_v37 = vadd.f32 %v9317_v0, %v11196_v8 }
 0x685   :  { %v7238_v29 = vunpack.i.h.bf16 %v7236_v21  ;;  %v7237_v26 = vunpack.i.l.bf16 %v7236_v21  ;;  %6702 = vmatmul.mubr.msk.f32.vlgmr.msra.gmra.mrb[34].mxu1 %vm694_vm1, %v1863_v22  ;;  %7171 = vpush %v2465_v36  ;;  %7042 = vmatprep.subr.bf16.mxu1 %v7041_v45  ;;  %v1867_v10 = vsel %vm693_vm3, %v1859_v51, 0.0  ;;  %v6113_v39 = vadd.f32 -0.11111111, %v9255_v11 }
 0x686   :  { %6704 = vmatprep.mubr.msk.f32.mxu1 %vm694_vm1, %v1864_v4  ;;  %7044 = vmatpush3.bf16.msra.mxu1 %v7041_v45  ;;  %v1861_v5 = vmul.f32 %v6082_v56, %v1853_v57  ;;  %v1868_v59 = vsel %vm693_vm3, %v1860_v60, 0.0  ;;  %v11194_v57 = vld [vmem:[#allocation12_spill] sm:$0xff]  ;;  %v6114_v32 = vadd.f32 -0.11111111, %v9267_v15  ;;  %v6115_v1 = vadd.f32 -0.11111111, %v9260_v6 }
 0x687   :  { %v7049_v61 = vpack.c.bf16 %v7238_v29, %v7237_v26  ;;  %v9476_v63 = vadd.f32 %v9317_v0, %v11194_v57  ;;  %v6116_v22 = vadd.f32 -0.11111111, %v9277_v52  ;;  %v6117_v26 = vadd.f32 -0.11111111, %v9272_v24  ;;  %v11197_v4 = vld [vmem:[#allocation10_spill] sm:$0xff] }
 0x688   :  { %v1869_v9 = vsel %vm693_vm3, %v1861_v5, 0.0  ;;  %v6118_v52 = vadd.f32 -0.11111111, %v9290_v16  ;;  %v6119_v24 = vadd.f32 -0.11111111, %v9284_v48 }
 0x689   :  { %6705 = vmatmul.mubr.msk.f32.gmra.mrb[36].mxu1 %vm694_vm1, %v1865_v18  ;;  %7050 = vmatprep.subr.bf16.mxu1 %v7049_v61  ;;  %v6120_v16 = vadd.f32 -0.11111111, %v9299_v3  ;;  %v2006_v3 = vld [vmem:[%s11107_s6 + $0x18] sm:$0xff] }
 0x68a   :  { %6707 = vmatprep.mubr.msk.f32.mxu1 %vm694_vm1, %v1866_v2 }
 0x68d   :  { %6708 = vmatmul.mubr.msk.f32.gmra.mrb[38].mxu1 %vm694_vm1, %v1867_v10 }
 0x68e   :  { %6710 = vmatprep.mubr.msk.f32.mxu1 %vm694_vm1, %v1868_v59  ;;  %7225 = vrot.lane.b32.xlu0 %v11187_v19, %s7595_s12  ;;  %v11195_v19 = vld [vmem:[#allocation17_spill] sm:$0xff]  ;;  %v2005_v59 = vld [vmem:[%s11107_s6 + $0x10] sm:$0xff] }
 0x68f   :  { %v9484_v17 = vadd.f32 %v9317_v0, %v11195_v19 }
 0x691   :  { %6711 = vmatmul.mubr.msk.f32.gmra.mrb[40].mxu1 %vm694_vm1, %v1869_v9 }
 0x692   :  { %3437 = vrot.lane.b32.xlu0 %v9467_v13, %s7589_s18 }
 0x696   :  { %3441 = vrot.lane.b32.xlu0 %v9476_v63, %s7589_s18 }
 0x69a   :  { %7245 = vrot.lane.b32.xlu0 %v11188_v30, %s7590_s28 }
 0x69e   :  { %3445 = vrot.lane.b32.xlu0 %v9484_v17, %s7589_s18 }
 0x6a2   :  { %3449 = vrot.lane.b32.xlu0 %v9490_v37, %s7589_s18 }
 0x6a6   :  { %3582 = vrot.lane.b32.xlu0 %v9467_v13, %s7590_s28 }
 0x6aa   :  { %3727 = vrot.lane.b32.xlu0 %v9467_v13, %s7591_s0 }
 0x6ae   :  { %3586 = vrot.lane.b32.xlu0 %v9476_v63, %s7590_s28 }
 0x6b2   :  { %3731 = vrot.lane.b32.xlu0 %v9476_v63, %s7591_s0 }
 0x6b6   :  { %s7172_s13 = spop %7171  ;;  %3590 = vrot.lane.b32.xlu0 %v9484_v17, %s7590_s28 }
 0x6b7   :  { %s2467_s22 = smul.f32 0.0017361111, %s7172_s13 }
 0x6b9   :  { %s6112_s23 = sadd.f32 -0.012345679, %s2467_s22 }
 0x6ba   :  { %3735 = vrot.lane.b32.xlu0 %v9484_v17, %s7591_s0 }
 0x6bb   :  { %s2477_s18 = sadd.f32 1e-05, %s6112_s23  ;;  %s6296_s23 = sld [smem:[#allocation2 + $0x180]] }
 0x6bd   :  { %v2478_v0 = vstv %s2477_s18  ;;  %s3872_s18 = sld [smem:[#allocation2]] }
 0x6be   :  { %7418 = vrsqrt.f32 %v2478_v0  ;;  %3594 = vrot.lane.b32.xlu0 %v9490_v37, %s7590_s28  ;;  %s6266_s28 = sld [smem:[#allocation2 + $0x100]] }
 0x6c1   :  { %v9743_v42 = vstv %s6296_s23 }
 0x6c2   :  { %3739 = vrot.lane.b32.xlu0 %v9490_v37, %s7591_s0  ;;  %s6208_s0 = sld [smem:[#allocation2 + $0x1]] }
 0x6c8   :  { %v7419_v41 = vpop.eup %7418 }
 0x6c9   :  { %7173 = vpush %v7419_v41  ;;  %v7033_v41 = vpack.c.bf16 %v2006_v3, %v2005_v59 }
 0x6fa   :  { %s7174_s2 = spop %7173 }
 0x6fb   :  { %v2481_v36 = vstv %s7174_s2  ;;  %s6228_s2 = sld [smem:[#allocation2 + $0x80]] }
 0x6fc   :  { %v2482_v45 = vmul.f32 %v6113_v39, %v2481_v36  ;;  %v2483_v35 = vmul.f32 %v6114_v32, %v2481_v36  ;;  %v2484_v21 = vmul.f32 %v6115_v1, %v2481_v36  ;;  %v2485_v11 = vmul.f32 %v6116_v22, %v2481_v36 }
 0x6fd   :  { %v2486_v15 = vmul.f32 %v6117_v26, %v2481_v36  ;;  %v2487_v58 = vmul.f32 %v6118_v52, %v2481_v36  ;;  %v2489_v48 = vmul.f32 %v6120_v16, %v2481_v36  ;;  %v1493_v1 = vsel %vm693_vm3, %v9367_v25, 0.0  ;;  %v1636_v26 = vld [vmem:[%s11107_s6 + $0x8] sm:$0xff] }
 0x6fe   :  { %v2490_v47 = vsel %vm693_vm3, %v2482_v45, 0.0  ;;  %v2491_v29 = vsel %vm693_vm3, %v2483_v35, 0.0  ;;  %v2492_v6 = vsel %vm693_vm3, %v2484_v21, 0.0  ;;  %v2493_v28 = vsel %vm693_vm3, %v2485_v11, 0.0 }
 0x6ff   :  { %6749 = vmatprep.mubr.msk.f32.mxu1 %vm694_vm1, %v2490_v47  ;;  %v2494_v18 = vsel %vm693_vm3, %v2486_v15, 0.0  ;;  %v2495_v60 = vsel %vm693_vm3, %v2487_v58, 0.0  ;;  %v2497_v19 = vsel %vm693_vm3, %v2489_v48, 0.0  ;;  %v1495_v45 = vsel %vm693_vm3, %v9371_v62, 0.0 }
 0x700   :  { %6750 = vmatmul.mubr.msk.f32.vlgmr.msra.gmra.mrb[42].mxu1 %vm694_vm1, %v2491_v29  ;;  %v1496_v25 = vsel %vm693_vm3, %v9375_v43, 0.0  ;;  %v1497_v35 = vsel %vm693_vm3, %v9377_v46, 0.0  ;;  %v1499_v62 = vsel %vm693_vm3, %v9381_v31, 0.0  ;;  %v1635_v29 = vld [vmem:[%s11107_s6] sm:$0xff]  ;;  %v6144_v48 = vadd.f32 -0.11111111, %v9395_v49 }
 0x701   :  { %7052 = vmatpush3.bf16.msra.mxu1 %v7049_v61  ;;  %6752 = vmatprep.mubr.msk.f32.mxu1 %vm694_vm1, %v2492_v6  ;;  %v2488_v61 = vmul.f32 %v6119_v24, %v2481_v36  ;;  %v1494_v36 = vsel %vm693_vm3, %v9369_v54, 0.0  ;;  %v1498_v54 = vsel %vm693_vm3, %v9379_v33, 0.0  ;;  %v7037_v6 = vpack.c.bf16 %v1636_v26, %v1635_v29  ;;  %v2633_v24 = vld [vmem:[%s11107_s6 + $0x20] sm:$0xff] }
 0x702   :  { %7059 = vmatprep.subr.msk.bf16.mxu1 %vm8147_vm2, %v11197_v4  ;;  %v6147_v49 = vadd.f32 -0.11111111, %v9400_v12 }
 0x703   :  { %v2496_v10 = vsel %vm693_vm3, %v2488_v61, 0.0 }
 0x704   :  { %6753 = vmatmul.mubr.msk.f32.gmra.mrb[44].mxu1 %vm694_vm1, %v2493_v28  ;;  %v2634_v28 = vld [vmem:[%s11107_s6 + $0x28] sm:$0xff] }
 0x705   :  { %6755 = vmatprep.mubr.msk.f32.mxu1 %vm694_vm1, %v2494_v18  ;;  %v2966_v51 = vpop.xlane.xlu0 %2965  ;;  %v9599_v58 = vpack.c.bf16 %v2634_v28, %v2633_v24  ;;  %v7241_v18 = vpop.permute.xlu1 %7240 }
 0x706   :  { %v2967_v2 = vrot.slane %v2966_v51, 4  ;;  %v7242_v59 = vunpack.i.l.bf16 %v7241_v18 }
 0x708   :  { %v2968_v56 = vadd.f32 %v2967_v2, %v2966_v51  ;;  %6756 = vmatmul.mubr.msk.f32.gmra.mrb[46].mxu1 %vm694_vm1, %v2495_v60  ;;  %v6143_v60 = vadd.f32 -0.11111111, %v9387_v14 }
 0x709   :  { %6758 = vmatprep.mubr.msk.f32.mxu1 %vm694_vm1, %v2496_v10  ;;  %v7226_v5 = vpop.permute.xlu0 %7225  ;;  %v9604_v51 = vpop.permute.xlu1 %3439  ;;  %v7243_v10 = vunpack.i.h.bf16 %v7241_v18 }
 0x70a   :  { %v7228_v23 = vunpack.i.h.bf16 %v7226_v5  ;;  %v7227_v9 = vunpack.i.l.bf16 %v7226_v5  ;;  %v2969_v57 = vrot.slane %v2968_v56, 2 }
 0x70c   :  { %6759 = vmatmul.mubr.msk.f32.gmra.mrb[48].mxu1 %vm694_vm1, %v2497_v19  ;;  %v7025_v8 = vpack.c.bf16 %v7228_v23, %v7227_v9  ;;  %v2970_v0 = vadd.f32 %v2969_v57, %v2968_v56  ;;  %v6145_v56 = vadd.f32 -0.11111111, %v9390_v7  ;;  %v6146_v19 = vadd.f32 -0.11111111, %v9407_v53 }
 0x70d   :  { %v9602_v61 = vpop.permute.xlu0 %3437  ;;  %v9608_v2 = vpop.permute.xlu1 %3443  ;;  %v6148_v53 = vadd.f32 -0.11111111, %v9418_v44  ;;  %v6150_v44 = vadd.f32 -0.11111111, %v9427_v34 }
 0x70e   :  { %7026 = vmatprep.subr.bf16.mxu0 %v7025_v8  ;;  %v2971_v39 = vrot.slane %v2970_v0, 1 }
 0x70f   :  { %7028 = vmatpush3.bf16.msra.mxu0 %v7025_v8 }
 0x710   :  { %v2972_v32 = vadd.f32 %v2971_v39, %v2970_v0  ;;  %7034 = vmatprep.subr.bf16.mxu0 %v7033_v41 }
 0x711   :  { %v9606_v16 = vpop.permute.xlu0 %3441  ;;  %v7251_v0 = vpop.permute.xlu1 %7250 }
 0x712   :  { %6686 = vmatmul.mubr.msk.f32.vlgmr.msra.gmra.mrb[18].mxu0 %vm694_vm1, %v1493_v1  ;;  %7175 = vpush %v2972_v32  ;;  %v6149_v1 = vadd.f32 -0.11111111, %v9412_v40 }
 0x713   :  { %6688 = vmatprep.mubr.msk.f32.mxu0 %vm694_vm1, %v1494_v36  ;;  %7036 = vmatpush3.bf16.msra.mxu0 %v7033_v41  ;;  %v7063_v41 = vpack.c.bf16 %v7243_v10, %v7242_v59 }
 0x714   :  { %7038 = vmatprep.subr.bf16.mxu0 %v7037_v6 }
 0x715   :  { %v9613_v3 = vpop.permute.xlu0 %7245 }
 0x716   :  { %6689 = vmatmul.mubr.msk.f32.gmra.mrb[20].mxu0 %vm694_vm1, %v1495_v45 }
 0x717   :  { %6691 = vmatprep.mubr.msk.f32.mxu0 %vm694_vm1, %v1496_v25 }
 0x719   :  { %v3446_v12 = vpop.permute.xlu0 %3445 }
 0x71a   :  { %6692 = vmatmul.mubr.msk.f32.gmra.mrb[22].mxu0 %vm694_vm1, %v1497_v35  ;;  %v3448_v35 = vpop.permute.xlu1 %3447 }
 0x71b   :  { %6694 = vmatprep.mubr.msk.f32.mxu0 %vm694_vm1, %v1498_v54 }
 0x71d   :  { %v3450_v40 = vpop.permute.xlu0 %3449 }
 0x71e   :  { %6695 = vmatmul.mubr.msk.f32.gmra.mrb[24].mxu0 %vm694_vm1, %v1499_v62 }
 0x721   :  { %v9651_v34 = vpop.permute.xlu0 %3582 }
 0x725   :  { %v3728_v29 = vpop.permute.xlu0 %3727 }
 0x743   :  { %s7176_s25 = spop %7175 }
 0x744   :  { %s2974_s26 = smul.f32 0.0017361111, %s7176_s25  ;;  %s6297_s25 = sld [smem:[#allocation2 + $0x181]] }
 0x746   :  { %s6142_s27 = sadd.f32 -0.012345679, %s2974_s26  ;;  %s6299_s26 = sld [smem:[#allocation2 + $0x183]] }
 0x748   :  { %s2984_s9 = sadd.f32 1e-05, %s6142_s27 }
 0x74a   :  { %v2985_v43 = vstv %s2984_s9 }
 0x74b   :  { %7420 = vrsqrt.f32 %v2985_v43 }
 0x755   :  { %v7421_v46 = vpop.eup %7420 }
 0x756   :  { %7177 = vpush %v7421_v46  ;;  %v3452_v46 = vpop.permute.xlu1 %3451 }
 0x758   :  { %v6703_v21 = vpop.f32.mrb[34].mxu1 }
 0x759   :  { %v1966_v22 = vpop.f32.mrb[35].mxu1 }
 0x75a   :  { %6717 = vmatprep.mubr.msk.f32.mxu0 %vm694_vm1, %v1966_v22  ;;  %v7253_v22 = vunpack.i.h.bf16 %v7251_v0 }
 0x75b   :  { %6718 = vmatmul.mubr.msk.f32.vlgmr.msra.gmra.mrb[26].mxu0 %vm694_vm1, %v6703_v21 }
 0x75c   :  { %v6706_v33 = vpop.f32.mrb[36].mxu1  ;;  %7040 = vmatpush3.bf16.msra.mxu0 %v7037_v6 }
 0x75d   :  { %v1976_v47 = vpop.f32.mrb[37].mxu1  ;;  %7046 = vmatprep.subr.bf16.mxu0 %v9599_v58 }
 0x75e   :  { %6720 = vmatprep.mubr.msk.f32.mxu0 %vm694_vm1, %v1976_v47 }
 0x75f   :  { %6721 = vmatmul.mubr.msk.f32.gmra.mrb[28].mxu0 %vm694_vm1, %v6706_v33  ;;  %v7252_v33 = vunpack.i.l.bf16 %v7251_v0 }
 0x760   :  { %v6709_v31 = vpop.f32.mrb[38].mxu1 }
 0x761   :  { %v1986_v11 = vpop.f32.mrb[39].mxu1  ;;  %v7075_v47 = vpack.c.bf16 %v7253_v22, %v7252_v33  ;;  %v9766_v22 = vstv %s6267_s5 }
 0x762   :  { %6723 = vmatprep.mubr.msk.f32.mxu0 %vm694_vm1, %v1986_v11 }
 0x763   :  { %6724 = vmatmul.mubr.msk.f32.gmra.mrb[30].mxu0 %vm694_vm1, %v6709_v31  ;;  %v9655_v31 = vpop.permute.xlu1 %3584 }
 0x764   :  { %v6712_v15 = vpop.f32.mrb[40].mxu1 }
 0x765   :  { %v1996_v52 = vpop.f32.mrb[41].mxu1 }
 0x766   :  { %6726 = vmatprep.mubr.msk.f32.mxu0 %vm694_vm1, %v1996_v52 }
 0x767   :  { %6727 = vmatmul.mubr.msk.f32.gmra.mrb[32].mxu0 %vm694_vm1, %v6712_v15 }
 0x787   :  { %s7178_s20 = spop %7177 }
 0x788   :  { %v2988_v5 = vstv %s7178_s20  ;;  %s6230_s20 = sld [smem:[#allocation2 + $0x82]] }
 0x789   :  { %v2989_v23 = vmul.f32 %v6143_v60, %v2988_v5  ;;  %v2990_v9 = vmul.f32 %v6144_v48, %v2988_v5  ;;  %v2991_v57 = vmul.f32 %v6145_v56, %v2988_v5  ;;  %v2992_v7 = vmul.f32 %v6146_v19, %v2988_v5  ;;  %v3140_v48 = vld [vmem:[%s11107_s6 + $0x30] sm:$0xff]  ;;  %v3141_v56 = vld [vmem:[%s11107_s6 + $0x38] sm:$0xff] }
 0x78a   :  { %v2993_v32 = vmul.f32 %v6147_v49, %v2988_v5  ;;  %v2994_v45 = vmul.f32 %v6148_v53, %v2988_v5  ;;  %v2996_v62 = vmul.f32 %v6150_v44, %v2988_v5  ;;  %v7053_v59 = vpack.c.bf16 %v3141_v56, %v3140_v48 }
 0x78b   :  { %v2997_v8 = vsel %vm693_vm3, %v2989_v23, 0.0  ;;  %v2998_v14 = vsel %vm693_vm3, %v2990_v9, 0.0  ;;  %v2999_v39 = vsel %vm693_vm3, %v2991_v57, 0.0  ;;  %v3000_v36 = vsel %vm693_vm3, %v2992_v7, 0.0 }
 0x78c   :  { %6781 = vmatprep.mubr.msk.f32.mxu1 %vm694_vm1, %v2997_v8  ;;  %v3001_v25 = vsel %vm693_vm3, %v2993_v32, 0.0  ;;  %v3002_v54 = vsel %vm693_vm3, %v2994_v45, 0.0  ;;  %v3004_v21 = vsel %vm693_vm3, %v2996_v62, 0.0  ;;  %v7248_v49 = vunpack.i.h.bf16 %v9613_v3 }
 0x78d   :  { %6782 = vmatmul.mubr.msk.f32.vlgmr.msra.gmra.mrb[50].mxu1 %vm694_vm1, %v2998_v14  ;;  %v4243_v62 = vstv %s6228_s2  ;;  %s3936_s2 = sld [smem:[#allocation4]] }
 0x78e   :  { %7062 = vmatpush3.bf16.xpose.msk.msra.mxu1 %vm8147_vm2, %v11197_v4  ;;  %6784 = vmatprep.mubr.msk.f32.mxu1 %vm694_vm1, %v2999_v39  ;;  %v2995_v4 = vmul.f32 %v6149_v1, %v2988_v5 }
 0x78f   :  { %7065 = vmatprep.subr.msk.bf16.mxu1 %vm8147_vm2, %v7063_v41 }
 0x790   :  { %v3003_v43 = vsel %vm693_vm3, %v2995_v4, 0.0 }
 0x791   :  { %6785 = vmatmul.mubr.msk.f32.gmra.mrb[52].mxu1 %vm694_vm1, %v3000_v36 }
 0x792   :  { %6787 = vmatprep.mubr.msk.f32.mxu1 %vm694_vm1, %v3001_v25 }
 0x795   :  { %6788 = vmatmul.mubr.msk.f32.gmra.mrb[54].mxu1 %vm694_vm1, %v3002_v54  ;;  %v3873_v54 = vstv %s3872_s18 }
 0x796   :  { %6790 = vmatprep.mubr.msk.f32.mxu1 %vm694_vm1, %v3003_v43 }
 0x799   :  { %6791 = vmatmul.mubr.msk.f32.gmra.mrb[56].mxu1 %vm694_vm1, %v3004_v21  ;;  %v9764_v21 = vstv %s6229_s24 }
 0x79a   :  { %6813 = vmatprep.mubr.msk.f32.mxu1 %vm694_vm1, %v9467_v13  ;;  %v3730_v13 = vpop.permute.xlu1 %3729 }
 0x79d   :  { %6814 = vmatmul.mubr.msk.f32.vlgmr.msra.gmra.mrb[58].mxu1 %vm694_vm1, %v9321_v55  ;;  %v9671_v55 = vpop.permute.xlu0 %3586 }
 0x79e   :  { %7068 = vmatpush3.bf16.xpose.msk.msra.mxu1 %vm8147_vm2, %v7063_v41  ;;  %6816 = vmatprep.mubr.msk.f32.mxu1 %vm694_vm1, %v9476_v63  ;;  %v9675_v63 = vpop.permute.xlu1 %3588 }
 0x79f   :  { %7077 = vmatprep.subr.msk.bf16.mxu1 %vm8147_vm2, %v7075_v47 }
 0x7a1   :  { %6817 = vmatmul.mubr.msk.f32.gmra.mrb[60].mxu1 %vm694_vm1, %v9327_v20  ;;  %v3732_v20 = vpop.permute.xlu0 %3731 }
 0x7a2   :  { %6819 = vmatprep.mubr.msk.f32.mxu1 %vm694_vm1, %v9484_v17 }
 0x7a5   :  { %6820 = vmatmul.mubr.msk.f32.gmra.mrb[62].mxu1 %vm694_vm1, %v9335_v27  ;;  %v3734_v27 = vpop.permute.xlu1 %3733 }
 0x7a6   :  { %6822 = vmatprep.mubr.msk.f32.mxu1 %vm694_vm1, %v9490_v37 }
 0x7a9   :  { %6823 = vmatmul.mubr.msk.f32.gmra.mrb[64].mxu1 %vm694_vm1, %v9341_v38  ;;  %v9688_v38 = vpop.permute.xlu0 %3590  ;;  %v9691_v17 = vpop.permute.xlu1 %3592 }
 0x7aa   :  { %6829 = vmatprep.mubr.msk.f32.mxu1 %vm694_vm1, %v9602_v61 }
 0x7ad   :  { %6830 = vmatmul.mubr.msk.f32.vlgmr.msra.gmra.mrb[66].mxu1 %vm694_vm1, %v9604_v51  ;;  %v3736_v37 = vpop.permute.xlu0 %3735  ;;  %v3738_v26 = vpop.permute.xlu1 %3737 }
 0x7ae   :  { %7080 = vmatpush3.bf16.xpose.msk.msra.mxu1 %vm8147_vm2, %v7075_v47  ;;  %6832 = vmatprep.mubr.msk.f32.mxu1 %vm694_vm1, %v9606_v16 }
 0x7b1   :  { %6833 = vmatmul.mubr.msk.f32.gmra.mrb[68].mxu1 %vm694_vm1, %v9608_v2  ;;  %v9698_v11 = vpop.permute.xlu0 %3594  ;;  %v9701_v6 = vpop.permute.xlu1 %3596 }
 0x7b2   :  { %6835 = vmatprep.mubr.msk.f32.mxu1 %vm694_vm1, %v3446_v12 }
 0x7b5   :  { %6836 = vmatmul.mubr.msk.f32.gmra.mrb[70].mxu1 %vm694_vm1, %v3448_v35  ;;  %v3740_v15 = vpop.permute.xlu0 %3739  ;;  %v3742_v52 = vpop.permute.xlu1 %3741 }
 0x7b6   :  { %6838 = vmatprep.mubr.msk.f32.mxu1 %vm694_vm1, %v3450_v40  ;;  %v4871_v40 = vstv %s6266_s28 }
 0x7b9   :  { %6839 = vmatmul.mubr.msk.f32.gmra.mrb[72].mxu1 %vm694_vm1, %v3452_v46  ;;  %v9762_v46 = vstv %s6208_s0 }
 0x7ba   :  { %6861 = vmatprep.mubr.msk.f32.mxu1 %vm694_vm1, %v3728_v29  ;;  %v9773_v29 = vstv %s6299_s26 }
 0x7bb   :  { %11199 = vst [vmem:[#allocation22_spill] sm:$0xff] %v9773_v29 }
 0x7bd   :  { %6862 = vmatmul.mubr.msk.f32.vlgmr.msra.gmra.mrb[74].mxu1 %vm694_vm1, %v3730_v13 }
 0x7be   :  { %6864 = vmatprep.mubr.msk.f32.mxu1 %vm694_vm1, %v3732_v20 }
 0x7c1   :  { %6865 = vmatmul.mubr.msk.f32.gmra.mrb[76].mxu1 %vm694_vm1, %v3734_v27 }
 0x7c2   :  { %6867 = vmatprep.mubr.msk.f32.mxu1 %vm694_vm1, %v3736_v37 }
 0x7c5   :  { %6868 = vmatmul.mubr.msk.f32.gmra.mrb[78].mxu1 %vm694_vm1, %v3738_v26 }
 0x7c6   :  { %6870 = vmatprep.mubr.msk.f32.mxu1 %vm694_vm1, %v3740_v15 }
 0x7c9   :  { %6871 = vmatmul.mubr.msk.f32.gmra.mrb[80].mxu1 %vm694_vm1, %v3742_v52 }
 0x7d3   :  { %v6751_v24 = vpop.f32.mrb[42].mxu1 }
 0x7d4   :  { %v2594_v28 = vpop.f32.mrb[43].mxu1 }
 0x7d7   :  { %v6754_v18 = vpop.f32.mrb[44].mxu1 }
 0x7d8   :  { %v2604_v61 = vpop.f32.mrb[45].mxu1 }
 0x7db   :  { %v6757_v51 = vpop.f32.mrb[46].mxu1 }
 0x7dc   :  { %v2614_v16 = vpop.f32.mrb[47].mxu1 }
 0x7df   :  { %v6760_v2 = vpop.f32.mrb[48].mxu1 }
 0x7e0   :  { %v2624_v60 = vpop.f32.mrb[49].mxu1 }
 0x7e5   :  { %v6687_v10 = vpop.f32.mrb[18].mxu0 }
 0x7e6   :  { %v1596_v5 = vpop.f32.mrb[19].mxu0 }
 0x7e7   :  { %6733 = vmatprep.mubr.msk.f32.mxu0 %vm694_vm1, %v1596_v5 }
 0x7e8   :  { %6734 = vmatmul.mubr.msk.f32.vlgmr.msra.gmra.mrb[26].mxu0 %vm694_vm1, %v6687_v10 }
 0x7e9   :  { %v6690_v23 = vpop.f32.mrb[20].mxu0  ;;  %7048 = vmatpush3.bf16.msra.mxu0 %v9599_v58  ;;  %v7247_v58 = vunpack.i.l.bf16 %v9613_v3 }
 0x7ea   :  { %v1606_v9 = vpop.f32.mrb[21].mxu0  ;;  %7054 = vmatprep.subr.bf16.mxu0 %v7053_v59 }
 0x7eb   :  { %6736 = vmatprep.mubr.msk.f32.mxu0 %vm694_vm1, %v1606_v9  ;;  %v7069_v0 = vpack.c.bf16 %v7248_v49, %v7247_v58 }
 0x7ec   :  { %6737 = vmatmul.mubr.msk.f32.gmra.mrb[28].mxu0 %vm694_vm1, %v6690_v23 }
 0x7ed   :  { %v6693_v57 = vpop.f32.mrb[22].mxu0 }
 0x7ee   :  { %v1616_v19 = vpop.f32.mrb[23].mxu0 }
 0x7ef   :  { %6739 = vmatprep.mubr.msk.f32.mxu0 %vm694_vm1, %v1616_v19 }
 0x7f0   :  { %6740 = vmatmul.mubr.msk.f32.gmra.mrb[30].mxu0 %vm694_vm1, %v6693_v57 }
 0x7f1   :  { %v6696_v8 = vpop.f32.mrb[24].mxu0 }
 0x7f2   :  { %v1626_v14 = vpop.f32.mrb[25].mxu0 }
 0x7f3   :  { %6742 = vmatprep.mubr.msk.f32.mxu0 %vm694_vm1, %v1626_v14 }
 0x7f4   :  { %6743 = vmatmul.mubr.msk.f32.gmra.mrb[32].mxu0 %vm694_vm1, %v6696_v8 }
 0x7f5   :  { %6765 = vmatprep.mubr.msk.f32.mxu0 %vm694_vm1, %v2594_v28 }
 0x7f8   :  { %6766 = vmatmul.mubr.msk.f32.vlgmr.msra.gmra.mrb[26].mxu0 %vm694_vm1, %v6751_v24 }
 0x7f9   :  { %7056 = vmatpush3.bf16.msra.mxu0 %v7053_v59  ;;  %6768 = vmatprep.mubr.msk.f32.mxu0 %vm694_vm1, %v2604_v61 }
 0x7fa   :  { %7071 = vmatprep.subr.msk.bf16.mxu0 %vm8147_vm2, %v7069_v0 }
 0x7fc   :  { %6769 = vmatmul.mubr.msk.f32.gmra.mrb[28].mxu0 %vm694_vm1, %v6754_v18 }
 0x7fd   :  { %6771 = vmatprep.mubr.msk.f32.mxu0 %vm694_vm1, %v2614_v16 }
 0x800   :  { %6772 = vmatmul.mubr.msk.f32.gmra.mrb[30].mxu0 %vm694_vm1, %v6757_v51 }
 0x801   :  { %6774 = vmatprep.mubr.msk.f32.mxu0 %vm694_vm1, %v2624_v60 }
 0x804   :  { %6775 = vmatmul.mubr.msk.f32.gmra.mrb[32].mxu0 %vm694_vm1, %v6760_v2 }
 0x860   :  { %v6783_v3 = vpop.f32.mrb[50].mxu1 }
 0x861   :  { %v3101_v7 = vpop.f32.mrb[51].mxu1 }
 0x862   :  { %6797 = vmatprep.mubr.msk.f32.mxu0 %vm694_vm1, %v3101_v7 }
 0x863   :  { %6798 = vmatmul.mubr.msk.f32.vlgmr.msra.gmra.mrb[26].mxu0 %vm694_vm1, %v6783_v3 }
 0x864   :  { %7074 = vmatpush3.bf16.xpose.msk.msra.mxu0 %vm8147_vm2, %v7069_v0  ;;  %v6786_v41 = vpop.f32.mrb[52].mxu1 }
 0x865   :  { %v3111_v39 = vpop.f32.mrb[53].mxu1 }
 0x866   :  { %6800 = vmatprep.mubr.msk.f32.mxu0 %vm694_vm1, %v3111_v39 }
 0x867   :  { %6801 = vmatmul.mubr.msk.f32.gmra.mrb[28].mxu0 %vm694_vm1, %v6786_v41 }
 0x868   :  { %v6789_v32 = vpop.f32.mrb[54].mxu1 }
 0x869   :  { %v3121_v53 = vpop.f32.mrb[55].mxu1 }
 0x86a   :  { %6803 = vmatprep.mubr.msk.f32.mxu0 %vm694_vm1, %v3121_v53 }
 0x86b   :  { %6804 = vmatmul.mubr.msk.f32.gmra.mrb[30].mxu0 %vm694_vm1, %v6789_v32 }
 0x86c   :  { %v6792_v12 = vpop.f32.mrb[56].mxu1 }
 0x86d   :  { %v3131_v1 = vpop.f32.mrb[57].mxu1 }
 0x86e   :  { %6806 = vmatprep.mubr.msk.f32.mxu0 %vm694_vm1, %v3131_v1 }
 0x86f   :  { %6807 = vmatmul.mubr.msk.f32.gmra.mrb[32].mxu0 %vm694_vm1, %v6792_v12 }
 0x870   :  { %v6815_v36 = vpop.f32.mrb[58].mxu1  ;;  %6845 = vmatprep.mubr.msk.f32.mxu0 %vm694_vm1, %v9651_v34 }
 0x871   :  { %v9749_v45 = vmul.f32 %v6815_v36, %v9743_v42  ;;  %v3398_v25 = vpop.f32.mrb[59].mxu1  ;;  %v3875_v33 = vmul.f32 %v6815_v36, %v3873_v54  ;;  %v4245_v13 = vmul.f32 %v6815_v36, %v4243_v62 }
 0x872   :  { %v4244_v20 = vmul.f32 %v4243_v62, %v3398_v25  ;;  %v4872_v27 = vmul.f32 %v4871_v40, %v3398_v25 }
 0x873   :  { %6846 = vmatmul.mubr.msk.f32.vlgmr.msra.gmra.mrb[34].mxu0 %vm694_vm1, %v9655_v31  ;;  %v9771_v31 = vstv %s6297_s25 }
 0x874   :  { %v6818_v4 = vpop.f32.mrb[60].mxu1  ;;  %6848 = vmatprep.mubr.msk.f32.mxu0 %vm694_vm1, %v9671_v55  ;;  %v4873_v55 = vmul.f32 %v6815_v36, %v4871_v40 }
 0x875   :  { %v9756_v35 = vmul.f32 %v6818_v4, %v9743_v42  ;;  %v3408_v44 = vpop.f32.mrb[61].mxu1  ;;  %v3877_v37 = vmul.f32 %v6818_v4, %v3873_v54  ;;  %v4247_v26 = vmul.f32 %v6818_v4, %v4243_v62  ;;  %v4875_v15 = vmul.f32 %v6818_v4, %v4871_v40 }
 0x876   :  { %v3876_v52 = vmul.f32 %v3873_v54, %v3408_v44  ;;  %v4246_v24 = vmul.f32 %v4243_v62, %v3408_v44  ;;  %v4874_v28 = vmul.f32 %v4871_v40, %v3408_v44  ;;  %v5381_v61 = vmul.f32 %v9743_v42, %v3408_v44 }
 0x877   :  { %6849 = vmatmul.mubr.msk.f32.gmra.mrb[36].mxu0 %vm694_vm1, %v9675_v63  ;;  %v3874_v63 = vmul.f32 %v3873_v54, %v3398_v25 }
 0x878   :  { %v6821_v43 = vpop.f32.mrb[62].mxu1  ;;  %6851 = vmatprep.mubr.msk.f32.mxu0 %vm694_vm1, %v9688_v38  ;;  %v5379_v38 = vmul.f32 %v9743_v42, %v3398_v25 }
 0x879   :  { %v9769_v34 = vmul.f32 %v6821_v43, %v9743_v42  ;;  %v3418_v47 = vpop.f32.mrb[63].mxu1  ;;  %v9781_v51 = vmul.f32 %v6821_v43, %v3873_v54  ;;  %v9783_v16 = vmul.f32 %v6821_v43, %v4243_v62  ;;  %v4877_v48 = vmul.f32 %v6821_v43, %v4871_v40 }
 0x87a   :  { %v4248_v56 = vmul.f32 %v4243_v62, %v3418_v47  ;;  %v4876_v10 = vmul.f32 %v4871_v40, %v3418_v47  ;;  %v5383_v5 = vmul.f32 %v9743_v42, %v3418_v47 }
 0x87b   :  { %6852 = vmatmul.mubr.msk.f32.gmra.mrb[38].mxu0 %vm694_vm1, %v9691_v17  ;;  %v3878_v17 = vmul.f32 %v3873_v54, %v3418_v47 }
 0x87c   :  { %v6824_v18 = vpop.f32.mrb[64].mxu1  ;;  %6854 = vmatprep.mubr.msk.f32.mxu0 %vm694_vm1, %v9698_v11 }
 0x87d   :  { %v9786_v2 = vmul.f32 %v6824_v18, %v9743_v42  ;;  %v3428_v60 = vpop.f32.mrb[65].mxu1  ;;  %v9789_v59 = vmul.f32 %v6824_v18, %v3873_v54  ;;  %v9791_v23 = vmul.f32 %v6824_v18, %v4243_v62  ;;  %v9793_v11 = vmul.f32 %v6824_v18, %v4871_v40 }
 0x87e   :  { %v9797_v9 = vmul.f32 %v3873_v54, %v3428_v60  ;;  %v9799_v57 = vmul.f32 %v4243_v62, %v3428_v60  ;;  %v9801_v19 = vmul.f32 %v4871_v40, %v3428_v60  ;;  %v9804_v8 = vmul.f32 %v9743_v42, %v3428_v60 }
 0x87f   :  { %6855 = vmatmul.mubr.msk.f32.gmra.mrb[40].mxu0 %vm694_vm1, %v9701_v6 }
 0x880   :  { %v6831_v14 = vpop.f32.mrb[66].mxu1 }
 0x881   :  { %v3885_v49 = vmul.f32 %v6831_v14, %v9762_v46  ;;  %v4255_v58 = vmul.f32 %v6831_v14, %v9764_v21  ;;  %v4883_v0 = vmul.f32 %v6831_v14, %v9766_v22  ;;  %v5390_v3 = vmul.f32 %v6831_v14, %v9771_v31  ;;  %v3543_v7 = vpop.f32.mrb[67].mxu1 }
 0x882   :  { %v3884_v6 = vmul.f32 %v9762_v46, %v3543_v7  ;;  %v4254_v41 = vmul.f32 %v9764_v21, %v3543_v7  ;;  %v4882_v39 = vmul.f32 %v9766_v22, %v3543_v7  ;;  %v5389_v32 = vmul.f32 %v9771_v31, %v3543_v7 }
 0x883   :  { %v9814_v53 = vadd.f32 %v3885_v49, %v3875_v33  ;;  %v9816_v12 = vadd.f32 %v4255_v58, %v4245_v13  ;;  %v9818_v1 = vadd.f32 %v4883_v0, %v4873_v55  ;;  %v9821_v42 = vadd.f32 %v5390_v3, %v9749_v45 }
 0x884   :  { %v9823_v36 = vadd.f32 %v3884_v6, %v3874_v63  ;;  %v9825_v25 = vadd.f32 %v4254_v41, %v4244_v20  ;;  %v9827_v4 = vadd.f32 %v4882_v39, %v4872_v27  ;;  %v9829_v44 = vadd.f32 %v5389_v32, %v5379_v38  ;;  %v6834_v54 = vpop.f32.mrb[68].mxu1 }
 0x885   :  { %v3887_v62 = vmul.f32 %v6834_v54, %v9762_v46  ;;  %v4257_v40 = vmul.f32 %v6834_v54, %v9764_v21  ;;  %v4885_v43 = vmul.f32 %v6834_v54, %v9766_v22  ;;  %v5392_v33 = vmul.f32 %v6834_v54, %v9771_v31  ;;  %v3553_v47 = vpop.f32.mrb[69].mxu1 }
 0x886   :  { %v3886_v45 = vmul.f32 %v9762_v46, %v3553_v47  ;;  %v4256_v13 = vmul.f32 %v9764_v21, %v3553_v47  ;;  %v4884_v55 = vmul.f32 %v9766_v22, %v3553_v47  ;;  %v5391_v63 = vmul.f32 %v9771_v31, %v3553_v47 }
 0x887   :  { %v9839_v20 = vadd.f32 %v3887_v62, %v3877_v37  ;;  %v9841_v27 = vadd.f32 %v4257_v40, %v4247_v26  ;;  %v9843_v38 = vadd.f32 %v4885_v43, %v4875_v15  ;;  %v9846_v18 = vadd.f32 %v5392_v33, %v9756_v35 }
 0x888   :  { %v9848_v60 = vadd.f32 %v3886_v45, %v3876_v52  ;;  %v9850_v14 = vadd.f32 %v4256_v13, %v4246_v24  ;;  %v9852_v49 = vadd.f32 %v4884_v55, %v4874_v28  ;;  %v9854_v58 = vadd.f32 %v5391_v63, %v5381_v61  ;;  %v6837_v0 = vpop.f32.mrb[70].mxu1 }
 0x889   :  { %v3889_v3 = vmul.f32 %v6837_v0, %v9762_v46  ;;  %v4259_v37 = vmul.f32 %v6837_v0, %v9764_v21  ;;  %v4887_v26 = vmul.f32 %v6837_v0, %v9766_v22  ;;  %v5394_v15 = vmul.f32 %v6837_v0, %v9771_v31  ;;  %v3563_v7 = vpop.f32.mrb[71].mxu1 }
 0x88a   :  { %v3888_v35 = vmul.f32 %v9762_v46, %v3563_v7  ;;  %v4258_v52 = vmul.f32 %v9764_v21, %v3563_v7  ;;  %v4886_v24 = vmul.f32 %v9766_v22, %v3563_v7  ;;  %v5393_v28 = vmul.f32 %v9771_v31, %v3563_v7 }
 0x88b   :  { %v9865_v61 = vadd.f32 %v3889_v3, %v9781_v51  ;;  %v9868_v6 = vadd.f32 %v4259_v37, %v9783_v16  ;;  %v9870_v41 = vadd.f32 %v4887_v26, %v4877_v48  ;;  %v9873_v39 = vadd.f32 %v5394_v15, %v9769_v34  ;;  %v6167_v26 = vld [vmem:[%s11108_s7] ss:$0 sm:$0xff] }
 0x88c   :  { %v9875_v32 = vadd.f32 %v3888_v35, %v3878_v17  ;;  %v9877_v54 = vadd.f32 %v4258_v52, %v4248_v56  ;;  %v9879_v62 = vadd.f32 %v4886_v24, %v4876_v10  ;;  %v9881_v40 = vadd.f32 %v5393_v28, %v5383_v5  ;;  %v6840_v43 = vpop.f32.mrb[72].mxu1 }
 0x88d   :  { %v3891_v51 = vmul.f32 %v6840_v43, %v9762_v46  ;;  %v4261_v33 = vmul.f32 %v6840_v43, %v9764_v21  ;;  %v4889_v16 = vmul.f32 %v6840_v43, %v9766_v22  ;;  %v5396_v48 = vmul.f32 %v6840_v43, %v9771_v31  ;;  %v3573_v47 = vpop.f32.mrb[73].mxu1 }
 0x88e   :  { %v3890_v34 = vmul.f32 %v9762_v46, %v3573_v47  ;;  %v4260_v17 = vmul.f32 %v9764_v21, %v3573_v47  ;;  %v4888_v56 = vmul.f32 %v9766_v22, %v3573_v47  ;;  %v5395_v10 = vmul.f32 %v9771_v31, %v3573_v47 }
 0x88f   :  { %v9892_v5 = vadd.f32 %v3891_v51, %v9789_v59  ;;  %v9895_v45 = vadd.f32 %v4261_v33, %v9791_v23  ;;  %v9898_v13 = vadd.f32 %v4889_v16, %v9793_v11  ;;  %v9901_v55 = vadd.f32 %v5396_v48, %v9786_v2 }
 0x890   :  { %v9904_v46 = vadd.f32 %v3890_v34, %v9797_v9  ;;  %v9907_v21 = vadd.f32 %v4260_v17, %v9799_v57  ;;  %v9910_v22 = vadd.f32 %v4888_v56, %v9801_v19  ;;  %v9913_v31 = vadd.f32 %v5395_v10, %v9804_v8  ;;  %v9915_v59 = vpop.f32.mrb[74].mxu1 }
 0x891   :  { %11200 = vst [vmem:[#allocation20_spill] sm:$0xff] %v9915_v59  ;;  %v9919_v23 = vmul.f32 %v9915_v59, %v9773_v29  ;;  %v9921_v2 = vpop.f32.mrb[75].mxu1  ;;  %v3919_v16 = vstv %s6210_s4  ;;  %v9966_v34 = vstv %s6231_s29  ;;  %v9975_v10 = vstv %s6269_s10  ;;  %s10102_s4 = sld [smem:[#allocation4 + $0x1]]  ;;  %s6300_s29 = sld [smem:[#allocation4 + $0x3]] }
 0x892   :  { %11202 = vst [vmem:[#allocation21_spill] sm:$0xff] %v9921_v2  ;;  %11212 = vst [vmem:[#allocation11_spill] sm:$0xff] %v9966_v34  ;;  %v9973_v56 = vmul.f32 %v9915_v59, %v3919_v16 }
 0x893   :  { %11201 = vst [vmem:[#allocation24_spill] sm:$0xff] %v9919_v23  ;;  %11213 = vst [vmem:[#allocation15_spill] sm:$0xff] %v9975_v10 }
 0x894   :  { %v9923_v11 = vpop.f32.mrb[76].mxu1 }
 0x895   :  { %11203 = vst [vmem:[#allocation25_spill] sm:$0xff] %v9923_v11  ;;  %v9927_v9 = vmul.f32 %v9923_v11, %v9773_v29  ;;  %v9929_v57 = vpop.f32.mrb[77].mxu1 }
 0x896   :  { %11205 = vst [vmem:[#allocation26_spill] sm:$0xff] %v9929_v57  ;;  %v10004_v30 = vmul.f32 %v3919_v16, %v9929_v57 }
 0x897   :  { %11204 = vst [vmem:[#allocation23_spill] sm:$0xff] %v9927_v9  ;;  %v10026_v9 = vstv %s3936_s2 }
 0x898   :  { %v9931_v19 = vpop.f32.mrb[78].mxu1 }
 0x899   :  { %11206 = vst [vmem:[#allocation29_spill] sm:$0xff] %v9931_v19  ;;  %v9935_v8 = vmul.f32 %v9931_v19, %v9773_v29  ;;  %v9937_v63 = vpop.f32.mrb[79].mxu1 }
 0x89a   :  { %11208 = vst [vmem:[#allocation28_spill] sm:$0xff] %v9937_v63 }
 0x89b   :  { %11207 = vst [vmem:[#allocation27_spill] sm:$0xff] %v9935_v8 }
 0x89c   :  { %v9939_v0 = vpop.f32.mrb[80].mxu1 }
 0x89d   :  { %11209 = vst [vmem:[#allocation30_spill] sm:$0xff] %v9939_v0  ;;  %v9943_v3 = vmul.f32 %v9939_v0, %v9773_v29  ;;  %v9945_v37 = vpop.f32.mrb[81].mxu1 }
 0x89e   :  { %11211 = vst [vmem:[#allocation31_spill] sm:$0xff] %v9945_v37 }
 0x89f   :  { %11210 = vst [vmem:[#allocation32_spill] sm:$0xff] %v9943_v3  ;;  %v10020_v3 = vmul.f32 %v3919_v16, %v9945_v37 }
 0x936   :  { %v6799_v15 = vpop.f32.mrb[26].mxu0 }
 0x937   :  { %v3287_v7 = vadd.f32 %v6799_v15, %v6167_v26  ;;  %v3232_v35 = vpop.f32.mrb[27].mxu0 }
 0x938   :  { %v3286_v52 = vadd.f32 %v6167_v26, %v3232_v35  ;;  %v9986_v35 = vmul.f32 %v3919_v16, %v9921_v2 }
 0x939   :  { %3295 = vst.msk [vmem:[%s11115_s14 + $0x8] sm:$0xff] %vm383_vm0, %v3287_v7  ;;  %v9983_v7 = vmul.f32 %v9915_v59, %v9966_v34 }
 0x93a   :  { %3294 = vst.msk [vmem:[%s11115_s14] sm:$0xff] %vm383_vm0, %v3286_v52  ;;  %v6802_v24 = vpop.f32.mrb[28].mxu0 }
 0x93b   :  { %v3289_v28 = vadd.f32 %v6802_v24, %v6167_v26  ;;  %v3242_v43 = vpop.f32.mrb[29].mxu0 }
 0x93c   :  { %v3288_v51 = vadd.f32 %v6167_v26, %v3242_v43 }
 0x93d   :  { %3297 = vst.msk [vmem:[%s11115_s14 + $0x18] sm:$0xff] %vm383_vm0, %v3289_v28  ;;  %v9988_v28 = vstv %s6209_s19 }
 0x93e   :  { %3296 = vst.msk [vmem:[%s11115_s14 + $0x10] sm:$0xff] %vm383_vm0, %v3288_v51  ;;  %v6805_v33 = vpop.f32.mrb[30].mxu0  ;;  %v9990_v51 = vstv %s6230_s20 }
 0x93f   :  { %v3291_v48 = vadd.f32 %v6805_v33, %v6167_v26  ;;  %v3252_v47 = vpop.f32.mrb[31].mxu0  ;;  %v9992_v33 = vstv %s6268_s8 }
 0x940   :  { %v3290_v17 = vadd.f32 %v6167_v26, %v3252_v47  ;;  %v9997_v47 = vmul.f32 %v9923_v11, %v3919_v16 }
 0x941   :  { %3299 = vst.msk [vmem:[%s11115_s14 + $0x28] sm:$0xff] %vm383_vm0, %v3291_v48  ;;  %v9994_v48 = vstv %s6298_s21 }
 0x942   :  { %3298 = vst.msk [vmem:[%s11115_s14 + $0x20] sm:$0xff] %vm383_vm0, %v3290_v17  ;;  %v6808_v15 = vpop.f32.mrb[32].mxu0  ;;  %v10001_v17 = vmul.f32 %v9923_v11, %v9966_v34 }
 0x943   :  { %v3293_v52 = vadd.f32 %v6808_v15, %v6167_v26  ;;  %v3262_v24 = vpop.f32.mrb[33].mxu0  ;;  %v10007_v15 = vmul.f32 %v9931_v19, %v3919_v16 }
 0x944   :  { %v3292_v43 = vadd.f32 %v6167_v26, %v3262_v24  ;;  %v10014_v26 = vmul.f32 %v3919_v16, %v9937_v63  ;;  %v10017_v24 = vmul.f32 %v9939_v0, %v3919_v16 }
 0x945   :  { %3301 = vst.msk [vmem:[%s11115_s14 + $0x38] sm:$0xff] %vm383_vm0, %v3293_v52 }
 0x946   :  { %3300 = vst.msk [vmem:[%s11115_s14 + $0x30] sm:$0xff] %vm383_vm0, %v3292_v43  ;;  %v6847_v8 = vpop.f32.mrb[34].mxu0 }
 0x947   :  { %v3903_v23 = vmul.f32 %v6847_v8, %v9988_v28  ;;  %v4273_v52 = vmul.f32 %v6847_v8, %v9990_v51  ;;  %v4901_v29 = vmul.f32 %v6847_v8, %v9992_v33  ;;  %v5408_v63 = vmul.f32 %v6847_v8, %v9994_v48  ;;  %v3688_v0 = vpop.f32.mrb[35].mxu0 }
 0x948   :  { %v3902_v16 = vmul.f32 %v9988_v28, %v3688_v0  ;;  %v4272_v37 = vmul.f32 %v9990_v51, %v3688_v0  ;;  %v4900_v57 = vmul.f32 %v9992_v33, %v3688_v0  ;;  %v5407_v43 = vmul.f32 %v9994_v48, %v3688_v0 }
 0x949   :  { %v3911_v11 = vadd.f32 %v3903_v23, %v9814_v53  ;;  %v10038_v19 = vadd.f32 %v4273_v52, %v9816_v12  ;;  %v10041_v34 = vadd.f32 %v4901_v29, %v9818_v1  ;;  %v10044_v2 = vadd.f32 %v5408_v63, %v9821_v42 }
 0x94a   :  { %v3910_v8 = vadd.f32 %v3902_v16, %v9823_v36  ;;  %v10048_v59 = vadd.f32 %v4272_v37, %v9825_v25  ;;  %v10051_v10 = vadd.f32 %v4900_v57, %v9827_v4  ;;  %v10054_v0 = vadd.f32 %v5407_v43, %v9829_v44  ;;  %v6850_v53 = vpop.f32.mrb[36].mxu0 }
 0x94b   :  { %v3905_v12 = vmul.f32 %v6850_v53, %v9988_v28  ;;  %v4275_v29 = vmul.f32 %v6850_v53, %v9990_v51  ;;  %v4903_v1 = vmul.f32 %v6850_v53, %v9992_v33  ;;  %v5410_v42 = vmul.f32 %v6850_v53, %v9994_v48  ;;  %v3698_v23 = vpop.f32.mrb[37].mxu0 }
 0x94c   :  { %v3904_v36 = vmul.f32 %v9988_v28, %v3698_v23  ;;  %v4274_v25 = vmul.f32 %v9990_v51, %v3698_v23  ;;  %v4902_v4 = vmul.f32 %v9992_v33, %v3698_v23  ;;  %v5409_v57 = vmul.f32 %v9994_v48, %v3698_v23 }
 0x94d   :  { %v3913_v44 = vadd.f32 %v3905_v12, %v9839_v20  ;;  %v10066_v63 = vadd.f32 %v4275_v29, %v9841_v27  ;;  %v10069_v37 = vadd.f32 %v4903_v1, %v9843_v38  ;;  %v10072_v52 = vadd.f32 %v5410_v42, %v9846_v18 }
 0x94e   :  { %v3912_v16 = vadd.f32 %v3904_v36, %v9848_v60  ;;  %v10076_v43 = vadd.f32 %v4274_v25, %v9850_v14  ;;  %v10079_v53 = vadd.f32 %v4902_v4, %v9852_v49  ;;  %v10082_v23 = vadd.f32 %v5409_v57, %v9854_v58  ;;  %v6853_v20 = vpop.f32.mrb[38].mxu0 }
 0x94f   :  { %v3907_v27 = vmul.f32 %v6853_v20, %v9988_v28  ;;  %v4277_v38 = vmul.f32 %v6853_v20, %v9990_v51  ;;  %v4905_v12 = vmul.f32 %v6853_v20, %v9992_v33  ;;  %v5412_v18 = vmul.f32 %v6853_v20, %v9994_v48  ;;  %v3708_v29 = vpop.f32.mrb[39].mxu0 }
 0x950   :  { %v3906_v60 = vmul.f32 %v9988_v28, %v3708_v29  ;;  %v4276_v14 = vmul.f32 %v9990_v51, %v3708_v29  ;;  %v4904_v49 = vmul.f32 %v9992_v33, %v3708_v29  ;;  %v5411_v1 = vmul.f32 %v9994_v48, %v3708_v29 }
 0x951   :  { %v3915_v58 = vadd.f32 %v3907_v27, %v9865_v61  ;;  %v10094_v42 = vadd.f32 %v4277_v38, %v9868_v6  ;;  %v10097_v36 = vadd.f32 %v4905_v12, %v9870_v41  ;;  %v10100_v25 = vadd.f32 %v5412_v18, %v9873_v39 }
 0x952   :  { %v3914_v4 = vadd.f32 %v3906_v60, %v9875_v32  ;;  %v10106_v57 = vadd.f32 %v4276_v14, %v9877_v54  ;;  %v10109_v20 = vadd.f32 %v4904_v49, %v9879_v62  ;;  %v10112_v61 = vadd.f32 %v5411_v1, %v9881_v40  ;;  %v6856_v6 = vpop.f32.mrb[40].mxu0 }
 0x953   :  { %v3929_v41 = vadd.f32 %v9973_v56, %v3911_v11  ;;  %v3928_v27 = vadd.f32 %v9986_v35, %v3910_v8  ;;  %v3909_v39 = vmul.f32 %v6856_v6, %v9988_v28  ;;  %v4279_v38 = vmul.f32 %v6856_v6, %v9990_v51  ;;  %v3718_v12 = vpop.f32.mrb[41].mxu0 }
 0x954   :  { %v4907_v32 = vmul.f32 %v6856_v6, %v9992_v33  ;;  %v5414_v54 = vmul.f32 %v6856_v6, %v9994_v48  ;;  %v3908_v62 = vmul.f32 %v9988_v28, %v3718_v12  ;;  %v4278_v18 = vmul.f32 %v9990_v51, %v3718_v12 }
 0x955   :  { %v3939_v40 = vadd.f32 %v10026_v9, %v3929_v41  ;;  %v3938_v29 = vadd.f32 %v10026_v9, %v3928_v27  ;;  %v3917_v11 = vadd.f32 %v3909_v39, %v9892_v5  ;;  %v4287_v56 = vadd.f32 %v4279_v38, %v9895_v45  ;;  %v11218_v38 = vld [vmem:[#allocation29_spill] sm:$0xff] }
 0x956   :  { %v10127_v35 = vadd.f32 %v4907_v32, %v9898_v13  ;;  %v10130_v8 = vadd.f32 %v5414_v54, %v9901_v55  ;;  %v3916_v60 = vadd.f32 %v3908_v62, %v9904_v46  ;;  %v4286_v28 = vadd.f32 %v4278_v18, %v9907_v21  ;;  %v11219_v18 = vld [vmem:[#allocation25_spill] sm:$0xff] }
 0x957   :  { %v10136_v51 = vsel %vm693_vm3, %v3939_v40, -1e+30  ;;  %v10140_v5 = vsel %vm693_vm3, %v3938_v29, -1e+30  ;;  %v4906_v45 = vmul.f32 %v9992_v33, %v3718_v12  ;;  %v5413_v13 = vmul.f32 %v9994_v48, %v3718_v12  ;;  %v11220_v29 = vld [vmem:[#allocation26_spill] sm:$0xff] }
 0x958   :  { %v3957_v55 = vsel %vm694_vm1, %v10136_v51, -inf  ;;  %v3954_v46 = vsel %vm694_vm1, %v10140_v5, -inf  ;;  %v3931_v21 = vadd.f32 %v9997_v47, %v3913_v44  ;;  %v3933_v14 = vadd.f32 %v10007_v15, %v3915_v58  ;;  %v11215_v58 = vld [vmem:[#allocation20_spill] sm:$0xff] }
 0x959   :  { %3958 = vmax.xlane.f32.xlu1 %v3957_v55  ;;  %3955 = vmax.xlane.f32.xlu0 %v3954_v46  ;;  %v10151_v49 = vadd.f32 %v4906_v45, %v9910_v22  ;;  %v10154_v1 = vadd.f32 %v5413_v13, %v9913_v31  ;;  %v3930_v33 = vadd.f32 %v10004_v30, %v3912_v16  ;;  %v10158_v48 = vstv %s10102_s4  ;;  %v11214_v16 = vld [vmem:[#allocation15_spill] sm:$0xff]  ;;  %v11222_v55 = vld [vmem:[#allocation28_spill] sm:$0xff] }
 0x95a   :  { %v3941_v6 = vadd.f32 %v10026_v9, %v3931_v21  ;;  %v3943_v41 = vadd.f32 %v10026_v9, %v3933_v14  ;;  %v3935_v47 = vadd.f32 %v10017_v24, %v3917_v11  ;;  %v3932_v15 = vadd.f32 %v10014_v26, %v3914_v4  ;;  %v11216_v4 = vld [vmem:[#allocation21_spill] sm:$0xff]  ;;  %v11223_v21 = vld [vmem:[#allocation31_spill] sm:$0xff] }
 0x95b   :  { %v3940_v44 = vadd.f32 %v10026_v9, %v3930_v33  ;;  %v4299_v22 = vadd.f32 %v9983_v7, %v10038_v19  ;;  %v3934_v31 = vadd.f32 %v10020_v3, %v3916_v60  ;;  %v4301_v30 = vadd.f32 %v10001_v17, %v10066_v63  ;;  %v11217_v19 = vld [vmem:[#allocation11_spill] sm:$0xff]  ;;  %v11221_v60 = vld [vmem:[#allocation30_spill] sm:$0xff] }
 0x95c   :  { %v4919_v27 = vmul.f32 %v11215_v58, %v11214_v16  ;;  %v10174_v39 = vsel %vm693_vm3, %v3941_v6, -1e+30  ;;  %v10178_v26 = vsel %vm693_vm3, %v3943_v41, -1e+30  ;;  %v3945_v24 = vadd.f32 %v10026_v9, %v3935_v47 }
 0x95d   :  { %v4290_v7 = vmul.f32 %v11217_v19, %v11216_v4  ;;  %v3963_v3 = vsel %vm694_vm1, %v10174_v39, -inf  ;;  %v3969_v17 = vsel %vm694_vm1, %v10178_v26, -inf  ;;  %v3942_v63 = vadd.f32 %v10026_v9, %v3932_v15 }
 0x95e   :  { %v4295_v12 = vmul.f32 %v11218_v38, %v11217_v19  ;;  %3964 = vmax.xlane.f32.xlu0 %v3963_v3  ;;  %3970 = vmax.xlane.f32.xlu1 %v3969_v17  ;;  %v10192_v32 = vsel %vm693_vm3, %v3940_v44, -1e+30  ;;  %v10196_v54 = vsel %vm693_vm3, %v3945_v24, -1e+30  ;;  %v4309_v62 = vadd.f32 %v10158_v48, %v4299_v22  ;;  %v11224_v17 = vld [vmem:[#allocation22_spill] sm:$0xff] }
 0x95f   :  { %v4921_v40 = vmul.f32 %v11219_v18, %v11214_v16  ;;  %v4292_v11 = vmul.f32 %v11217_v19, %v11220_v29  ;;  %v4297_v45 = vmul.f32 %v11221_v60, %v11217_v19  ;;  %v3975_v13 = vsel %vm694_vm1, %v10196_v54, -inf }
 0x960   :  { %v4294_v46 = vmul.f32 %v11217_v19, %v11222_v55  ;;  %v4296_v14 = vmul.f32 %v11217_v19, %v11223_v21  ;;  %v4298_v33 = vadd.f32 %v4290_v7, %v10048_v59  ;;  %v4303_v6 = vadd.f32 %v4295_v12, %v10094_v42 }
 0x961   :  { %v3960_v41 = vsel %vm694_vm1, %v10192_v32, -inf  ;;  %v10217_v47 = vsel %vm693_vm3, %v3942_v63, -1e+30  ;;  %v4300_v15 = vadd.f32 %v4292_v11, %v10076_v43  ;;  %v4305_v44 = vadd.f32 %v4297_v45, %v4287_v56 }
 0x962   :  { %3961 = vmax.xlane.f32.xlu0 %v3960_v41  ;;  %3976 = vmax.xlane.f32.xlu1 %v3975_v13  ;;  %v10222_v22 = vsel %vm693_vm3, %v4309_v62, -1e+30  ;;  %v3944_v59 = vadd.f32 %v10026_v9, %v3934_v31  ;;  %v4311_v42 = vadd.f32 %v10158_v48, %v4301_v30  ;;  %v4302_v58 = vadd.f32 %v4294_v46, %v10106_v57 }
 0x963   :  { %v4304_v24 = vadd.f32 %v4296_v14, %v4286_v28  ;;  %v10228_v19 = vadd.f32 %v4919_v27, %v10041_v34  ;;  %v4918_v43 = vmul.f32 %v11214_v16, %v11216_v4  ;;  %v4920_v56 = vmul.f32 %v11214_v16, %v11220_v29 }
 0x964   :  { %v10235_v7 = vadd.f32 %v4921_v40, %v10069_v37  ;;  %v4923_v9 = vmul.f32 %v11218_v38, %v11214_v16  ;;  %v4925_v31 = vmul.f32 %v11221_v60, %v11214_v16  ;;  %v3966_v57 = vsel %vm694_vm1, %v10217_v47, -inf }
 0x965   :  { %v4327_v34 = vsel %vm694_vm1, %v10222_v22, -inf  ;;  %v10247_v28 = vsel %vm693_vm3, %v3944_v59, -1e+30  ;;  %v10251_v37 = vsel %vm693_vm3, %v4311_v42, -1e+30  ;;  %v4308_v30 = vadd.f32 %v10158_v48, %v4298_v33 }
 0x966   :  { %3967 = vmax.xlane.f32.xlu0 %v3966_v57  ;;  %4328 = vmax.xlane.f32.xlu1 %v4327_v34  ;;  %v4313_v27 = vadd.f32 %v10158_v48, %v4303_v6  ;;  %v10256_v3 = vadd.f32 %v4918_v43, %v10051_v10  ;;  %v5425_v63 = vmul.f32 %v11224_v17, %v11216_v4  ;;  %v3972_v40 = vsel %vm694_vm1, %v10247_v28, -inf  ;;  %v11227_v43 = vld [vmem:[#allocation27_spill] sm:$0xff] }
 0x967   :  { %v10261_v38 = vadd.f32 %v4923_v9, %v10097_v36  ;;  %v10264_v12 = vadd.f32 %v4920_v56, %v10079_v53  ;;  %v10267_v62 = vadd.f32 %v4925_v31, %v10127_v35  ;;  %v4922_v18 = vmul.f32 %v11214_v16, %v11222_v55  ;;  %v11228_v9 = vld [vmem:[#allocation32_spill] sm:$0xff] }
 0x968   :  { %v4924_v10 = vmul.f32 %v11214_v16, %v11223_v21  ;;  %v4333_v4 = vsel %vm694_vm1, %v10251_v37, -inf  ;;  %v10279_v53 = vsel %vm693_vm3, %v4308_v30, -1e+30  ;;  %v10283_v36 = vsel %vm693_vm3, %v4313_v27, -1e+30 }
 0x969   :  { %v4310_v35 = vadd.f32 %v10158_v48, %v4300_v15  ;;  %v4315_v16 = vadd.f32 %v10158_v48, %v4305_v44  ;;  %v10288_v11 = vadd.f32 %v4922_v18, %v10109_v20  ;;  %v5427_v45 = vmul.f32 %v11224_v17, %v11220_v29  ;;  %v11225_v15 = vld [vmem:[#allocation24_spill] sm:$0xff] }
 0x96a   :  { %3973 = vmax.xlane.f32.xlu0 %v3972_v40  ;;  %4334 = vmax.xlane.f32.xlu1 %v4333_v4  ;;  %v10291_v60 = vadd.f32 %v4924_v10, %v10151_v49  ;;  %v10296_v13 = vadd.f32 %v5425_v63, %v10054_v0  ;;  %v5429_v46 = vmul.f32 %v11224_v17, %v11222_v55  ;;  %v4324_v33 = vsel %vm694_vm1, %v10279_v53, -inf }
 0x96b   :  { %v5431_v14 = vmul.f32 %v11224_v17, %v11223_v21  ;;  %v4339_v20 = vsel %vm694_vm1, %v10283_v36, -inf  ;;  %v10308_v49 = vsel %vm693_vm3, %v4310_v35, -1e+30  ;;  %v10312_v0 = vsel %vm693_vm3, %v4315_v16, -1e+30 }
 0x96c   :  { %v4312_v29 = vadd.f32 %v10158_v48, %v4302_v58  ;;  %v10316_v55 = vadd.f32 %v5427_v45, %v10082_v23  ;;  %v10318_v21 = vstv %s6300_s29  ;;  %v10321_v6 = vadd.f32 %v5429_v46, %v10112_v61  ;;  %v11226_v58 = vld [vmem:[#allocation23_spill] sm:$0xff] }
 0x96d   :  { %v10324_v41 = vadd.f32 %v5431_v14, %v10154_v1  ;;  %v5434_v44 = vadd.f32 %v11225_v15, %v10044_v2  ;;  %v4330_v59 = vsel %vm694_vm1, %v10308_v49, -inf  ;;  %v4345_v42 = vsel %vm694_vm1, %v10312_v0, -inf }
 0x96e   :  { %4325 = vmax.xlane.f32.xlu0 %v4324_v33  ;;  %4340 = vmax.xlane.f32.xlu1 %v4339_v20  ;;  %v4314_v23 = vadd.f32 %v10158_v48, %v4304_v24  ;;  %v10335_v61 = vsel %vm693_vm3, %v4312_v29, -1e+30  ;;  %v5436_v2 = vadd.f32 %v11226_v58, %v10072_v52  ;;  %v5438_v56 = vadd.f32 %v11227_v43, %v10100_v25 }
 0x96f   :  { %v10338_v1 = vadd.f32 %v10318_v21, %v5434_v44  ;;  %v5440_v31 = vadd.f32 %v11228_v9, %v10130_v8  ;;  %v4336_v24 = vsel %vm694_vm1, %v10335_v61, -inf }
 0x970   :  { %v10347_v48 = vadd.f32 %v10318_v21, %v5436_v2  ;;  %v10352_v57 = vadd.f32 %v10318_v21, %v5438_v56  ;;  %v10359_v52 = vsel %vm693_vm3, %v4314_v23, -1e+30 }
 0x971   :  { %v10355_v34 = vadd.f32 %v10318_v21, %v5440_v31  ;;  %v4342_v25 = vsel %vm694_vm1, %v10359_v52, -inf  ;;  %v4935_v31 = vstv %s6270_s1 }
 0x972   :  { %4331 = vmax.xlane.f32.xlu0 %v4330_v59  ;;  %4346 = vmax.xlane.f32.xlu1 %v4345_v42 }
 0x976   :  { %4337 = vmax.xlane.f32.xlu0 %v4336_v24 }
 0x97a   :  { %4343 = vmax.xlane.f32.xlu0 %v4342_v25 }
 0x9e6   :  { %v3959_v8 = vpop.xlane.xlu1 %3958  ;;  %v3956_v30 = vpop.xlane.xlu0 %3955 }
 0x9e7   :  { %v3979_v27 = vsub.f32 %v10136_v51, %v3959_v8  ;;  %v3978_v17 = vsub.f32 %v10140_v5, %v3956_v30  ;;  %v4937_v30 = vadd.f32 %v4935_v31, %v10228_v19  ;;  %v4939_v19 = vadd.f32 %v4935_v31, %v10235_v7 }
 0x9e9   :  { %v3988_v63 = vmul.f32 1.442695, %v3979_v27  ;;  %v3986_v18 = vmul.f32 1.442695, %v3978_v17  ;;  %v10417_v7 = vsel %vm693_vm3, %v4939_v19, -1e+30 }
 0x9eb   :  { %7422 = vpow2.f32 %v3988_v63  ;;  %v3965_v10 = vpop.xlane.xlu0 %3964  ;;  %v3971_v40 = vpop.xlane.xlu1 %3970 }
 0x9ec   :  { %7424 = vpow2.f32 %v3986_v18  ;;  %v3981_v4 = vsub.f32 %v10174_v39, %v3965_v10  ;;  %v3983_v35 = vsub.f32 %v10178_v26, %v3971_v40 }
 0x9ee   :  { %v3992_v16 = vmul.f32 1.442695, %v3981_v4  ;;  %v3996_v45 = vmul.f32 1.442695, %v3983_v35  ;;  %v10403_v4 = vsel %vm693_vm3, %v4937_v30, -1e+30  ;;  %v4936_v35 = vadd.f32 %v4935_v31, %v10256_v3 }
 0x9ef   :  { %v3962_v46 = vpop.xlane.xlu0 %3961  ;;  %v3977_v14 = vpop.xlane.xlu1 %3976  ;;  %v4941_v3 = vadd.f32 %v4935_v31, %v10261_v38 }
 0x9f0   :  { %7426 = vpow2.f32 %v3992_v16  ;;  %v3980_v33 = vsub.f32 %v10192_v32, %v3962_v46  ;;  %v3985_v51 = vsub.f32 %v10196_v54, %v3977_v14  ;;  %v4955_v14 = vsel %vm694_vm1, %v10403_v4, -inf }
 0x9f1   :  { %7428 = vpow2.f32 %v3996_v45  ;;  %v10433_v38 = vsel %vm693_vm3, %v4941_v3, -1e+30 }
 0x9f2   :  { %v3990_v5 = vmul.f32 1.442695, %v3980_v33  ;;  %v4000_v20 = vmul.f32 1.442695, %v3985_v51 }
 0x9f3   :  { %v3968_v29 = vpop.xlane.xlu0 %3967  ;;  %v4329_v42 = vpop.xlane.xlu1 %4328 }
 0x9f4   :  { %7430 = vpow2.f32 %v3990_v5  ;;  %v3982_v15 = vsub.f32 %v10217_v47, %v3968_v29  ;;  %v4349_v63 = vsub.f32 %v10222_v22, %v4329_v42 }
 0x9f5   :  { %v10370_v44 = vpop.eup %7422  ;;  %7432 = vpow2.f32 %v4000_v20 }
 0x9f6   :  { %v10372_v39 = vpop.eup %7424  ;;  %v3994_v26 = vmul.f32 1.442695, %v3982_v15  ;;  %v4005_v59 = vsel %vm694_vm1, %v10370_v44, 0.0  ;;  %v4358_v22 = vmul.f32 1.442695, %v4349_v63 }
 0x9f7   :  { %4006 = vadd.xlane.f32.xlu1 %v4005_v59  ;;  %v3974_v32 = vpop.xlane.xlu0 %3973  ;;  %v4002_v54 = vsel %vm694_vm1, %v10372_v39, 0.0  ;;  %v4335_v25 = vpop.xlane.xlu1 %4334  ;;  %v4961_v59 = vsel %vm694_vm1, %v10417_v7, -inf }
 0x9f8   :  { %7434 = vpow2.f32 %v3994_v26  ;;  %v3984_v23 = vsub.f32 %v10247_v28, %v3974_v32  ;;  %4003 = vadd.xlane.f32.xlu0 %v4002_v54  ;;  %v4351_v16 = vsub.f32 %v10251_v37, %v4335_v25  ;;  %v10421_v37 = vsel %vm693_vm3, %v4936_v35, -1e+30 }
 0x9f9   :  { %v4952_v32 = vsel %vm694_vm1, %v10421_v37, -inf }
 0x9fa   :  { %v10379_v47 = vpop.eup %7426  ;;  %v3998_v58 = vmul.f32 1.442695, %v3984_v23  ;;  %v4362_v51 = vmul.f32 1.442695, %v4351_v16 }
 0x9fb   :  { %v10381_v2 = vpop.eup %7428  ;;  %v4011_v43 = vsel %vm694_vm1, %v10379_v47, 0.0  ;;  %v4326_v56 = vpop.xlane.xlu0 %4325 }
 0x9fc   :  { %7436 = vpow2.f32 %v3998_v58  ;;  %4012 = vadd.xlane.f32.xlu1 %v4011_v43  ;;  %v4017_v9 = vsel %vm694_vm1, %v10381_v2, 0.0  ;;  %v4341_v40 = vpop.xlane.xlu1 %4340  ;;  %v4348_v46 = vsub.f32 %v10279_v53, %v4326_v56  ;;  %v4938_v53 = vadd.f32 %v4935_v31, %v10264_v12 }
 0x9fd   :  { %v4353_v5 = vsub.f32 %v10283_v36, %v4341_v40  ;;  %7438 = vpow2.f32 %v4358_v22  ;;  %v4943_v36 = vadd.f32 %v4935_v31, %v10267_v62  ;;  %v4967_v56 = vsel %vm694_vm1, %v10433_v38, -inf }
 0x9fe   :  { %v10387_v24 = vpop.eup %7430  ;;  %v4356_v29 = vmul.f32 1.442695, %v4348_v46  ;;  %v10437_v12 = vsel %vm693_vm3, %v4938_v53, -1e+30  ;;  %7440 = vpow2.f32 %v4362_v51  ;;  %v5443_v53 = vadd.f32 %v10318_v21, %v10296_v13 }
 0x9ff   :  { %v10389_v28 = vpop.eup %7432  ;;  %v4008_v8 = vsel %vm694_vm1, %v10387_v24, 0.0  ;;  %v4332_v18 = vpop.xlane.xlu0 %4331  ;;  %v4366_v54 = vmul.f32 1.442695, %v4353_v5  ;;  %v10449_v62 = vsel %vm693_vm3, %v4943_v36, -1e+30 }
 0xa00   :  { %4018 = vadd.xlane.f32.xlu1 %v4017_v9  ;;  %4009 = vadd.xlane.f32.xlu0 %v4008_v8  ;;  %v4023_v27 = vsel %vm694_vm1, %v10389_v28, 0.0  ;;  %v4350_v15 = vsub.f32 %v10308_v49, %v4332_v18  ;;  %v4347_v26 = vpop.xlane.xlu1 %4346  ;;  %v4940_v49 = vadd.f32 %v4935_v31, %v10288_v11  ;;  %7442 = vpow2.f32 %v4356_v29 }
 0xa01   :  { %v4355_v42 = vsub.f32 %v10312_v0, %v4347_v26  ;;  %v4958_v9 = vsel %vm694_vm1, %v10437_v12, -inf  ;;  %v4942_v0 = vadd.f32 %v4935_v31, %v10291_v60  ;;  %7444 = vpow2.f32 %v4366_v54 }
 0xa02   :  { %v10396_v17 = vpop.eup %7434  ;;  %v4360_v23 = vmul.f32 1.442695, %v4350_v15  ;;  %v10453_v11 = vsel %vm693_vm3, %v4940_v49, -1e+30  ;;  %v4973_v30 = vsel %vm694_vm1, %v10449_v62, -inf  ;;  %v5445_v15 = vadd.f32 %v10318_v21, %v10316_v55 }
 0xa03   :  { %v4014_v10 = vsel %vm694_vm1, %v10396_v17, 0.0  ;;  %v4338_v20 = vpop.xlane.xlu0 %4337  ;;  %v10465_v18 = vsel %vm693_vm3, %v4942_v0, -1e+30  ;;  %v10501_v29 = vsel %vm693_vm3, %v5443_v53, -1e+30  ;;  %v5449_v49 = vadd.f32 %v10318_v21, %v10324_v41 }
 0xa04   :  { %4024 = vadd.xlane.f32.xlu1 %v4023_v27  ;;  %4015 = vadd.xlane.f32.xlu0 %v4014_v10  ;;  %v4352_v58 = vsub.f32 %v10335_v61, %v4338_v20  ;;  %v4370_v61 = vmul.f32 1.442695, %v4355_v42  ;;  %7446 = vpow2.f32 %v4360_v23  ;;  %v4964_v27 = vsel %vm694_vm1, %v10453_v11, -inf }
 0xa05   :  { %v4970_v10 = vsel %vm694_vm1, %v10465_v18, -inf  ;;  %v5459_v13 = vsel %vm694_vm1, %v10501_v29, -inf  ;;  %v10527_v42 = vsel %vm693_vm3, %v5449_v49, -1e+30 }
 0xa06   :  { %v10408_v45 = vpop.eup %7436  ;;  %v4364_v25 = vmul.f32 1.442695, %v4352_v58  ;;  %7448 = vpow2.f32 %v4370_v61 }
 0xa07   :  { %v4020_v33 = vsel %vm694_vm1, %v10408_v45, 0.0  ;;  %v4344_v43 = vpop.xlane.xlu0 %4343  ;;  %v10461_v63 = vpop.eup %7438 }
 0xa08   :  { %4956 = vmax.xlane.f32.xlu1 %v4955_v14  ;;  %4021 = vadd.xlane.f32.xlu0 %v4020_v33  ;;  %v4354_v8 = vsub.f32 %v10359_v52, %v4344_v43  ;;  %7450 = vpow2.f32 %v4364_v25  ;;  %v10467_v31 = vpop.eup %7440  ;;  %v4375_v52 = vsel %vm694_vm1, %v10461_v63, 0.0 }
 0xa09   :  { %v4381_v35 = vsel %vm694_vm1, %v10467_v31, 0.0 }
 0xa0a   :  { %v4368_v60 = vmul.f32 1.442695, %v4354_v8  ;;  %v10473_v40 = vpop.eup %7442 }
 0xa0b   :  { %v10475_v19 = vpop.eup %7444  ;;  %v4372_v16 = vsel %vm694_vm1, %v10473_v40, 0.0 }
 0xa0c   :  { %4962 = vmax.xlane.f32.xlu1 %v4961_v59  ;;  %4953 = vmax.xlane.f32.xlu0 %v4952_v32  ;;  %7452 = vpow2.f32 %v4368_v60  ;;  %v4387_v14 = vsel %vm694_vm1, %v10475_v19, 0.0  ;;  %v10511_v59 = vsel %vm693_vm3, %v5445_v15, -1e+30  ;;  %v5447_v32 = vadd.f32 %v10318_v21, %v10321_v6 }
 0xa0d   :  { %v5465_v36 = vsel %vm694_vm1, %v10511_v59, -inf  ;;  %v5477_v6 = vsel %vm694_vm1, %v10527_v42, -inf }
 0xa0e   :  { %v10481_v22 = vpop.eup %7446  ;;  %v10519_v55 = vsel %vm693_vm3, %v5447_v32, -1e+30 }
 0xa0f   :  { %v4378_v33 = vsel %vm694_vm1, %v10481_v22, 0.0  ;;  %v5471_v54 = vsel %vm694_vm1, %v10519_v55, -inf }
 0xa10   :  { %4968 = vmax.xlane.f32.xlu1 %v4967_v56  ;;  %4959 = vmax.xlane.f32.xlu0 %v4958_v9  ;;  %v10483_v46 = vpop.eup %7448 }
 0xa11   :  { %v4393_v51 = vsel %vm694_vm1, %v10483_v46, 0.0 }
 0xa12   :  { %v10489_v3 = vpop.eup %7450 }
 0xa13   :  { %v4384_v5 = vsel %vm694_vm1, %v10489_v3, 0.0 }
 0xa14   :  { %4974 = vmax.xlane.f32.xlu1 %v4973_v30  ;;  %4965 = vmax.xlane.f32.xlu0 %v4964_v27 }
 0xa16   :  { %v10497_v20 = vpop.eup %7452 }
 0xa17   :  { %v4390_v26 = vsel %vm694_vm1, %v10497_v20, 0.0 }
 0xa18   :  { %4376 = vadd.xlane.f32.xlu1 %v4375_v52  ;;  %4971 = vmax.xlane.f32.xlu0 %v4970_v10 }
 0xa1c   :  { %4382 = vadd.xlane.f32.xlu1 %v4381_v35  ;;  %4373 = vadd.xlane.f32.xlu0 %v4372_v16 }
 0xa20   :  { %4388 = vadd.xlane.f32.xlu1 %v4387_v14  ;;  %4379 = vadd.xlane.f32.xlu0 %v4378_v33 }
 0xa24   :  { %4394 = vadd.xlane.f32.xlu1 %v4393_v51  ;;  %4385 = vadd.xlane.f32.xlu0 %v4384_v5 }
 0xa28   :  { %5460 = vmax.xlane.f32.xlu1 %v5459_v13  ;;  %4391 = vadd.xlane.f32.xlu0 %v4390_v26 }
 0xa2c   :  { %5466 = vmax.xlane.f32.xlu1 %v5465_v36 }
 0xa30   :  { %5472 = vmax.xlane.f32.xlu1 %v5471_v54 }
 0xa34   :  { %5478 = vmax.xlane.f32.xlu1 %v5477_v6 }
 0xa84   :  { %v4007_v23 = vpop.xlane.xlu1 %4006 }
 0xa85   :  { %7454 = vrcp.f32 %v4007_v23  ;;  %v4004_v58 = vpop.xlane.xlu0 %4003 }
 0xa86   :  { %7456 = vrcp.f32 %v4004_v58 }
 0xa89   :  { %v4013_v43 = vpop.xlane.xlu1 %4012 }
 0xa8a   :  { %7458 = vrcp.f32 %v4013_v43 }
 0xa8d   :  { %v4019_v56 = vpop.xlane.xlu1 %4018  ;;  %v4010_v21 = vpop.xlane.xlu0 %4009 }
 0xa8e   :  { %7460 = vrcp.f32 %v4010_v21 }
 0xa8f   :  { %v7455_v41 = vpop.eup %7454  ;;  %7462 = vrcp.f32 %v4019_v56 }
 0xa90   :  { %v7457_v9 = vpop.eup %7456  ;;  %v10532_v25 = vmul.f32 %v7455_v41, %v10370_v44 }
 0xa91   :  { %v4025_v0 = vpop.xlane.xlu1 %4024  ;;  %v4016_v61 = vpop.xlane.xlu0 %4015  ;;  %v10535_v8 = vmul.f32 %v7457_v9, %v10372_v39 }
 0xa92   :  { %7464 = vrcp.f32 %v4016_v61  ;;  %v4043_v52 = vmul.f32 %v10532_v25, %v10532_v25 }
 0xa93   :  { %7466 = vrcp.f32 %v4025_v0  ;;  %v4042_v10 = vmul.f32 %v10535_v8, %v10535_v8 }
 0xa94   :  { %v7459_v60 = vpop.eup %7458  ;;  %v4051_v51 = vsel %vm694_vm1, %v4043_v52, 0.0 }
 0xa95   :  { %v10537_v30 = vpop.xlane.xlu1 %4956  ;;  %v4022_v27 = vpop.xlane.xlu0 %4021  ;;  %v10544_v44 = vmul.f32 %v7459_v60, %v10379_v47  ;;  %v4050_v5 = vsel %vm694_vm1, %v4042_v10, 0.0 }
 0xa96   :  { %7468 = vrcp.f32 %v4022_v27  ;;  %v4052_v6 = vadd.f32 %v4051_v51, %v4050_v5 }
 0xa97   :  { %v4045_v47 = vmul.f32 %v10544_v44, %v10544_v44 }
 0xa98   :  { %v7461_v35 = vpop.eup %7460 }
 0xa99   :  { %v10546_v16 = vpop.xlane.xlu1 %4962  ;;  %v4954_v39 = vpop.xlane.xlu0 %4953  ;;  %v10549_v33 = vmul.f32 %v7461_v35, %v10387_v24  ;;  %v4055_v0 = vsel %vm694_vm1, %v4045_v47, 0.0 }
 0xa9a   :  { %v7463_v14 = vpop.eup %7462  ;;  %v4976_v53 = vsub.f32 %v10421_v37, %v4954_v39 }
 0xa9b   :  { %v4044_v15 = vmul.f32 %v10549_v33, %v10549_v33  ;;  %v10559_v32 = vmul.f32 %v7463_v14, %v10381_v2 }
 0xa9c   :  { %v4984_v13 = vmul.f32 1.442695, %v4976_v53  ;;  %v7465_v26 = vpop.eup %7464 }
 0xa9d   :  { %v10561_v36 = vpop.xlane.xlu1 %4968  ;;  %v4960_v24 = vpop.xlane.xlu0 %4959  ;;  %v10564_v37 = vmul.f32 %v7465_v26, %v10396_v17  ;;  %v4053_v23 = vsel %vm694_vm1, %v4044_v15, 0.0  ;;  %v4977_v26 = vsub.f32 %v10403_v4, %v10537_v30  ;;  %v4979_v30 = vsub.f32 %v10417_v7, %v10546_v16 }
 0xa9e   :  { %v7467_v49 = vpop.eup %7466  ;;  %v4978_v54 = vsub.f32 %v10437_v12, %v4960_v24  ;;  %7470 = vpow2.f32 %v4984_v13  ;;  %v4054_v2 = vadd.f32 %v4053_v23, %v4052_v6  ;;  %v4047_v12 = vmul.f32 %v10559_v32, %v10559_v32 }
 0xa9f   :  { %v4046_v56 = vmul.f32 %v10564_v37, %v10564_v37  ;;  %v10576_v17 = vmul.f32 %v7467_v49, %v10389_v28  ;;  %v4986_v4 = vmul.f32 1.442695, %v4977_v26  ;;  %v4990_v7 = vmul.f32 1.442695, %v4979_v30 }
 0xaa0   :  { %v7469_v58 = vpop.eup %7468  ;;  %v4988_v43 = vmul.f32 1.442695, %v4978_v54  ;;  %v4056_v27 = vadd.f32 %v4055_v0, %v4054_v2  ;;  %v4059_v14 = vsel %vm694_vm1, %v4047_v12, 0.0 }
 0xaa1   :  { %v10570_v21 = vpop.xlane.xlu1 %4974  ;;  %v4966_v41 = vpop.xlane.xlu0 %4965  ;;  %v10573_v9 = vmul.f32 %v7469_v58, %v10408_v45  ;;  %v4057_v52 = vsel %vm694_vm1, %v4046_v56, 0.0  ;;  %v4049_v28 = vmul.f32 %v10576_v17, %v10576_v17 }
 0xaa2   :  { %v4980_v61 = vsub.f32 %v10453_v11, %v4966_v41  ;;  %7472 = vpow2.f32 %v4988_v43  ;;  %v4058_v45 = vadd.f32 %v4057_v52, %v4056_v27 }
 0xaa3   :  { %v4048_v60 = vmul.f32 %v10573_v9, %v10573_v9  ;;  %v4063_v49 = vsel %vm694_vm1, %v4049_v28, 0.0 }
 0xaa4   :  { %v4992_v10 = vmul.f32 1.442695, %v4980_v61  ;;  %v4060_v51 = vadd.f32 %v4059_v14, %v4058_v45  ;;  %v4981_v61 = vsub.f32 %v10433_v38, %v10561_v36  ;;  %v4983_v36 = vsub.f32 %v10449_v62, %v10570_v21 }
 0xaa5   :  { %v4377_v35 = vpop.xlane.xlu1 %4376  ;;  %v4972_v39 = vpop.xlane.xlu0 %4971  ;;  %v4061_v53 = vsel %vm694_vm1, %v4048_v60, 0.0  ;;  %v10650_v21 = vsel %vm693_vm3, %v10355_v34, -1e+30 }
 0xaa6   :  { %v4982_v11 = vsub.f32 %v10465_v18, %v4972_v39  ;;  %7474 = vpow2.f32 %v4992_v10  ;;  %v4062_v15 = vadd.f32 %v4061_v53, %v4060_v51  ;;  %v10600_v18 = vsel %vm693_vm3, %v10338_v1, -1e+30 }
 0xaa7   :  { %7476 = vrcp.f32 %v4377_v35  ;;  %v5462_v2 = vsel %vm694_vm1, %v10600_v18, -inf  ;;  %v10613_v1 = vsel %vm693_vm3, %v10347_v48, -1e+30  ;;  %v10631_v10 = vsel %vm693_vm3, %v10352_v57, -1e+30 }
 0xaa8   :  { %v4996_v5 = vmul.f32 1.442695, %v4982_v11  ;;  %v10590_v13 = vpop.eup %7470  ;;  %v4064_v54 = vadd.f32 %v4063_v49, %v4062_v15  ;;  %v5468_v60 = vsel %vm694_vm1, %v10613_v1, -inf  ;;  %v4994_v14 = vmul.f32 1.442695, %v4981_v61 }
 0xaa9   :  { %v4383_v47 = vpop.xlane.xlu1 %4382  ;;  %v4374_v24 = vpop.xlane.xlu0 %4373  ;;  %v5000_v6 = vsel %vm694_vm1, %v10590_v13, 0.0  ;;  %v5474_v57 = vsel %vm694_vm1, %v10631_v10, -inf  ;;  %v5480_v34 = vsel %vm694_vm1, %v10650_v21, -inf }
 0xaaa   :  { %7478 = vpow2.f32 %v4996_v5  ;;  %5001 = vadd.xlane.f32.xlu1 %v5000_v6  ;;  %4065 = vadd.xlane.f32.xlu0 %v4064_v54 }
 0xaab   :  { %7480 = vrcp.f32 %v4383_v47 }
 0xaac   :  { %7482 = vrcp.f32 %v4374_v24  ;;  %v10602_v23 = vpop.eup %7472 }
 0xaad   :  { %v4389_v58 = vpop.xlane.xlu1 %4388  ;;  %v4380_v43 = vpop.xlane.xlu0 %4379  ;;  %v5006_v56 = vsel %vm694_vm1, %v10602_v23, 0.0 }
 0xaae   :  { %7484 = vrcp.f32 %v4389_v58  ;;  %5007 = vadd.xlane.f32.xlu1 %v5006_v56  ;;  %5463 = vmax.xlane.f32.xlu0 %v5462_v2 }
 0xaaf   :  { %7486 = vrcp.f32 %v4380_v43 }
 0xab0   :  { %v10615_v41 = vpop.eup %7474  ;;  %7488 = vpow2.f32 %v4986_v4 }
 0xab1   :  { %v4395_v16 = vpop.xlane.xlu1 %4394  ;;  %v4386_v12 = vpop.xlane.xlu0 %4385  ;;  %v5012_v27 = vsel %vm694_vm1, %v10615_v41, 0.0 }
 0xab2   :  { %v7477_v0 = vpop.eup %7476  ;;  %7490 = vrcp.f32 %v4395_v16  ;;  %5013 = vadd.xlane.f32.xlu1 %v5012_v27  ;;  %5469 = vmax.xlane.f32.xlu0 %v5468_v60 }
 0xab3   :  { %7492 = vrcp.f32 %v4386_v12  ;;  %v10626_v52 = vmul.f32 %v7477_v0, %v10461_v63 }
 0xab4   :  { %v10623_v48 = vpop.eup %7478  ;;  %7494 = vpow2.f32 %v4990_v7 }
 0xab5   :  { %v7481_v38 = vpop.eup %7480  ;;  %v5461_v45 = vpop.xlane.xlu1 %5460  ;;  %v5018_v39 = vsel %vm694_vm1, %v10623_v48, 0.0  ;;  %v4413_v11 = vmul.f32 %v10626_v52, %v10626_v52 }
 0xab6   :  { %v4392_v35 = vpop.xlane.xlu0 %4391  ;;  %v7483_v28 = vpop.eup %7482  ;;  %5019 = vadd.xlane.f32.xlu1 %v5018_v39  ;;  %v10645_v62 = vmul.f32 %v7481_v38, %v10467_v31  ;;  %5475 = vmax.xlane.f32.xlu0 %v5474_v57  ;;  %v5483_v47 = vsub.f32 %v10501_v29, %v5461_v45 }
 0xab7   :  { %7496 = vrcp.f32 %v4392_v35  ;;  %v10638_v63 = vmul.f32 %v7483_v28, %v10473_v40  ;;  %v4998_v40 = vmul.f32 1.442695, %v4983_v36  ;;  %v4421_v54 = vsel %vm694_vm1, %v4413_v11, 0.0 }
 0xab8   :  { %v7485_v53 = vpop.eup %7484  ;;  %7498 = vpow2.f32 %v4994_v14  ;;  %v4415_v6 = vmul.f32 %v10645_v62, %v10645_v62  ;;  %v5491_v56 = vmul.f32 1.442695, %v5483_v47 }
 0xab9   :  { %v7487_v51 = vpop.eup %7486  ;;  %v4412_v5 = vmul.f32 %v10638_v63, %v10638_v63  ;;  %v5467_v15 = vpop.xlane.xlu1 %5466  ;;  %v10667_v4 = vmul.f32 %v7485_v53, %v10475_v19  ;;  %7500 = vpow2.f32 %v4998_v40 }
 0xaba   :  { %v10655_v26 = vmul.f32 %v7487_v51, %v10481_v22  ;;  %v10658_v31 = vpop.eup %7488  ;;  %5481 = vmax.xlane.f32.xlu0 %v5480_v34  ;;  %v5485_v2 = vsub.f32 %v10511_v59, %v5467_v15  ;;  %v4425_v59 = vsel %vm694_vm1, %v4415_v6, 0.0  ;;  %7502 = vpow2.f32 %v5491_v56 }
 0xabb   :  { %v4420_v24 = vsel %vm694_vm1, %v4412_v5, 0.0  ;;  %v5003_v19 = vsel %vm694_vm1, %v10658_v31, 0.0  ;;  %v4417_v27 = vmul.f32 %v10667_v4, %v10667_v4 }
 0xabc   :  { %v7491_v49 = vpop.eup %7490  ;;  %v4414_v22 = vmul.f32 %v10655_v26, %v10655_v26  ;;  %v4422_v58 = vadd.f32 %v4421_v54, %v4420_v24  ;;  %v5495_v36 = vmul.f32 1.442695, %v5485_v2 }
 0xabd   :  { %v7493_v29 = vpop.eup %7492  ;;  %v5473_v30 = vpop.xlane.xlu1 %5472  ;;  %v10681_v61 = vmul.f32 %v7491_v49, %v10483_v46  ;;  %v4429_v53 = vsel %vm694_vm1, %v4417_v27, 0.0 }
 0xabe   :  { %v10672_v43 = vmul.f32 %v7493_v29, %v10489_v3  ;;  %v4423_v7 = vsel %vm694_vm1, %v4414_v22, 0.0  ;;  %v10676_v16 = vpop.eup %7494  ;;  %5004 = vadd.xlane.f32.xlu0 %v5003_v19  ;;  %v5487_v45 = vsub.f32 %v10519_v55, %v5473_v30  ;;  %7504 = vpow2.f32 %v5495_v36 }
 0xabf   :  { %v4424_v12 = vadd.f32 %v4423_v7, %v4422_v58  ;;  %v5009_v39 = vsel %vm694_vm1, %v10676_v16, 0.0 }
 0xac0   :  { %v4416_v3 = vmul.f32 %v10672_v43, %v10672_v43  ;;  %v5499_v51 = vmul.f32 1.442695, %v5487_v45 }
 0xac1   :  { %v7497_v0 = vpop.eup %7496  ;;  %v4426_v38 = vadd.f32 %v4425_v59, %v4424_v12  ;;  %v5479_v46 = vpop.xlane.xlu1 %5478 }
 0xac2   :  { %v10689_v60 = vmul.f32 %v7497_v0, %v10497_v20  ;;  %v4427_v35 = vsel %vm694_vm1, %v4416_v3, 0.0  ;;  %v10697_v57 = vpop.eup %7498  ;;  %5010 = vadd.xlane.f32.xlu0 %v5009_v39  ;;  %v4419_v20 = vmul.f32 %v10681_v61, %v10681_v61  ;;  %v5489_v40 = vsub.f32 %v10527_v42, %v5479_v46 }
 0xac3   :  { %v4428_v14 = vadd.f32 %v4427_v35, %v4426_v38  ;;  %v10704_v5 = vpop.eup %7500  ;;  %v5015_v15 = vsel %vm694_vm1, %v10697_v57, 0.0  ;;  %7506 = vpow2.f32 %v5499_v51 }
 0xac4   :  { %v4418_v28 = vmul.f32 %v10689_v60, %v10689_v60  ;;  %v4433_v24 = vsel %vm694_vm1, %v4419_v20, 0.0  ;;  %v5503_v49 = vmul.f32 1.442695, %v5489_v40  ;;  %v5021_v54 = vsel %vm694_vm1, %v10704_v5, 0.0  ;;  %v10711_v6 = vpop.eup %7502 }
 0xac5   :  { %v4430_v11 = vadd.f32 %v4429_v53, %v4428_v14  ;;  %v5507_v42 = vsel %vm694_vm1, %v10711_v6, 0.0 }
 0xac6   :  { %v4431_v55 = vsel %vm694_vm1, %v4418_v28, 0.0  ;;  %5016 = vadd.xlane.f32.xlu0 %v5015_v15  ;;  %7508 = vpow2.f32 %v5503_v49 }
 0xac7   :  { %v4432_v47 = vadd.f32 %v4431_v55, %v4430_v11 }
 0xac8   :  { %v10715_v22 = vpop.eup %7504 }
 0xac9   :  { %v4434_v34 = vadd.f32 %v4433_v24, %v4432_v47  ;;  %v5513_v29 = vsel %vm694_vm1, %v10715_v22, 0.0 }
 0xaca   :  { %5022 = vadd.xlane.f32.xlu0 %v5021_v54 }
 0xacb   :  { %4435 = vadd.xlane.f32.xlu1 %v4434_v34 }
 0xacd   :  { %v10719_v30 = vpop.eup %7506 }
 0xace   :  { %5508 = vadd.xlane.f32.xlu0 %v5507_v42  ;;  %v5519_v58 = vsel %vm694_vm1, %v10719_v30, 0.0 }
 0xad0   :  { %v10723_v56 = vpop.eup %7508 }
 0xad1   :  { %v5525_v2 = vsel %vm694_vm1, %v10723_v56, 0.0 }
 0xad2   :  { %5514 = vadd.xlane.f32.xlu0 %v5513_v29 }
 0xad6   :  { %5520 = vadd.xlane.f32.xlu0 %v5519_v58 }
 0xada   :  { %5526 = vadd.xlane.f32.xlu0 %v5525_v2 }
 0xb37   :  { %v4066_v7 = vpop.xlane.xlu0 %4065  ;;  %v5002_v3 = vpop.xlane.xlu1 %5001 }
 0xb38   :  { %v4067_v19 = vrot.slane %v4066_v7, 4 }
 0xb3a   :  { %v4068_v12 = vadd.f32 %v4067_v19, %v4066_v7 }
 0xb3b   :  { %v5464_v0 = vpop.xlane.xlu0 %5463  ;;  %v5008_v39 = vpop.xlane.xlu1 %5007 }
 0xb3c   :  { %v4069_v27 = vrot.slane %v4068_v12, 2  ;;  %v5484_v59 = vsub.f32 %v10600_v18, %v5464_v0 }
 0xb3e   :  { %v5493_v38 = vmul.f32 1.442695, %v5484_v59  ;;  %v4070_v36 = vadd.f32 %v4069_v27, %v4068_v12 }
 0xb3f   :  { %v5470_v45 = vpop.xlane.xlu0 %5469  ;;  %v5014_v51 = vpop.xlane.xlu1 %5013 }
 0xb40   :  { %7510 = vpow2.f32 %v5493_v38  ;;  %v5486_v35 = vsub.f32 %v10613_v1, %v5470_v45  ;;  %v4071_v46 = vrot.slane %v4070_v36, 1 }
 0xb42   :  { %v5497_v28 = vmul.f32 1.442695, %v5486_v35  ;;  %v4072_v14 = vadd.f32 %v4071_v46, %v4070_v36 }
 0xb43   :  { %v5476_v20 = vpop.xlane.xlu0 %5475  ;;  %v5020_v24 = vpop.xlane.xlu1 %5019 }
 0xb44   :  { %7512 = vpow2.f32 %v5497_v28  ;;  %v5488_v53 = vsub.f32 %v10631_v10, %v5476_v20  ;;  %7179 = vpush %v4072_v14 }
 0xb45   :  { %7514 = vrcp.f32 %v5002_v3 }
 0xb46   :  { %v5501_v11 = vmul.f32 1.442695, %v5488_v53 }
 0xb47   :  { %v5482_v55 = vpop.xlane.xlu0 %5481 }
 0xb48   :  { %7516 = vpow2.f32 %v5501_v11  ;;  %v5490_v18 = vsub.f32 %v10650_v21, %v5482_v55 }
 0xb49   :  { %7518 = vrcp.f32 %v5008_v39 }
 0xb4a   :  { %v10731_v40 = vpop.eup %7510  ;;  %v5505_v1 = vmul.f32 1.442695, %v5490_v18  ;;  %7520 = vrcp.f32 %v5014_v51 }
 0xb4b   :  { %v5005_v15 = vpop.xlane.xlu0 %5004  ;;  %v5510_v47 = vsel %vm694_vm1, %v10731_v40, 0.0 }
 0xb4c   :  { %7522 = vpow2.f32 %v5505_v1  ;;  %5511 = vadd.xlane.f32.xlu1 %v5510_v47 }
 0xb4d   :  { %7524 = vrcp.f32 %v5005_v15 }
 0xb4e   :  { %v10735_v10 = vpop.eup %7512 }
 0xb4f   :  { %v5011_v34 = vpop.xlane.xlu0 %5010  ;;  %v5516_v49 = vsel %vm694_vm1, %v10735_v10, 0.0  ;;  %v7515_v21 = vpop.eup %7514 }
 0xb50   :  { %7526 = vrcp.f32 %v5011_v34  ;;  %5517 = vadd.xlane.f32.xlu1 %v5516_v49  ;;  %v10744_v2 = vmul.f32 %v7515_v21, %v10590_v13 }
 0xb51   :  { %7528 = vrcp.f32 %v5020_v24 }
 0xb52   :  { %v10739_v54 = vpop.eup %7516  ;;  %v5040_v59 = vmul.f32 %v10744_v2, %v10744_v2 }
 0xb53   :  { %v7519_v42 = vpop.eup %7518  ;;  %v5017_v29 = vpop.xlane.xlu0 %5016  ;;  %v5522_v58 = vsel %vm694_vm1, %v10739_v54, 0.0 }
 0xb54   :  { %7530 = vrcp.f32 %v5017_v29  ;;  %5523 = vadd.xlane.f32.xlu1 %v5522_v58  ;;  %v7521_v7 = vpop.eup %7520  ;;  %v10749_v12 = vmul.f32 %v7519_v42, %v10602_v23  ;;  %v5048_v39 = vsel %vm694_vm1, %v5040_v59, 0.0 }
 0xb55   :  { %v10761_v23 = vmul.f32 %v7521_v7, %v10615_v41 }
 0xb56   :  { %v10746_v19 = vpop.eup %7522  ;;  %v5042_v36 = vmul.f32 %v10749_v12, %v10749_v12 }
 0xb57   :  { %v7525_v0 = vpop.eup %7524  ;;  %v5023_v3 = vpop.xlane.xlu0 %5022  ;;  %v5528_v27 = vsel %vm694_vm1, %v10746_v19, 0.0  ;;  %v5044_v41 = vmul.f32 %v10761_v23, %v10761_v23 }
 0xb58   :  { %v10756_v38 = vmul.f32 %v7525_v0, %v10658_v31  ;;  %7532 = vrcp.f32 %v5023_v3  ;;  %5529 = vadd.xlane.f32.xlu1 %v5528_v27  ;;  %v5051_v11 = vsel %vm694_vm1, %v5042_v36, 0.0  ;;  %v4436_v0 = vpop.xlane.xlu1 %4435  ;;  %v11229_v36 = vld [vmem:[#allocation9_spill] sm:$0xff] }
 0xb59   :  { %v5055_v47 = vsel %vm694_vm1, %v5044_v41, 0.0  ;;  %v4437_v3 = vrot.slane %v4436_v0, 4  ;;  %v6217_v41 = vadd.f32 -0.11111111, %v10559_v32 }
 0xb5a   :  { %v7527_v13 = vpop.eup %7526  ;;  %v5041_v45 = vmul.f32 %v10756_v38, %v10756_v38 }
 0xb5b   :  { %v7529_v35 = vpop.eup %7528  ;;  %v10766_v46 = vmul.f32 %v7527_v13, %v10676_v16 }
 0xb5c   :  { %v5049_v31 = vsel %vm694_vm1, %v5041_v45, 0.0  ;;  %v10773_v53 = vmul.f32 %v7529_v35, %v10623_v48 }
 0xb5d   :  { %v5043_v28 = vmul.f32 %v10766_v46, %v10766_v46  ;;  %v5050_v14 = vadd.f32 %v5049_v31, %v5048_v39  ;;  %v6212_v31 = vadd.f32 -0.11111111, %v10535_v8 }
 0xb5e   :  { %v7531_v20 = vpop.eup %7530  ;;  %v5046_v48 = vmul.f32 %v10773_v53, %v10773_v53 }
 0xb5f   :  { %v10779_v16 = vmul.f32 %v7531_v20, %v10697_v57  ;;  %v5052_v55 = vadd.f32 %v5051_v11, %v5050_v14  ;;  %v5053_v51 = vsel %vm694_vm1, %v5043_v28, 0.0  ;;  %v6213_v28 = vadd.f32 -0.11111111, %v10532_v25 }
 0xb60   :  { %v5059_v42 = vsel %vm694_vm1, %v5046_v48, 0.0  ;;  %v6214_v14 = vadd.f32 -0.11111111, %v10549_v33  ;;  %v6215_v20 = vadd.f32 -0.11111111, %v10544_v44 }
 0xb61   :  { %v5045_v18 = vmul.f32 %v10779_v16, %v10779_v16  ;;  %v5054_v1 = vadd.f32 %v5053_v51, %v5052_v55  ;;  %v6216_v55 = vadd.f32 -0.11111111, %v10564_v37  ;;  %v6218_v51 = vadd.f32 -0.11111111, %v10573_v9 }
 0xb62   :  { %v7533_v15 = vpop.eup %7532 }
 0xb63   :  { %v10788_v24 = vmul.f32 %v7533_v15, %v10704_v5  ;;  %v5056_v34 = vadd.f32 %v5055_v47, %v5054_v1  ;;  %v5057_v57 = vsel %vm694_vm1, %v5045_v18, 0.0  ;;  %v4438_v5 = vadd.f32 %v4437_v3, %v4436_v0 }
 0xb64   :  { %v6219_v18 = vadd.f32 -0.11111111, %v10576_v17  ;;  %v5509_v17 = vpop.xlane.xlu0 %5508 }
 0xb65   :  { %v5047_v49 = vmul.f32 %v10788_v24, %v10788_v24  ;;  %v5058_v21 = vadd.f32 %v5057_v57, %v5056_v34  ;;  %v4439_v27 = vrot.slane %v4438_v5, 2 }
 0xb67   :  { %v5060_v29 = vadd.f32 %v5059_v42, %v5058_v21  ;;  %v5061_v58 = vsel %vm694_vm1, %v5047_v49, 0.0  ;;  %v4440_v13 = vadd.f32 %v4439_v27, %v4438_v5 }
 0xb68   :  { %v5515_v34 = vpop.xlane.xlu0 %5514 }
 0xb69   :  { %v5062_v7 = vadd.f32 %v5061_v58, %v5060_v29  ;;  %v4441_v45 = vrot.slane %v4440_v13, 1 }
 0xb6b   :  { %5063 = vadd.xlane.f32.xlu0 %v5062_v7  ;;  %v4442_v39 = vadd.f32 %v4441_v45, %v4440_v13 }
 0xb6c   :  { %v5521_v57 = vpop.xlane.xlu0 %5520 }
 0xb70   :  { %v5527_v21 = vpop.xlane.xlu0 %5526 }
 0xb75   :  { %s7180_s17 = spop %7179 }
 0xb76   :  { %s4074_s10 = smul.f32 0.0017361111, %s7180_s17 }
 0xb78   :  { %s6211_s3 = sadd.f32 -0.012345679, %s4074_s10 }
 0xb7a   :  { %s4084_s11 = sadd.f32 1e-05, %s6211_s3 }
 0xb7c   :  { %v4085_v59 = vstv %s4084_s11 }
 0xb7d   :  { %7534 = vrsqrt.f32 %v4085_v59 }
 0xb81   :  { %7255 = vrot.lane.b32.xlu0 %v11229_v36, %s7592_s30 }
 0xb87   :  { %v7535_v35 = vpop.eup %7534 }
 0xb88   :  { %7181 = vpush %v7535_v35 }
 0xb89   :  { %7183 = vpush %v4442_v39 }
 0xbb9   :  { %s7182_s19 = spop %7181 }
 0xbba   :  { %v4088_v11 = vstv %s7182_s19  ;;  %s7184_s20 = spop %7183 }
 0xbbb   :  { %s4444_s30 = smul.f32 0.0017361111, %s7184_s20  ;;  %v4089_v1 = vmul.f32 %v6212_v31, %v4088_v11  ;;  %v10805_v8 = vmul.f32 %v6213_v28, %v4088_v11  ;;  %v10807_v25 = vmul.f32 %v6214_v14, %v4088_v11  ;;  %v10809_v15 = vmul.f32 %v6215_v20, %v4088_v11 }
 0xbbc   :  { %v10811_v33 = vmul.f32 %v6216_v55, %v4088_v11  ;;  %v10813_v44 = vmul.f32 %v6217_v41, %v4088_v11  ;;  %v10815_v32 = vmul.f32 %v6218_v51, %v4088_v11  ;;  %v10817_v48 = vmul.f32 %v6219_v18, %v4088_v11 }
 0xbbd   :  { %s6233_s8 = sadd.f32 -0.012345679, %s4444_s30  ;;  %v4097_v37 = vsel %vm693_vm3, %v4089_v1, 0.0 }
 0xbbe   :  { %6877 = vmatprep.mubr.msk.f32.mxu0 %vm694_vm1, %v4097_v37 }
 0xbbf   :  { %s4454_s21 = sadd.f32 1e-05, %s6233_s8 }
 0xbc1   :  { %v4455_v9 = vstv %s4454_s21 }
 0xbc2   :  { %7536 = vrsqrt.f32 %v4455_v9 }
 0xbc3   :  { %7538 = vrcp.f32 %v5509_v17 }
 0xbc4   :  { %7540 = vrcp.f32 %v5515_v34 }
 0xbc5   :  { %7542 = vrcp.f32 %v5521_v57 }
 0xbcc   :  { %v7537_v47 = vpop.eup %7536 }
 0xbcd   :  { %7185 = vpush %v7537_v47  ;;  %v7539_v29 = vpop.eup %7538 }
 0xbce   :  { %v7541_v58 = vpop.eup %7540  ;;  %v10823_v7 = vmul.f32 %v7539_v29, %v10711_v6 }
 0xbcf   :  { %v7543_v3 = vpop.eup %7542  ;;  %v10826_v5 = vmul.f32 %v7541_v58, %v10715_v22 }
 0xbd0   :  { %v5547_v59 = vmul.f32 %v10823_v7, %v10823_v7  ;;  %v10836_v39 = vmul.f32 %v7543_v3, %v10719_v30 }
 0xbd1   :  { %v5549_v6 = vmul.f32 %v10826_v5, %v10826_v5 }
 0xbd2   :  { %v5555_v28 = vsel %vm694_vm1, %v5547_v59, 0.0  ;;  %v5551_v30 = vmul.f32 %v10836_v39, %v10836_v39 }
 0xbd3   :  { %v5558_v55 = vsel %vm694_vm1, %v5549_v6, 0.0 }
 0xbd4   :  { %v5562_v17 = vsel %vm694_vm1, %v5551_v30, 0.0 }
 0xbd9   :  { %v5512_v49 = vpop.xlane.xlu1 %5511 }
 0xbda   :  { %7544 = vrcp.f32 %v5512_v49 }
 0xbdb   :  { %7546 = vrcp.f32 %v5527_v21 }
 0xbdd   :  { %v5518_v42 = vpop.xlane.xlu1 %5517 }
 0xbde   :  { %7548 = vrcp.f32 %v5518_v42 }
 0xbe1   :  { %v5524_v0 = vpop.xlane.xlu1 %5523 }
 0xbe2   :  { %7550 = vrcp.f32 %v5524_v0 }
 0xbe4   :  { %v7545_v27 = vpop.eup %7544 }
 0xbe5   :  { %v10831_v13 = vmul.f32 %v7545_v27, %v10731_v40  ;;  %v5530_v45 = vpop.xlane.xlu1 %5529  ;;  %v7547_v35 = vpop.eup %7546 }
 0xbe6   :  { %7552 = vrcp.f32 %v5530_v45  ;;  %v10848_v11 = vmul.f32 %v7547_v35, %v10723_v56 }
 0xbe7   :  { %v5548_v22 = vmul.f32 %v10831_v13, %v10831_v13 }
 0xbe8   :  { %v7549_v31 = vpop.eup %7548  ;;  %v5553_v56 = vmul.f32 %v10848_v11, %v10848_v11 }
 0xbe9   :  { %v5556_v14 = vsel %vm694_vm1, %v5548_v22, 0.0  ;;  %v10843_v40 = vmul.f32 %v7549_v31, %v10735_v10  ;;  %v6234_v22 = vadd.f32 -0.11111111, %v10638_v63  ;;  %v6235_v31 = vadd.f32 -0.11111111, %v10626_v52 }
 0xbea   :  { %v5557_v20 = vadd.f32 %v5556_v14, %v5555_v28  ;;  %v5566_v42 = vsel %vm694_vm1, %v5553_v56, 0.0  ;;  %v6238_v52 = vadd.f32 -0.11111111, %v10672_v43 }
 0xbeb   :  { %v5550_v41 = vmul.f32 %v10843_v40, %v10843_v40 }
 0xbec   :  { %v7551_v51 = vpop.eup %7550  ;;  %v5559_v18 = vadd.f32 %v5558_v55, %v5557_v20 }
 0xbed   :  { %v10854_v1 = vmul.f32 %v7551_v51, %v10739_v54  ;;  %v5560_v10 = vsel %vm694_vm1, %v5550_v41, 0.0  ;;  %v6236_v41 = vadd.f32 -0.11111111, %v10655_v26 }
 0xbee   :  { %v5561_v37 = vadd.f32 %v5560_v10, %v5559_v18 }
 0xbef   :  { %v5552_v9 = vmul.f32 %v10854_v1, %v10854_v1 }
 0xbf0   :  { %v7553_v47 = vpop.eup %7552  ;;  %v5563_v34 = vadd.f32 %v5562_v17, %v5561_v37  ;;  %v6237_v37 = vadd.f32 -0.11111111, %v10645_v62  ;;  %v6239_v62 = vadd.f32 -0.11111111, %v10667_v4 }
 0xbf1   :  { %v10863_v57 = vmul.f32 %v7553_v47, %v10746_v19  ;;  %v5564_v49 = vsel %vm694_vm1, %v5552_v9, 0.0  ;;  %v6240_v47 = vadd.f32 -0.11111111, %v10689_v60 }
 0xbf2   :  { %v5565_v54 = vadd.f32 %v5564_v49, %v5563_v34 }
 0xbf3   :  { %v5554_v21 = vmul.f32 %v10863_v57, %v10863_v57 }
 0xbf4   :  { %v5567_v29 = vadd.f32 %v5566_v42, %v5565_v54 }
 0xbf5   :  { %v5568_v58 = vsel %vm694_vm1, %v5554_v21, 0.0  ;;  %v6241_v21 = vadd.f32 -0.11111111, %v10681_v61 }
 0xbf6   :  { %v5569_v0 = vadd.f32 %v5568_v58, %v5567_v29 }
 0xbf8   :  { %v5064_v3 = vpop.xlane.xlu0 %5063  ;;  %5570 = vadd.xlane.f32.xlu1 %v5569_v0  ;;  %v6272_v0 = vadd.f32 -0.11111111, %v10744_v2  ;;  %v4611_v2 = vld [vmem:[%s11107_s6 + $0x18] sm:$0xff] }
 0xbf9   :  { %v5065_v27 = vrot.slane %v5064_v3, 4 }
 0xbfb   :  { %v5066_v59 = vadd.f32 %v5065_v27, %v5064_v3 }
 0xbfc   :  { %v7256_v45 = vpop.permute.xlu0 %7255 }
 0xbfd   :  { %v5067_v35 = vrot.slane %v5066_v59, 2  ;;  %v7258_v19 = vunpack.i.h.bf16 %v7256_v45  ;;  %v7257_v6 = vunpack.i.l.bf16 %v7256_v45 }
 0xbfe   :  { %s7186_s13 = spop %7185 }
 0xbff   :  { %v7085_v28 = vpack.c.bf16 %v7258_v19, %v7257_v6  ;;  %v4458_v14 = vstv %s7186_s13  ;;  %v5068_v20 = vadd.f32 %v5067_v35, %v5066_v59  ;;  %v4610_v6 = vld [vmem:[%s11107_s6 + $0x10] sm:$0xff] }
 0xc00   :  { %v4459_v30 = vmul.f32 %v6234_v22, %v4458_v14  ;;  %v4460_v55 = vmul.f32 %v6235_v31, %v4458_v14  ;;  %v4461_v18 = vmul.f32 %v6236_v41, %v4458_v14  ;;  %v4462_v26 = vmul.f32 %v6237_v37, %v4458_v14 }
 0xc01   :  { %7086 = vmatprep.subr.bf16.mxu1 %v7085_v28  ;;  %v5069_v51 = vrot.slane %v5068_v20, 1  ;;  %v4463_v17 = vmul.f32 %v6238_v52, %v4458_v14  ;;  %v4464_v34 = vmul.f32 %v6239_v62, %v4458_v14  ;;  %v4465_v54 = vmul.f32 %v6240_v47, %v4458_v14 }
 0xc02   :  { %7088 = vmatpush3.bf16.msra.mxu1 %v7085_v28  ;;  %v4467_v10 = vsel %vm693_vm3, %v4459_v30, 0.0  ;;  %v4468_v9 = vsel %vm693_vm3, %v4460_v55, 0.0  ;;  %v4469_v56 = vsel %vm693_vm3, %v4461_v18, 0.0  ;;  %v4470_v43 = vsel %vm693_vm3, %v4462_v26, 0.0 }
 0xc03   :  { %6893 = vmatprep.mubr.msk.f32.mxu1 %vm694_vm1, %v4467_v10  ;;  %v5070_v63 = vadd.f32 %v5069_v51, %v5068_v20  ;;  %v4471_v49 = vsel %vm693_vm3, %v4463_v17, 0.0  ;;  %v4472_v4 = vsel %vm693_vm3, %v4464_v34, 0.0  ;;  %v4466_v60 = vmul.f32 %v6241_v21, %v4458_v14 }
 0xc04   :  { %v4473_v42 = vsel %vm693_vm3, %v4465_v54, 0.0  ;;  %v7089_v41 = vpack.c.bf16 %v4611_v2, %v4610_v6  ;;  %v6273_v10 = vadd.f32 -0.11111111, %v10756_v38  ;;  %v4099_v38 = vsel %vm693_vm3, %v10807_v25, 0.0 }
 0xc05   :  { %6894 = vmatmul.mubr.msk.f32.vlgmr.msra.gmra.mrb[82].mxu1 %vm694_vm1, %v4468_v9  ;;  %7187 = vpush %v5070_v63  ;;  %v4474_v29 = vsel %vm693_vm3, %v4466_v60, 0.0  ;;  %v4098_v9 = vsel %vm693_vm3, %v10805_v8, 0.0  ;;  %v6275_v8 = vadd.f32 -0.11111111, %v10766_v46  ;;  %v4100_v34 = vsel %vm693_vm3, %v10809_v15, 0.0 }
 0xc06   :  { %6896 = vmatprep.mubr.msk.f32.mxu1 %vm694_vm1, %v4469_v56  ;;  %v6274_v56 = vadd.f32 -0.11111111, %v10749_v12  ;;  %v6276_v12 = vadd.f32 -0.11111111, %v10761_v23  ;;  %v4101_v46 = vsel %vm693_vm3, %v10811_v33, 0.0 }
 0xc07   :  { %v6277_v54 = vadd.f32 -0.11111111, %v10779_v16  ;;  %v6278_v21 = vadd.f32 -0.11111111, %v10773_v53  ;;  %v4241_v16 = vld [vmem:[%s11107_s6 + $0x8] sm:$0xff]  ;;  %v4103_v53 = vsel %vm693_vm3, %v10815_v32, 0.0 }
 0xc09   :  { %6897 = vmatmul.mubr.msk.f32.gmra.mrb[84].mxu1 %vm694_vm1, %v4470_v43  ;;  %7260 = vrot.lane.b32.xlu1 %v11229_v36, %s7595_s12 }
 0xc0a   :  { %6899 = vmatprep.mubr.msk.f32.mxu1 %vm694_vm1, %v4471_v49 }
 0xc0d   :  { %6900 = vmatmul.mubr.msk.f32.gmra.mrb[86].mxu1 %vm694_vm1, %v4472_v4  ;;  %7265 = vrot.lane.b32.xlu1 %v11229_v36, %s7593_s15  ;;  %v4102_v4 = vsel %vm693_vm3, %v10813_v44, 0.0 }
 0xc0e   :  { %6902 = vmatprep.mubr.msk.f32.mxu1 %vm694_vm1, %v4473_v42  ;;  %v4240_v42 = vld [vmem:[%s11107_s6] sm:$0xff] }
 0xc11   :  { %6903 = vmatmul.mubr.msk.f32.gmra.mrb[88].mxu1 %vm694_vm1, %v4474_v29  ;;  %7270 = vrot.lane.b32.xlu1 %v11229_v36, %s7594_s16 }
 0xc36   :  { %s7188_s12 = spop %7187 }
 0xc37   :  { %s5072_s22 = smul.f32 0.0017361111, %s7188_s12 }
 0xc39   :  { %s6271_s23 = sadd.f32 -0.012345679, %s5072_s22 }
 0xc3b   :  { %s5082_s18 = sadd.f32 1e-05, %s6271_s23 }
 0xc3d   :  { %v5083_v61 = vstv %s5082_s18 }
 0xc3e   :  { %7554 = vrsqrt.f32 %v5083_v61  ;;  %v7093_v61 = vpack.c.bf16 %v4241_v16, %v4240_v42 }
 0xc48   :  { %v7555_v58 = vpop.eup %7554 }
 0xc49   :  { %7189 = vpush %v7555_v58  ;;  %v6279_v58 = vadd.f32 -0.11111111, %v10788_v24 }
 0xc7a   :  { %s7190_s15 = spop %7189 }
 0xc7b   :  { %v10909_v3 = vstv %s7190_s15 }
 0xc7c   :  { %v5087_v27 = vmul.f32 %v6272_v0, %v10909_v3  ;;  %v5088_v26 = vmul.f32 %v6273_v10, %v10909_v3  ;;  %v5089_v47 = vmul.f32 %v6274_v56, %v10909_v3  ;;  %v5090_v25 = vmul.f32 %v6275_v8, %v10909_v3 }
 0xc7d   :  { %v5091_v23 = vmul.f32 %v6276_v12, %v10909_v3  ;;  %v5092_v60 = vmul.f32 %v6277_v54, %v10909_v3  ;;  %v5093_v29 = vmul.f32 %v6278_v21, %v10909_v3  ;;  %v4104_v0 = vsel %vm693_vm3, %v10817_v48, 0.0  ;;  %v5746_v12 = vld [vmem:[%s11107_s6 + $0x38] sm:$0xff] }
 0xc7e   :  { %v5095_v59 = vsel %vm693_vm3, %v5087_v27, 0.0  ;;  %v5096_v49 = vsel %vm693_vm3, %v5088_v26, 0.0  ;;  %v5097_v15 = vsel %vm693_vm3, %v5089_v47, 0.0  ;;  %v5098_v33 = vsel %vm693_vm3, %v5090_v25, 0.0 }
 0xc7f   :  { %6941 = vmatprep.mubr.msk.f32.mxu1 %vm694_vm1, %v5095_v59  ;;  %v5099_v44 = vsel %vm693_vm3, %v5091_v23, 0.0  ;;  %v5100_v32 = vsel %vm693_vm3, %v5092_v60, 0.0  ;;  %v5094_v27 = vmul.f32 %v6279_v58, %v10909_v3  ;;  %v5101_v59 = vsel %vm693_vm3, %v5093_v29, 0.0 }
 0xc80   :  { %v6306_v26 = vadd.f32 -0.11111111, %v10836_v39  ;;  %v6308_v56 = vadd.f32 -0.11111111, %v10848_v11  ;;  %v6309_v47 = vadd.f32 -0.11111111, %v10863_v57 }
 0xc81   :  { %v5102_v24 = vsel %vm693_vm3, %v5094_v27, 0.0  ;;  %v5745_v57 = vld [vmem:[%s11107_s6 + $0x30] sm:$0xff] }
 0xc82   :  { %v7109_v25 = vpack.c.bf16 %v5746_v12, %v5745_v57 }
 0xc85   :  { %v5571_v36 = vpop.xlane.xlu1 %5570 }
 0xc86   :  { %v5572_v45 = vrot.slane %v5571_v36, 4 }
 0xc88   :  { %v5573_v35 = vadd.f32 %v5572_v45, %v5571_v36 }
 0xc89   :  { %v7261_v19 = vpop.permute.xlu1 %7260 }
 0xc8a   :  { %v5574_v22 = vrot.slane %v5573_v35, 2  ;;  %v7263_v31 = vunpack.i.h.bf16 %v7261_v19  ;;  %v7262_v28 = vunpack.i.l.bf16 %v7261_v19 }
 0xc8c   :  { %v7081_v14 = vpack.c.bf16 %v7263_v31, %v7262_v28  ;;  %v5575_v20 = vadd.f32 %v5574_v22, %v5573_v35  ;;  %v5238_v28 = vld [vmem:[%s11107_s6 + $0x20] sm:$0xff] }
 0xc8d   :  { %v7266_v30 = vpop.permute.xlu1 %7265 }
 0xc8e   :  { %v7268_v55 = vunpack.i.h.bf16 %v7266_v30  ;;  %v7267_v51 = vunpack.i.l.bf16 %v7266_v30  ;;  %7082 = vmatprep.subr.bf16.mxu0 %v7081_v14  ;;  %v5576_v18 = vrot.slane %v5575_v20, 1  ;;  %v6303_v30 = vadd.f32 -0.11111111, %v10831_v13 }
 0xc8f   :  { %7084 = vmatpush3.bf16.msra.mxu0 %v7081_v14  ;;  %v5239_v14 = vld [vmem:[%s11107_s6 + $0x28] sm:$0xff] }
 0xc90   :  { %v7097_v37 = vpack.c.bf16 %v7268_v55, %v7267_v51  ;;  %v5577_v63 = vadd.f32 %v5576_v18, %v5575_v20  ;;  %7090 = vmatprep.subr.bf16.mxu0 %v7089_v41  ;;  %v7101_v20 = vpack.c.bf16 %v5239_v14, %v5238_v28  ;;  %v6304_v55 = vadd.f32 -0.11111111, %v10826_v5 }
 0xc91   :  { %v7271_v52 = vpop.permute.xlu1 %7270 }
 0xc92   :  { %v7273_v17 = vunpack.i.h.bf16 %v7271_v52  ;;  %v7272_v62 = vunpack.i.l.bf16 %v7271_v52  ;;  %6878 = vmatmul.mubr.msk.f32.vlgmr.msra.gmra.mrb[42].mxu0 %vm694_vm1, %v4098_v9  ;;  %7098 = vmatprep.subr.bf16.mxu1 %v7097_v37  ;;  %7191 = vpush %v5577_v63  ;;  %v6305_v63 = vadd.f32 -0.11111111, %v10843_v40  ;;  %v6307_v40 = vadd.f32 -0.11111111, %v10854_v1 }
 0xc93   :  { %6880 = vmatprep.mubr.msk.f32.mxu0 %vm694_vm1, %v4099_v38  ;;  %7100 = vmatpush3.bf16.msra.mxu1 %v7097_v37 }
 0xc94   :  { %v7105_v43 = vpack.c.bf16 %v7273_v17, %v7272_v62  ;;  %7092 = vmatpush3.bf16.msra.mxu0 %v7089_v41  ;;  %v6302_v41 = vadd.f32 -0.11111111, %v10823_v7 }
 0xc95   :  { %7094 = vmatprep.subr.bf16.mxu0 %v7093_v61 }
 0xc96   :  { %6881 = vmatmul.mubr.msk.f32.gmra.mrb[44].mxu0 %vm694_vm1, %v4100_v34  ;;  %6942 = vmatmul.mubr.msk.f32.vlgmr.msra.gmra.mrb[90].mxu1 %vm694_vm1, %v5096_v49 }
 0xc97   :  { %7106 = vmatprep.subr.bf16.mxu1 %v7105_v43  ;;  %6883 = vmatprep.mubr.msk.f32.mxu0 %vm694_vm1, %v4101_v46 }
 0xc98   :  { %6944 = vmatprep.mubr.msk.f32.mxu1 %vm694_vm1, %v5097_v15  ;;  %7108 = vmatpush3.bf16.msra.mxu1 %v7105_v43 }
 0xc9a   :  { %6884 = vmatmul.mubr.msk.f32.gmra.mrb[46].mxu0 %vm694_vm1, %v4102_v4  ;;  %6945 = vmatmul.mubr.msk.f32.gmra.mrb[92].mxu1 %vm694_vm1, %v5098_v33 }
 0xc9b   :  { %6886 = vmatprep.mubr.msk.f32.mxu0 %vm694_vm1, %v4103_v53  ;;  %6947 = vmatprep.mubr.msk.f32.mxu1 %vm694_vm1, %v5099_v44 }
 0xc9e   :  { %6887 = vmatmul.mubr.msk.f32.gmra.mrb[48].mxu0 %vm694_vm1, %v4104_v0  ;;  %6948 = vmatmul.mubr.msk.f32.gmra.mrb[94].mxu1 %vm694_vm1, %v5100_v32 }
 0xc9f   :  { %6950 = vmatprep.mubr.msk.f32.mxu1 %vm694_vm1, %v5101_v59 }
 0xca2   :  { %6951 = vmatmul.mubr.msk.f32.gmra.mrb[96].mxu1 %vm694_vm1, %v5102_v24 }
 0xcc3   :  { %s7192_s27 = spop %7191 }
 0xcc4   :  { %s5579_s9 = smul.f32 0.0017361111, %s7192_s27 }
 0xcc6   :  { %s6301_s4 = sadd.f32 -0.012345679, %s5579_s9 }
 0xcc8   :  { %s5589_s29 = sadd.f32 1e-05, %s6301_s4 }
 0xcca   :  { %v5590_v48 = vstv %s5589_s29 }
 0xccb   :  { %7556 = vrsqrt.f32 %v5590_v48 }
 0xcd5   :  { %v7557_v3 = vpop.eup %7556 }
 0xcd6   :  { %7193 = vpush %v7557_v3  ;;  %v6326_v3 = vld [vmem:[%s11108_s7] ss:$0 sm:$0xff] }
 0xcd8   :  { %v6895_v36 = vpop.f32.mrb[82].mxu1 }
 0xcd9   :  { %v4571_v45 = vpop.f32.mrb[83].mxu1 }
 0xcda   :  { %6909 = vmatprep.mubr.msk.f32.mxu0 %vm694_vm1, %v4571_v45 }
 0xcdb   :  { %6910 = vmatmul.mubr.msk.f32.vlgmr.msra.gmra.mrb[50].mxu0 %vm694_vm1, %v6895_v36 }
 0xcdc   :  { %v6898_v35 = vpop.f32.mrb[84].mxu1  ;;  %7096 = vmatpush3.bf16.msra.mxu0 %v7093_v61 }
 0xcdd   :  { %v4581_v19 = vpop.f32.mrb[85].mxu1  ;;  %7102 = vmatprep.subr.bf16.mxu0 %v7101_v20 }
 0xcde   :  { %6912 = vmatprep.mubr.msk.f32.mxu0 %vm694_vm1, %v4581_v19 }
 0xcdf   :  { %6913 = vmatmul.mubr.msk.f32.gmra.mrb[52].mxu0 %vm694_vm1, %v6898_v35 }
 0xce0   :  { %v6901_v6 = vpop.f32.mrb[86].mxu1 }
 0xce1   :  { %v4591_v2 = vpop.f32.mrb[87].mxu1 }
 0xce2   :  { %6915 = vmatprep.mubr.msk.f32.mxu0 %vm694_vm1, %v4591_v2 }
 0xce3   :  { %6916 = vmatmul.mubr.msk.f32.gmra.mrb[54].mxu0 %vm694_vm1, %v6901_v6 }
 0xce4   :  { %v6904_v22 = vpop.f32.mrb[88].mxu1 }
 0xce5   :  { %v4601_v31 = vpop.f32.mrb[89].mxu1 }
 0xce6   :  { %6918 = vmatprep.mubr.msk.f32.mxu0 %vm694_vm1, %v4601_v31 }
 0xce7   :  { %6919 = vmatmul.mubr.msk.f32.gmra.mrb[56].mxu0 %vm694_vm1, %v6904_v22 }
 0xd07   :  { %s7194_s11 = spop %7193 }
 0xd08   :  { %v5593_v51 = vstv %s7194_s11 }
 0xd09   :  { %v5594_v18 = vmul.f32 %v6302_v41, %v5593_v51  ;;  %v5595_v10 = vmul.f32 %v6303_v30, %v5593_v51  ;;  %v5596_v37 = vmul.f32 %v6304_v55, %v5593_v51  ;;  %v5597_v7 = vmul.f32 %v6305_v63, %v5593_v51 }
 0xd0a   :  { %v5598_v13 = vmul.f32 %v6306_v26, %v5593_v51  ;;  %v5599_v62 = vmul.f32 %v6307_v40, %v5593_v51  ;;  %v5600_v38 = vmul.f32 %v6308_v56, %v5593_v51  ;;  %v5601_v1 = vmul.f32 %v6309_v47, %v5593_v51 }
 0xd0b   :  { %v5602_v52 = vsel %vm693_vm3, %v5594_v18, 0.0  ;;  %v5603_v9 = vsel %vm693_vm3, %v5595_v10, 0.0  ;;  %v5604_v5 = vsel %vm693_vm3, %v5596_v37, 0.0  ;;  %v5605_v17 = vsel %vm693_vm3, %v5597_v7, 0.0 }
 0xd0c   :  { %6973 = vmatprep.mubr.msk.f32.mxu1 %vm694_vm1, %v5602_v52  ;;  %v5606_v39 = vsel %vm693_vm3, %v5598_v13, 0.0  ;;  %v5607_v8 = vsel %vm693_vm3, %v5599_v62, 0.0  ;;  %v5608_v11 = vsel %vm693_vm3, %v5600_v38, 0.0  ;;  %v5609_v43 = vsel %vm693_vm3, %v5601_v1, 0.0 }
 0xd0d   :  { %6974 = vmatmul.mubr.msk.f32.vlgmr.msra.gmra.mrb[98].mxu1 %vm694_vm1, %v5603_v9 }
 0xd0e   :  { %6976 = vmatprep.mubr.msk.f32.mxu1 %vm694_vm1, %v5604_v5 }
 0xd11   :  { %6977 = vmatmul.mubr.msk.f32.gmra.mrb[100].mxu1 %vm694_vm1, %v5605_v17 }
 0xd12   :  { %6979 = vmatprep.mubr.msk.f32.mxu1 %vm694_vm1, %v5606_v39 }
 0xd15   :  { %6980 = vmatmul.mubr.msk.f32.gmra.mrb[102].mxu1 %vm694_vm1, %v5607_v8 }
 0xd16   :  { %6982 = vmatprep.mubr.msk.f32.mxu1 %vm694_vm1, %v5608_v11 }
 0xd19   :  { %6983 = vmatmul.mubr.msk.f32.gmra.mrb[104].mxu1 %vm694_vm1, %v5609_v43 }
 0xd65   :  { %v6879_v34 = vpop.f32.mrb[42].mxu0 }
 0xd66   :  { %v4201_v49 = vpop.f32.mrb[43].mxu0 }
 0xd67   :  { %6925 = vmatprep.mubr.msk.f32.mxu0 %vm694_vm1, %v4201_v49 }
 0xd68   :  { %6926 = vmatmul.mubr.msk.f32.vlgmr.msra.gmra.mrb[50].mxu0 %vm694_vm1, %v6879_v34 }
 0xd69   :  { %v6882_v46 = vpop.f32.mrb[44].mxu0  ;;  %v6943_v50 = vpop.f32.mrb[90].mxu1  ;;  %7104 = vmatpush3.bf16.msra.mxu0 %v7101_v20 }
 0xd6a   :  { %v4211_v23 = vpop.f32.mrb[45].mxu0  ;;  %v5199_v15 = vpop.f32.mrb[91].mxu1  ;;  %7110 = vmatprep.subr.bf16.mxu0 %v7109_v25 }
 0xd6b   :  { %6928 = vmatprep.mubr.msk.f32.mxu0 %vm694_vm1, %v4211_v23 }
 0xd6c   :  { %6929 = vmatmul.mubr.msk.f32.gmra.mrb[52].mxu0 %vm694_vm1, %v6882_v46 }
 0xd6d   :  { %v6885_v54 = vpop.f32.mrb[46].mxu0  ;;  %v6946_v21 = vpop.f32.mrb[92].mxu1 }
 0xd6e   :  { %v4221_v4 = vpop.f32.mrb[47].mxu0  ;;  %v5209_v33 = vpop.f32.mrb[93].mxu1 }
 0xd6f   :  { %6931 = vmatprep.mubr.msk.f32.mxu0 %vm694_vm1, %v4221_v4 }
 0xd70   :  { %6932 = vmatmul.mubr.msk.f32.gmra.mrb[54].mxu0 %vm694_vm1, %v6885_v54 }
 0xd71   :  { %v6888_v60 = vpop.f32.mrb[48].mxu0  ;;  %v6949_v42 = vpop.f32.mrb[94].mxu1 }
 0xd72   :  { %v4231_v16 = vpop.f32.mrb[49].mxu0  ;;  %v5219_v53 = vpop.f32.mrb[95].mxu1 }
 0xd73   :  { %6934 = vmatprep.mubr.msk.f32.mxu0 %vm694_vm1, %v4231_v16 }
 0xd74   :  { %6935 = vmatmul.mubr.msk.f32.gmra.mrb[56].mxu0 %vm694_vm1, %v6888_v60 }
 0xd75   :  { %v6952_v44 = vpop.f32.mrb[96].mxu1  ;;  %6957 = vmatprep.mubr.msk.f32.mxu0 %vm694_vm1, %v5199_v15 }
 0xd76   :  { %v5229_v29 = vpop.f32.mrb[97].mxu1 }
 0xd78   :  { %6958 = vmatmul.mubr.msk.f32.vlgmr.msra.gmra.mrb[50].mxu0 %vm694_vm1, %v6943_v50 }
 0xd79   :  { %6960 = vmatprep.mubr.msk.f32.mxu0 %vm694_vm1, %v5209_v33  ;;  %7112 = vmatpush3.bf16.msra.mxu0 %v7109_v25 }
 0xd7c   :  { %6961 = vmatmul.mubr.msk.f32.gmra.mrb[52].mxu0 %vm694_vm1, %v6946_v21 }
 0xd7d   :  { %6963 = vmatprep.mubr.msk.f32.mxu0 %vm694_vm1, %v5219_v53 }
 0xd80   :  { %6964 = vmatmul.mubr.msk.f32.gmra.mrb[54].mxu0 %vm694_vm1, %v6949_v42 }
 0xd81   :  { %6966 = vmatprep.mubr.msk.f32.mxu0 %vm694_vm1, %v5229_v29 }
 0xd84   :  { %6967 = vmatmul.mubr.msk.f32.gmra.mrb[56].mxu0 %vm694_vm1, %v6952_v44 }
 0xde0   :  { %v6975_v61 = vpop.f32.mrb[98].mxu1 }
 0xde1   :  { %v5706_v58 = vpop.f32.mrb[99].mxu1 }
 0xde2   :  { %6989 = vmatprep.mubr.msk.f32.mxu0 %vm694_vm1, %v5706_v58 }
 0xde3   :  { %6990 = vmatmul.mubr.msk.f32.vlgmr.msra.gmra.mrb[50].mxu0 %vm694_vm1, %v6975_v61 }
 0xde4   :  { %v6978_v0 = vpop.f32.mrb[100].mxu1 }
 0xde5   :  { %v5716_v32 = vpop.f32.mrb[101].mxu1 }
 0xde6   :  { %6992 = vmatprep.mubr.msk.f32.mxu0 %vm694_vm1, %v5716_v32 }
 0xde7   :  { %6993 = vmatmul.mubr.msk.f32.gmra.mrb[52].mxu0 %vm694_vm1, %v6978_v0 }
 0xde8   :  { %v6981_v27 = vpop.f32.mrb[102].mxu1 }
 0xde9   :  { %v5726_v59 = vpop.f32.mrb[103].mxu1 }
 0xdea   :  { %6995 = vmatprep.mubr.msk.f32.mxu0 %vm694_vm1, %v5726_v59 }
 0xdeb   :  { %6996 = vmatmul.mubr.msk.f32.gmra.mrb[54].mxu0 %vm694_vm1, %v6981_v27 }
 0xdec   :  { %v6984_v24 = vpop.f32.mrb[104].mxu1 }
 0xded   :  { %v5736_v48 = vpop.f32.mrb[105].mxu1 }
 0xdee   :  { %6998 = vmatprep.mubr.msk.f32.mxu0 %vm694_vm1, %v5736_v48 }
 0xdef   :  { %6999 = vmatmul.mubr.msk.f32.gmra.mrb[56].mxu0 %vm694_vm1, %v6984_v24 }
 0xeb6   :  { %v6991_v36 = vpop.f32.mrb[50].mxu0 }
 0xeb7   :  { %v5892_v45 = vadd.f32 %v6991_v36, %v6326_v3  ;;  %v5837_v35 = vpop.f32.mrb[51].mxu0 }
 0xeb8   :  { %v5891_v19 = vadd.f32 %v6326_v3, %v5837_v35 }
 0xeb9   :  { %6328 = vst.msk [vmem:[%s11115_s14 + $0x48] sm:$0xff] %vm383_vm0, %v5892_v45 }
 0xeba   :  { %6327 = vst.msk [vmem:[%s11115_s14 + $0x40] sm:$0xff] %vm383_vm0, %v5891_v19  ;;  %v6994_v6 = vpop.f32.mrb[52].mxu0 }
 0xebb   :  { %v5894_v2 = vadd.f32 %v6994_v6, %v6326_v3  ;;  %v5847_v22 = vpop.f32.mrb[53].mxu0 }
 0xebc   :  { %v5893_v31 = vadd.f32 %v6326_v3, %v5847_v22 }
 0xebd   :  { %6330 = vst.msk [vmem:[%s11115_s14 + $0x58] sm:$0xff] %vm383_vm0, %v5894_v2 }
 0xebe   :  { %6329 = vst.msk [vmem:[%s11115_s14 + $0x50] sm:$0xff] %vm383_vm0, %v5893_v31  ;;  %v6997_v28 = vpop.f32.mrb[54].mxu0 }
 0xebf   :  { %v5896_v14 = vadd.f32 %v6997_v28, %v6326_v3  ;;  %v5857_v20 = vpop.f32.mrb[55].mxu0 }
 0xec0   :  { %v5895_v41 = vadd.f32 %v6326_v3, %v5857_v20 }
 0xec1   :  { %6332 = vst.msk [vmem:[%s11115_s14 + $0x68] sm:$0xff] %vm383_vm0, %v5896_v14 }
 0xec2   :  { %6331 = vst.msk [vmem:[%s11115_s14 + $0x60] sm:$0xff] %vm383_vm0, %v5895_v41  ;;  %v7000_v30 = vpop.f32.mrb[56].mxu0 }
 0xec3   :  { %v5898_v55 = vadd.f32 %v7000_v30, %v6326_v3  ;;  %v5867_v51 = vpop.f32.mrb[57].mxu0 }
 0xec4   :  { %v5897_v18 = vadd.f32 %v6326_v3, %v5867_v51 }
 0xec5   :  { %6334 = vst.msk [vmem:[%s11115_s14 + $0x78] sm:$0xff] %vm383_vm0, %v5898_v55 }
 0xec6   :  { %6333 = vst.msk [vmem:[%s11115_s14 + $0x70] sm:$0xff] %vm383_vm0, %v5897_v18 }
 0xec7   :  { %5912 = vsyncpa [#allocation3], 1 }
 0xec8   :  { %5913 = vsyncpa [#allocation5], 1 }

</bundles_post_ra>
